<compile_context>
chip_gen: v7x
topology: tpu7x:2x2x1
jax: 0.10.0
libtpu: 0.0.40
codegen_flags: <defaults>
</compile_context>

<pallas_src>
import math

import jax
import jax.numpy as jnp
from jax.experimental import pallas as pl
from jax.experimental.pallas import tpu as pltpu


PARAM_ORDER = ("ln_g", "ln_b",
               "wqkv1", "bqkv1", "wo1", "bo1",
               "wq2", "bq2", "wkv2", "bkv2", "wo2", "bo2",
               "wf1", "bf1", "wf2", "bf2")


def _pick_tile(n, pref, align):
    """Largest tile <= pref that divides n and is a multiple of `align`
    (falls back to the full extent, which always satisfies the (8,128) rule)."""
    if n <= pref:
        return n
    for t in range(pref, align - 1, -align):
        if n % t == 0:
            return t
    return n


def make_decoder_layer_kernel(d_model, d_ff, heads, tq, tf, approx_gelu=False):
    D, F, H = d_model, d_ff, heads
    HD = D // H
    TQ, TF = tq, tf
    SCALE = 1.0 / math.sqrt(HD)
    RSQRT2 = 1.0 / math.sqrt(2.0)

    def kernel(x_ref, e_ref, tpb_ref, cab_ref, spb_ref,
               ln_g_ref, ln_b_ref,
               wqkv1_ref, bqkv1_ref, wo1_ref, bo1_ref,
               wq2_ref, bq2_ref, wkv2_ref, bkv2_ref, wo2_ref, bo2_ref,
               wf1_ref, bf1_ref, wf2_ref, bf2_ref,
               out_ref,
               kh1_s, vh1_s, kh2_s, vh2_s, qh_s, ao_s):
        qi = pl.program_id(1)
        q0 = pl.multiple_of(qi * TQ, TQ)           # first row of this q-tile

        def layer_norm(v, g, b):
            mu = jnp.mean(v, axis=-1, keepdims=True)
            var = jnp.mean((v - mu) ** 2, axis=-1, keepdims=True)
            return (v - mu) * jax.lax.rsqrt(var + 1e-5) * g + b

        def mm(a, w, b):
            # bf16 MXU operands, f32 accumulation, f32 bias add.
            return (jnp.dot(a.astype(jnp.bfloat16), w,
                            preferred_element_type=jnp.float32) + b)

        # ---- once per batch element: project K/V heads into scratch ----
        @pl.when(qi == 0)
        def _():
            xn = layer_norm(x_ref[0], ln_g_ref[0], ln_b_ref[0])        # (L, D)
            kv1 = mm(xn, wqkv1_ref[:, D:], bqkv1_ref[:, D:])           # (L, 2D)
            kv2 = mm(e_ref[0], wkv2_ref[...], bkv2_ref[...])           # (S, 2D)
            for h in range(H):
                lo, hi = h * HD, (h + 1) * HD
                kh1_s[h] = kv1[:, lo:hi].astype(jnp.bfloat16)
                vh1_s[h] = kv1[:, D + lo:D + hi].astype(jnp.bfloat16)
                kh2_s[h] = kv2[:, lo:hi].astype(jnp.bfloat16)
                vh2_s[h] = kv2[:, D + lo:D + hi].astype(jnp.bfloat16)

        def attend(q, kh, vh, bias):
            # q: (TQ, D) f32; kh/vh: (H, Lk, HD) bf16; bias: (1|H, TQ, Lk) f32.
            qs = q * SCALE                          # scale folded into q once
            for h in range(H):
                qh_s[h] = qs[:, h * HD:(h + 1) * HD].astype(jnp.bfloat16)
            s = jnp.einsum('hqd,hkd->hqk', qh_s[...], kh,
                           preferred_element_type=jnp.float32)
            s = s + bias
            s = s - jnp.max(s, axis=-1, keepdims=True)
            p = jnp.exp(s)
            denom = jnp.sum(p, axis=-1, keepdims=True)        # (H, TQ, 1) f32
            o = jnp.einsum('hqk,hkd->hqd', p.astype(jnp.bfloat16), vh,
                           preferred_element_type=jnp.float32)
            # deferred softmax normalization on the small (H, TQ, HD) output
            o = o * pl.reciprocal(denom, approx=True)
            # TODO(synk): fold this head-merge into the output projection
            # (contract (h, d) against wo reshaped to (H, HD, D)) once a
            # multi-dim-contraction dot lowers cleanly in Mosaic.
            for h in range(H):
                ao_s[:, h * HD:(h + 1) * HD] = o[h]
            return ao_s[...]                         # (TQ, D) f32

        # ---------------- per-query-tile decoder layer ----------------
        x_q = x_ref[0, pl.ds(q0, TQ), :]             # (TQ, D) residual stream

        # self-attention block
        xn_q = layer_norm(x_q, ln_g_ref[0], ln_b_ref[0])
        q1 = mm(xn_q, wqkv1_ref[:, :D], bqkv1_ref[:, :D])
        self_bias = (tpb_ref[0] + cab_ref[pl.ds(q0, TQ), :])[None]   # (1,TQ,L)
        x_q = x_q + mm(attend(q1, kh1_s[...], vh1_s[...], self_bias),
                       wo1_ref[...], bo1_ref[...])       # dropout_1 == identity

        # cross-attention block
        xn_q = layer_norm(x_q, ln_g_ref[1], ln_b_ref[1])
        q2 = mm(xn_q, wq2_ref[...], bq2_ref[...])
        cross_bias = spb_ref[0][None]                                # (1,1,S)
        x_q = x_q + mm(attend(q2, kh2_s[...], vh2_s[...], cross_bias),
                       wo2_ref[...], bo2_ref[...])       # dropout_2 == identity

        # feed-forward block, chunked over d_ff (bounds the live GELU slab)
        xn_q = layer_norm(x_q, ln_g_ref[2], ln_b_ref[2])
        xb = xn_q.astype(jnp.bfloat16)
        ffo = None
        for j0 in range(0, F, TF):
            h1 = (jnp.dot(xb, wf1_ref[:, j0:j0 + TF],
                          preferred_element_type=jnp.float32)
                  + bf1_ref[:, j0:j0 + TF])
            if approx_gelu:
                # optional tanh GELU (EUP) — off by default to match nn.GELU()
                h1 = jax.nn.gelu(h1, approximate=True)
            else:
                h1 = 0.5 * h1 * (1.0 + jax.lax.erf(h1 * RSQRT2))   # exact GELU
            part = jnp.dot(h1.astype(jnp.bfloat16), wf2_ref[j0:j0 + TF, :],
                           preferred_element_type=jnp.float32)
            ffo = part if ffo is None else ffo + part
        out_ref[0] = (x_q + ffo + bf2_ref[...]).astype(out_ref.dtype)  # drop_3 == id

    return kernel


def decoder_layer(x, e_outputs, src_mask, trg_mask, trg_attn_mask, params,
                  d_model, d_ff, heads, approx_gelu=False):
    """x:(B,L,D) f32, e_outputs:(B,S,D) f32, src_mask:(B,S) bool (True==pad),
    trg_mask:(B,L) bool (True==pad), trg_attn_mask:(L,L) bool (True==masked)."""
    B, L, D = x.shape
    S = e_outputs.shape[1]
    H = heads
    HD = D // H
    F = d_ff
    NEG = jnp.float32(-1e9)

    # Small additive padding biases only (no (B, L, L) tensor in HBM).
    trg_pad_bias = jnp.where(trg_mask, NEG, 0.0).astype(jnp.float32)[:, None, :]
    src_pad_bias = jnp.where(src_mask, NEG, 0.0).astype(jnp.float32)[:, None, :]
    causal_bias = jnp.where(trg_attn_mask, NEG, 0.0).astype(jnp.float32)

    # Matmul weights in bf16 (native MXU input); biases / LN params stay f32.
    prepped = {k: (v.astype(jnp.bfloat16) if k.startswith("w")
                   else v.astype(jnp.float32))
               for k, v in params.items()}
    weights = [prepped[k] for k in PARAM_ORDER]

    TQ = _pick_tile(L, 256, 8)      # query tile (>=256 keeps the MXU fed)
    TF = _pick_tile(F, 512, 128)    # d_ff chunk (bounds the (TQ, TF) GELU slab)
    nQ = L // TQ

    kernel = make_decoder_layer_kernel(D, F, H, TQ, TF, approx_gelu)

    def build_call(single_buffer):
        def const_spec(shape):
            # constant-index operands: one VMEM buffer is enough
            n = len(shape)
            if single_buffer:
                return pl.BlockSpec(shape, lambda b, qi, _n=n: (0,) * _n,
                                    pipeline_mode=pl.Buffered(1))
            return pl.BlockSpec(shape, lambda b, qi, _n=n: (0,) * _n)

        in_specs = [
            pl.BlockSpec((1, L, D), lambda b, qi: (b, 0, 0)),   # x (full seq)
            pl.BlockSpec((1, S, D), lambda b, qi: (b, 0, 0)),   # e_outputs
            pl.BlockSpec((1, 1, L), lambda b, qi: (b, 0, 0)),   # trg pad bias
            const_spec((L, L)),                                 # causal bias
            pl.BlockSpec((1, 1, S), lambda b, qi: (b, 0, 0)),   # src pad bias
        ] + [const_spec(w.shape) for w in weights]

        out_specs = pl.BlockSpec((1, TQ, D), lambda b, qi: (b, qi, 0))

        scratch_shapes = [
            pltpu.VMEM((H, L, HD), jnp.bfloat16),   # self-attn K heads
            pltpu.VMEM((H, L, HD), jnp.bfloat16),   # self-attn V heads
            pltpu.VMEM((H, S, HD), jnp.bfloat16),   # cross-attn K heads
            pltpu.VMEM((H, S, HD), jnp.bfloat16),   # cross-attn V heads
            pltpu.VMEM((H, TQ, HD), jnp.bfloat16),  # Q heads (per tile)
            pltpu.VMEM((TQ, D), jnp.float32),       # merged attention output
        ]

        # ---- VMEM budget: real live set + 25% margin, <= 85% of capacity ----
        try:
            cap = int(pltpu.get_tpu_info().vmem_capacity_bytes)
        except Exception:
            cap = 64 << 20                      # conservative (v7x per-TC)
        wf = 1 if single_buffer else 2
        w_bytes = wf * sum(int(w.size) * w.dtype.itemsize for w in weights)
        cab_bytes = wf * 4 * L * L
        blk_bytes = 2 * 4 * (L * D + S * D + L + S + TQ * D)   # pipelined blocks
        scr_bytes = 2 * (2 * H * L * HD + 2 * H * S * HD + H * TQ * HD) + 4 * TQ * D
        live_bytes = 4 * (2 * H * TQ * max(L, S)   # scores + probs (f32)
                          + H * TQ * HD            # attention output
                          + 2 * L * D              # K/V projection at qi == 0
                          + TQ * TF                # FFN chunk
                          + 4 * TQ * D)            # misc f32 temps
        needed = int(1.25 * (w_bytes + cab_bytes + blk_bytes + scr_bytes + live_bytes))
        vmem_limit = int(min(0.85 * cap, max(needed, 16 << 20)))

        return pl.pallas_call(
            kernel,
            out_shape=jax.ShapeDtypeStruct((B, L, D), jnp.float32),
            grid_spec=pltpu.PrefetchScalarGridSpec(
                num_scalar_prefetch=0,
                grid=(B, nQ),
                in_specs=in_specs,
                out_specs=out_specs,
                scratch_shapes=scratch_shapes,
            ),
            compiler_params=pltpu.CompilerParams(
                # batch across the megacore TCs; query-tile axis stays
                # "arbitrary" because it carries the per-batch K/V scratch.
                dimension_semantics=("parallel", "arbitrary"),
                vmem_limit_bytes=vmem_limit,
            ),
        )

    args = (x, e_outputs, trg_pad_bias, causal_bias, src_pad_bias, *weights)
    try:
        # preferred path: single-buffer every constant-index operand
        return jax.block_until_ready(build_call(single_buffer=True)(*args))
    except Exception:
        # fallback if this JAX build rejects pipeline_mode=pl.Buffered(1)
        return jax.block_until_ready(build_call(single_buffer=False)(*args))


def reference_decoder_layer(x, e, self_bias, cross_bias, p, D, F, H):
    """Pure-JAX f32 reference (same math as the PyTorch module), validation only."""
    HD = D // H

    def ln(v, g, b):
        mu = v.mean(-1, keepdims=True)
        var = ((v - mu) ** 2).mean(-1, keepdims=True)
        return (v - mu) / jnp.sqrt(var + 1e-5) * g + b

    def mha(q, k, v, bias):
        B, Lq, _ = q.shape
        Lk = k.shape[1]
        qh = q.reshape(B, Lq, H, HD).transpose(0, 2, 1, 3)
        kh = k.reshape(B, Lk, H, HD).transpose(0, 2, 1, 3)
        vh = v.reshape(B, Lk, H, HD).transpose(0, 2, 1, 3)
        s = jnp.einsum('bhqd,bhkd->bhqk', qh, kh) / math.sqrt(HD)
        s = s + bias[:, None]
        a = jax.nn.softmax(s, axis=-1)
        o = jnp.einsum('bhqk,bhkd->bhqd', a, vh)
        return o.transpose(0, 2, 1, 3).reshape(B, Lq, D)

    x2 = ln(x, p["ln_g"][0], p["ln_b"][0])
    qkv = x2 @ p["wqkv1"] + p["bqkv1"]
    q, k, v = jnp.split(qkv, 3, axis=-1)
    x = x + mha(q, k, v, self_bias) @ p["wo1"] + p["bo1"]

    x2 = ln(x, p["ln_g"][1], p["ln_b"][1])
    q = x2 @ p["wq2"] + p["bq2"]
    kv = e @ p["wkv2"] + p["bkv2"]
    k, v = jnp.split(kv, 2, axis=-1)
    x = x + mha(q, k, v, cross_bias) @ p["wo2"] + p["bo2"]

    x2 = ln(x, p["ln_g"][2], p["ln_b"][2])
    h = x2 @ p["wf1"] + p["bf1"]
    h = 0.5 * h * (1.0 + jax.lax.erf(h / jnp.sqrt(2.0)))
    return x + h @ p["wf2"] + p["bf2"]


if __name__ == "__main__":
    # small shapes consistent with the module
    B, L, S = 2, 8, 8
    D, F, H = 32, 64, 4

    key = jax.random.PRNGKey(0)
    ks = jax.random.split(key, 16)

    def init(k, shape, scale=0.1):
        return (scale * jax.random.normal(k, shape)).astype(jnp.float32)

    params = {
        "ln_g": jnp.ones((3, D), jnp.float32),
        "ln_b": jnp.zeros((3, D), jnp.float32),
        "wqkv1": init(ks[0], (D, 3 * D)), "bqkv1": init(ks[1], (1, 3 * D)),
        "wo1":   init(ks[2], (D, D)),     "bo1":   init(ks[3], (1, D)),
        "wq2":   init(ks[4], (D, D)),     "bq2":   init(ks[5], (1, D)),
        "wkv2":  init(ks[6], (D, 2 * D)), "bkv2":  init(ks[7], (1, 2 * D)),
        "wo2":   init(ks[8], (D, D)),     "bo2":   init(ks[9], (1, D)),
        "wf1":   init(ks[10], (D, F)),    "bf1":   init(ks[11], (1, F)),
        "wf2":   init(ks[12], (F, D)),    "bf2":   init(ks[13], (1, D)),
    }

    x = init(ks[14], (B, L, D), scale=1.0)
    e_outputs = init(ks[15], (B, S, D), scale=1.0)

    # key_padding_masks: True == padded/ignored; attn_mask: causal (True == masked)
    trg_mask = jnp.zeros((B, L), bool).at[1, -1].set(True)
    src_mask = jnp.zeros((B, S), bool).at[0, -2:].set(True)
    trg_attn_mask = jnp.triu(jnp.ones((L, L), bool), k=1)

    out = decoder_layer(x, e_outputs, src_mask, trg_mask, trg_attn_mask,
                        params, D, F, H)
    out = jax.block_until_ready(out)

    # validate against f32 pure-JAX reference (kernel uses bf16 MXU operands,
    # so tolerance is set accordingly)
    NEG = jnp.float32(-1e9)
    self_bias = jnp.where(trg_mask[:, None, :] | trg_attn_mask[None, :, :],
                          NEG, jnp.float32(0.0))
    cross_bias = jnp.where(src_mask[:, None, :], NEG, jnp.float32(0.0))
    ref = reference_decoder_layer(x, e_outputs, self_bias, cross_bias,
                                  params, D, F, H)
    assert out.shape == (B, L, D)
    assert jnp.allclose(out, ref, rtol=3e-2, atol=3e-2), \
        f"max abs diff {jnp.max(jnp.abs(out - ref))}"

    print("KERNEL_OK")
</pallas_src>

<mosaic_0001>
module attributes {stable_mosaic.version = 11 : i64} {
  func.func @kernel(%arg0: i32, %arg1: i32, %arg2: memref<1x8x32xf32, #tpu.memory_space<vmem>>, %arg3: memref<1x8x32xf32, #tpu.memory_space<vmem>>, %arg4: memref<1x1x8xf32, #tpu.memory_space<vmem>>, %arg5: memref<8x8xf32, #tpu.memory_space<vmem>>, %arg6: memref<1x1x8xf32, #tpu.memory_space<vmem>>, %arg7: memref<3x32xf32, #tpu.memory_space<vmem>>, %arg8: memref<3x32xf32, #tpu.memory_space<vmem>>, %arg9: memref<32x96xbf16, #tpu.memory_space<vmem>>, %arg10: memref<1x96xf32, #tpu.memory_space<vmem>>, %arg11: memref<32x32xbf16, #tpu.memory_space<vmem>>, %arg12: memref<1x32xf32, #tpu.memory_space<vmem>>, %arg13: memref<32x32xbf16, #tpu.memory_space<vmem>>, %arg14: memref<1x32xf32, #tpu.memory_space<vmem>>, %arg15: memref<32x64xbf16, #tpu.memory_space<vmem>>, %arg16: memref<1x64xf32, #tpu.memory_space<vmem>>, %arg17: memref<32x32xbf16, #tpu.memory_space<vmem>>, %arg18: memref<1x32xf32, #tpu.memory_space<vmem>>, %arg19: memref<32x64xbf16, #tpu.memory_space<vmem>>, %arg20: memref<1x64xf32, #tpu.memory_space<vmem>>, %arg21: memref<64x32xbf16, #tpu.memory_space<vmem>>, %arg22: memref<1x32xf32, #tpu.memory_space<vmem>>, %arg23: memref<1x8x32xf32, #tpu.memory_space<vmem>>, %arg24: memref<4x8x8xbf16, #tpu.memory_space<vmem>>, %arg25: memref<4x8x8xbf16, #tpu.memory_space<vmem>>, %arg26: memref<4x8x8xbf16, #tpu.memory_space<vmem>>, %arg27: memref<4x8x8xbf16, #tpu.memory_space<vmem>>, %arg28: memref<4x8x8xbf16, #tpu.memory_space<vmem>>, %arg29: memref<8x32xf32, #tpu.memory_space<vmem>>) attributes {dimension_semantics = [#tpu.dimension_semantics<parallel>, #tpu.dimension_semantics<arbitrary>], iteration_bounds = array<i64: 2, 1>, scalar_prefetch = 0 : i64, scratch_operands = 6 : i64, tpu.core_type = #tpu.core_type<tc>, window_params = [{transform_indices = @transform_0, window_bounds = array<i64: 1, 8, 32>}, {transform_indices = @transform_1, window_bounds = array<i64: 1, 8, 32>}, {transform_indices = @transform_2, window_bounds = array<i64: 1, 1, 8>}, {pipeline_mode = #tpu.pipeline_mode<synchronous>, transform_indices = @transform_3, window_bounds = array<i64: 8, 8>}, {transform_indices = @transform_4, window_bounds = array<i64: 1, 1, 8>}, {pipeline_mode = #tpu.pipeline_mode<synchronous>, transform_indices = @transform_5, window_bounds = array<i64: 3, 32>}, {pipeline_mode = #tpu.pipeline_mode<synchronous>, transform_indices = @transform_6, window_bounds = array<i64: 3, 32>}, {pipeline_mode = #tpu.pipeline_mode<synchronous>, transform_indices = @transform_7, window_bounds = array<i64: 32, 96>}, {pipeline_mode = #tpu.pipeline_mode<synchronous>, transform_indices = @transform_8, window_bounds = array<i64: 1, 96>}, {pipeline_mode = #tpu.pipeline_mode<synchronous>, transform_indices = @transform_9, window_bounds = array<i64: 32, 32>}, {pipeline_mode = #tpu.pipeline_mode<synchronous>, transform_indices = @transform_10, window_bounds = array<i64: 1, 32>}, {pipeline_mode = #tpu.pipeline_mode<synchronous>, transform_indices = @transform_11, window_bounds = array<i64: 32, 32>}, {pipeline_mode = #tpu.pipeline_mode<synchronous>, transform_indices = @transform_12, window_bounds = array<i64: 1, 32>}, {pipeline_mode = #tpu.pipeline_mode<synchronous>, transform_indices = @transform_13, window_bounds = array<i64: 32, 64>}, {pipeline_mode = #tpu.pipeline_mode<synchronous>, transform_indices = @transform_14, window_bounds = array<i64: 1, 64>}, {pipeline_mode = #tpu.pipeline_mode<synchronous>, transform_indices = @transform_15, window_bounds = array<i64: 32, 32>}, {pipeline_mode = #tpu.pipeline_mode<synchronous>, transform_indices = @transform_16, window_bounds = array<i64: 1, 32>}, {pipeline_mode = #tpu.pipeline_mode<synchronous>, transform_indices = @transform_17, window_bounds = array<i64: 32, 64>}, {pipeline_mode = #tpu.pipeline_mode<synchronous>, transform_indices = @transform_18, window_bounds = array<i64: 1, 64>}, {pipeline_mode = #tpu.pipeline_mode<synchronous>, transform_indices = @transform_19, window_bounds = array<i64: 64, 32>}, {pipeline_mode = #tpu.pipeline_mode<synchronous>, transform_indices = @transform_20, window_bounds = array<i64: 1, 32>}, {transform_indices = @transform_21, window_bounds = array<i64: 1, 8, 32>}]} {
    %c8_i32 = arith.constant 8 : i32
    %0 = arith.muli %arg1, %c8_i32 : i32
    %1 = tpu.assume_multiple %0, 8 : i32
    %c0_i32 = arith.constant 0 : i32
    %2 = arith.cmpi eq, %arg1, %c0_i32 : i32
    %3 = arith.extui %2 : i1 to i32
    %c0_i32_0 = arith.constant 0 : i32
    %4 = arith.cmpi ne, %3, %c0_i32_0 : i32
    scf.if %4 {
      %c0_137 = arith.constant 0 : index
      %c0_138 = arith.constant 0 : index
      %c0_139 = arith.constant 0 : index
      %258 = vector.load %arg2[%c0_137, %c0_138, %c0_139] : memref<1x8x32xf32, #tpu.memory_space<vmem>>, vector<1x8x32xf32>
      %259 = vector.shape_cast %258 : vector<1x8x32xf32> to vector<8x32xf32>
      %c0_140 = arith.constant 0 : index
      %c0_141 = arith.constant 0 : index
      %260 = vector.load %arg7[%c0_140, %c0_141] : memref<3x32xf32, #tpu.memory_space<vmem>>, vector<1x32xf32>
      %261 = vector.shape_cast %260 : vector<1x32xf32> to vector<32xf32>
      %c0_142 = arith.constant 0 : index
      %c0_143 = arith.constant 0 : index
      %262 = vector.load %arg8[%c0_142, %c0_143] : memref<3x32xf32, #tpu.memory_space<vmem>>, vector<1x32xf32>
      %263 = vector.shape_cast %262 : vector<1x32xf32> to vector<32xf32>
      %cst_144 = arith.constant dense<0.000000e+00> : vector<8xf32>
      %264 = vector.multi_reduction <add>, %259, %cst_144 [1] : vector<8x32xf32> to vector<8xf32>
      %265 = vector.shape_cast %264 : vector<8xf32> to vector<8x1xf32>
      %cst_145 = arith.constant 3.200000e+01 : f32
      %266 = vector.broadcast %cst_145 : f32 to vector<8x1xf32>
      %267 = arith.divf %265, %266 : vector<8x1xf32>
      %268 = vector.broadcast %267 : vector<8x1xf32> to vector<8x32xf32>
      %269 = arith.subf %259, %268 : vector<8x32xf32>
      %270 = arith.mulf %269, %269 : vector<8x32xf32>
      %cst_146 = arith.constant dense<0.000000e+00> : vector<8xf32>
      %271 = vector.multi_reduction <add>, %270, %cst_146 [1] : vector<8x32xf32> to vector<8xf32>
      %272 = vector.shape_cast %271 : vector<8xf32> to vector<8x1xf32>
      %cst_147 = arith.constant 3.200000e+01 : f32
      %273 = vector.broadcast %cst_147 : f32 to vector<8x1xf32>
      %274 = arith.divf %272, %273 : vector<8x1xf32>
      %275 = vector.broadcast %267 : vector<8x1xf32> to vector<8x32xf32>
      %276 = arith.subf %259, %275 : vector<8x32xf32>
      %cst_148 = arith.constant 9.99999974E-6 : f32
      %277 = vector.broadcast %cst_148 : f32 to vector<8x1xf32>
      %278 = arith.addf %274, %277 : vector<8x1xf32>
      %279 = math.rsqrt %278 : vector<8x1xf32>
      %280 = vector.broadcast %279 : vector<8x1xf32> to vector<8x32xf32>
      %281 = arith.mulf %276, %280 : vector<8x32xf32>
      %282 = vector.shape_cast %261 : vector<32xf32> to vector<1x32xf32>
      %283 = vector.broadcast %282 : vector<1x32xf32> to vector<8x32xf32>
      %284 = arith.mulf %281, %283 : vector<8x32xf32>
      %285 = vector.shape_cast %263 : vector<32xf32> to vector<1x32xf32>
      %286 = vector.broadcast %285 : vector<1x32xf32> to vector<8x32xf32>
      %287 = arith.addf %284, %286 : vector<8x32xf32>
      %c0_149 = arith.constant 0 : index
      %c32 = arith.constant 32 : index
      %288 = vector.load %arg9[%c0_149, %c32] : memref<32x96xbf16, #tpu.memory_space<vmem>>, vector<32x64xbf16>
      %c0_150 = arith.constant 0 : index
      %c32_151 = arith.constant 32 : index
      %289 = vector.load %arg10[%c0_150, %c32_151] : memref<1x96xf32, #tpu.memory_space<vmem>>, vector<1x64xf32>
      %290 = arith.truncf %287 : vector<8x32xf32> to vector<8x32xbf16>
      %cst_152 = arith.constant dense<0.000000e+00> : vector<8x64xf32>
      %291 = tpu.matmul %290, %288, %cst_152 {dimension_numbers = #tpu.dot_dimension_numbers<[1], [0], [0], [1], [0, 0, 1, 1], [], []>} : vector<8x32xbf16>, vector<32x64xbf16>, vector<8x64xf32> -> vector<8x64xf32>
      %292 = vector.broadcast %289 : vector<1x64xf32> to vector<8x64xf32>
      %293 = arith.addf %291, %292 : vector<8x64xf32>
      %c0_153 = arith.constant 0 : index
      %c0_154 = arith.constant 0 : index
      %c0_155 = arith.constant 0 : index
      %294 = vector.load %arg3[%c0_153, %c0_154, %c0_155] : memref<1x8x32xf32, #tpu.memory_space<vmem>>, vector<1x8x32xf32>
      %295 = vector.shape_cast %294 : vector<1x8x32xf32> to vector<8x32xf32>
      %c0_156 = arith.constant 0 : index
      %c0_157 = arith.constant 0 : index
      %296 = vector.load %arg15[%c0_156, %c0_157] : memref<32x64xbf16, #tpu.memory_space<vmem>>, vector<32x64xbf16>
      %c0_158 = arith.constant 0 : index
      %c0_159 = arith.constant 0 : index
      %297 = vector.load %arg16[%c0_158, %c0_159] : memref<1x64xf32, #tpu.memory_space<vmem>>, vector<1x64xf32>
      %298 = arith.truncf %295 : vector<8x32xf32> to vector<8x32xbf16>
      %cst_160 = arith.constant dense<0.000000e+00> : vector<8x64xf32>
      %299 = tpu.matmul %298, %296, %cst_160 {dimension_numbers = #tpu.dot_dimension_numbers<[1], [0], [0], [1], [0, 0, 1, 1], [], []>} : vector<8x32xbf16>, vector<32x64xbf16>, vector<8x64xf32> -> vector<8x64xf32>
      %300 = vector.broadcast %297 : vector<1x64xf32> to vector<8x64xf32>
      %301 = arith.addf %299, %300 : vector<8x64xf32>
      %302 = vector.extract_strided_slice %293 {offsets = [0, 0], sizes = [8, 8], strides = [1, 1]} : vector<8x64xf32> to vector<8x8xf32>
      %303 = arith.truncf %302 : vector<8x8xf32> to vector<8x8xbf16>
      %c0_161 = arith.constant 0 : index
      %c0_162 = arith.constant 0 : index
      %c0_163 = arith.constant 0 : index
      %304 = vector.load %arg24[%c0_161, %c0_162, %c0_163] : memref<4x8x8xbf16, #tpu.memory_space<vmem>>, vector<1x8x8xbf16>
      %305 = vector.shape_cast %304 : vector<1x8x8xbf16> to vector<8x8xbf16>
      %306 = vector.shape_cast %303 : vector<8x8xbf16> to vector<1x8x8xbf16>
      tpu.vector_store %arg24[%c0_161, %c0_162, %c0_163], %306 {strides = array<i32>} : memref<4x8x8xbf16, #tpu.memory_space<vmem>>, vector<1x8x8xbf16>,
      %307 = vector.extract_strided_slice %293 {offsets = [0, 32], sizes = [8, 8], strides = [1, 1]} : vector<8x64xf32> to vector<8x8xf32>
      %308 = arith.truncf %307 : vector<8x8xf32> to vector<8x8xbf16>
      %c0_164 = arith.constant 0 : index
      %c0_165 = arith.constant 0 : index
      %c0_166 = arith.constant 0 : index
      %309 = vector.load %arg25[%c0_164, %c0_165, %c0_166] : memref<4x8x8xbf16, #tpu.memory_space<vmem>>, vector<1x8x8xbf16>
      %310 = vector.shape_cast %309 : vector<1x8x8xbf16> to vector<8x8xbf16>
      %311 = vector.shape_cast %308 : vector<8x8xbf16> to vector<1x8x8xbf16>
      tpu.vector_store %arg25[%c0_164, %c0_165, %c0_166], %311 {strides = array<i32>} : memref<4x8x8xbf16, #tpu.memory_space<vmem>>, vector<1x8x8xbf16>,
      %312 = vector.extract_strided_slice %301 {offsets = [0, 0], sizes = [8, 8], strides = [1, 1]} : vector<8x64xf32> to vector<8x8xf32>
      %313 = arith.truncf %312 : vector<8x8xf32> to vector<8x8xbf16>
      %c0_167 = arith.constant 0 : index
      %c0_168 = arith.constant 0 : index
      %c0_169 = arith.constant 0 : index
      %314 = vector.load %arg26[%c0_167, %c0_168, %c0_169] : memref<4x8x8xbf16, #tpu.memory_space<vmem>>, vector<1x8x8xbf16>
      %315 = vector.shape_cast %314 : vector<1x8x8xbf16> to vector<8x8xbf16>
      %316 = vector.shape_cast %313 : vector<8x8xbf16> to vector<1x8x8xbf16>
      tpu.vector_store %arg26[%c0_167, %c0_168, %c0_169], %316 {strides = array<i32>} : memref<4x8x8xbf16, #tpu.memory_space<vmem>>, vector<1x8x8xbf16>,
      %317 = vector.extract_strided_slice %301 {offsets = [0, 32], sizes = [8, 8], strides = [1, 1]} : vector<8x64xf32> to vector<8x8xf32>
      %318 = arith.truncf %317 : vector<8x8xf32> to vector<8x8xbf16>
      %c0_170 = arith.constant 0 : index
      %c0_171 = arith.constant 0 : index
      %c0_172 = arith.constant 0 : index
      %319 = vector.load %arg27[%c0_170, %c0_171, %c0_172] : memref<4x8x8xbf16, #tpu.memory_space<vmem>>, vector<1x8x8xbf16>
      %320 = vector.shape_cast %319 : vector<1x8x8xbf16> to vector<8x8xbf16>
      %321 = vector.shape_cast %318 : vector<8x8xbf16> to vector<1x8x8xbf16>
      tpu.vector_store %arg27[%c0_170, %c0_171, %c0_172], %321 {strides = array<i32>} : memref<4x8x8xbf16, #tpu.memory_space<vmem>>, vector<1x8x8xbf16>,
      %322 = vector.extract_strided_slice %293 {offsets = [0, 8], sizes = [8, 8], strides = [1, 1]} : vector<8x64xf32> to vector<8x8xf32>
      %323 = arith.truncf %322 : vector<8x8xf32> to vector<8x8xbf16>
      %c1_173 = arith.constant 1 : index
      %c0_174 = arith.constant 0 : index
      %c0_175 = arith.constant 0 : index
      %324 = vector.load %arg24[%c1_173, %c0_174, %c0_175] : memref<4x8x8xbf16, #tpu.memory_space<vmem>>, vector<1x8x8xbf16>
      %325 = vector.shape_cast %324 : vector<1x8x8xbf16> to vector<8x8xbf16>
      %326 = vector.shape_cast %323 : vector<8x8xbf16> to vector<1x8x8xbf16>
      tpu.vector_store %arg24[%c1_173, %c0_174, %c0_175], %326 {strides = array<i32>} : memref<4x8x8xbf16, #tpu.memory_space<vmem>>, vector<1x8x8xbf16>,
      %327 = vector.extract_strided_slice %293 {offsets = [0, 40], sizes = [8, 8], strides = [1, 1]} : vector<8x64xf32> to vector<8x8xf32>
      %328 = arith.truncf %327 : vector<8x8xf32> to vector<8x8xbf16>
      %c1_176 = arith.constant 1 : index
      %c0_177 = arith.constant 0 : index
      %c0_178 = arith.constant 0 : index
      %329 = vector.load %arg25[%c1_176, %c0_177, %c0_178] : memref<4x8x8xbf16, #tpu.memory_space<vmem>>, vector<1x8x8xbf16>
      %330 = vector.shape_cast %329 : vector<1x8x8xbf16> to vector<8x8xbf16>
      %331 = vector.shape_cast %328 : vector<8x8xbf16> to vector<1x8x8xbf16>
      tpu.vector_store %arg25[%c1_176, %c0_177, %c0_178], %331 {strides = array<i32>} : memref<4x8x8xbf16, #tpu.memory_space<vmem>>, vector<1x8x8xbf16>,
      %332 = vector.extract_strided_slice %301 {offsets = [0, 8], sizes = [8, 8], strides = [1, 1]} : vector<8x64xf32> to vector<8x8xf32>
      %333 = arith.truncf %332 : vector<8x8xf32> to vector<8x8xbf16>
      %c1_179 = arith.constant 1 : index
      %c0_180 = arith.constant 0 : index
      %c0_181 = arith.constant 0 : index
      %334 = vector.load %arg26[%c1_179, %c0_180, %c0_181] : memref<4x8x8xbf16, #tpu.memory_space<vmem>>, vector<1x8x8xbf16>
      %335 = vector.shape_cast %334 : vector<1x8x8xbf16> to vector<8x8xbf16>
      %336 = vector.shape_cast %333 : vector<8x8xbf16> to vector<1x8x8xbf16>
      tpu.vector_store %arg26[%c1_179, %c0_180, %c0_181], %336 {strides = array<i32>} : memref<4x8x8xbf16, #tpu.memory_space<vmem>>, vector<1x8x8xbf16>,
      %337 = vector.extract_strided_slice %301 {offsets = [0, 40], sizes = [8, 8], strides = [1, 1]} : vector<8x64xf32> to vector<8x8xf32>
      %338 = arith.truncf %337 : vector<8x8xf32> to vector<8x8xbf16>
      %c1_182 = arith.constant 1 : index
      %c0_183 = arith.constant 0 : index
      %c0_184 = arith.constant 0 : index
      %339 = vector.load %arg27[%c1_182, %c0_183, %c0_184] : memref<4x8x8xbf16, #tpu.memory_space<vmem>>, vector<1x8x8xbf16>
      %340 = vector.shape_cast %339 : vector<1x8x8xbf16> to vector<8x8xbf16>
      %341 = vector.shape_cast %338 : vector<8x8xbf16> to vector<1x8x8xbf16>
      tpu.vector_store %arg27[%c1_182, %c0_183, %c0_184], %341 {strides = array<i32>} : memref<4x8x8xbf16, #tpu.memory_space<vmem>>, vector<1x8x8xbf16>,
      %342 = vector.extract_strided_slice %293 {offsets = [0, 16], sizes = [8, 8], strides = [1, 1]} : vector<8x64xf32> to vector<8x8xf32>
      %343 = arith.truncf %342 : vector<8x8xf32> to vector<8x8xbf16>
      %c2_185 = arith.constant 2 : index
      %c0_186 = arith.constant 0 : index
      %c0_187 = arith.constant 0 : index
      %344 = vector.load %arg24[%c2_185, %c0_186, %c0_187] : memref<4x8x8xbf16, #tpu.memory_space<vmem>>, vector<1x8x8xbf16>
      %345 = vector.shape_cast %344 : vector<1x8x8xbf16> to vector<8x8xbf16>
      %346 = vector.shape_cast %343 : vector<8x8xbf16> to vector<1x8x8xbf16>
      tpu.vector_store %arg24[%c2_185, %c0_186, %c0_187], %346 {strides = array<i32>} : memref<4x8x8xbf16, #tpu.memory_space<vmem>>, vector<1x8x8xbf16>,
      %347 = vector.extract_strided_slice %293 {offsets = [0, 48], sizes = [8, 8], strides = [1, 1]} : vector<8x64xf32> to vector<8x8xf32>
      %348 = arith.truncf %347 : vector<8x8xf32> to vector<8x8xbf16>
      %c2_188 = arith.constant 2 : index
      %c0_189 = arith.constant 0 : index
      %c0_190 = arith.constant 0 : index
      %349 = vector.load %arg25[%c2_188, %c0_189, %c0_190] : memref<4x8x8xbf16, #tpu.memory_space<vmem>>, vector<1x8x8xbf16>
      %350 = vector.shape_cast %349 : vector<1x8x8xbf16> to vector<8x8xbf16>
      %351 = vector.shape_cast %348 : vector<8x8xbf16> to vector<1x8x8xbf16>
      tpu.vector_store %arg25[%c2_188, %c0_189, %c0_190], %351 {strides = array<i32>} : memref<4x8x8xbf16, #tpu.memory_space<vmem>>, vector<1x8x8xbf16>,
      %352 = vector.extract_strided_slice %301 {offsets = [0, 16], sizes = [8, 8], strides = [1, 1]} : vector<8x64xf32> to vector<8x8xf32>
      %353 = arith.truncf %352 : vector<8x8xf32> to vector<8x8xbf16>
      %c2_191 = arith.constant 2 : index
      %c0_192 = arith.constant 0 : index
      %c0_193 = arith.constant 0 : index
      %354 = vector.load %arg26[%c2_191, %c0_192, %c0_193] : memref<4x8x8xbf16, #tpu.memory_space<vmem>>, vector<1x8x8xbf16>
      %355 = vector.shape_cast %354 : vector<1x8x8xbf16> to vector<8x8xbf16>
      %356 = vector.shape_cast %353 : vector<8x8xbf16> to vector<1x8x8xbf16>
      tpu.vector_store %arg26[%c2_191, %c0_192, %c0_193], %356 {strides = array<i32>} : memref<4x8x8xbf16, #tpu.memory_space<vmem>>, vector<1x8x8xbf16>,
      %357 = vector.extract_strided_slice %301 {offsets = [0, 48], sizes = [8, 8], strides = [1, 1]} : vector<8x64xf32> to vector<8x8xf32>
      %358 = arith.truncf %357 : vector<8x8xf32> to vector<8x8xbf16>
      %c2_194 = arith.constant 2 : index
      %c0_195 = arith.constant 0 : index
      %c0_196 = arith.constant 0 : index
      %359 = vector.load %arg27[%c2_194, %c0_195, %c0_196] : memref<4x8x8xbf16, #tpu.memory_space<vmem>>, vector<1x8x8xbf16>
      %360 = vector.shape_cast %359 : vector<1x8x8xbf16> to vector<8x8xbf16>
      %361 = vector.shape_cast %358 : vector<8x8xbf16> to vector<1x8x8xbf16>
      tpu.vector_store %arg27[%c2_194, %c0_195, %c0_196], %361 {strides = array<i32>} : memref<4x8x8xbf16, #tpu.memory_space<vmem>>, vector<1x8x8xbf16>,
      %362 = vector.extract_strided_slice %293 {offsets = [0, 24], sizes = [8, 8], strides = [1, 1]} : vector<8x64xf32> to vector<8x8xf32>
      %363 = arith.truncf %362 : vector<8x8xf32> to vector<8x8xbf16>
      %c3_197 = arith.constant 3 : index
      %c0_198 = arith.constant 0 : index
      %c0_199 = arith.constant 0 : index
      %364 = vector.load %arg24[%c3_197, %c0_198, %c0_199] : memref<4x8x8xbf16, #tpu.memory_space<vmem>>, vector<1x8x8xbf16>
      %365 = vector.shape_cast %364 : vector<1x8x8xbf16> to vector<8x8xbf16>
      %366 = vector.shape_cast %363 : vector<8x8xbf16> to vector<1x8x8xbf16>
      tpu.vector_store %arg24[%c3_197, %c0_198, %c0_199], %366 {strides = array<i32>} : memref<4x8x8xbf16, #tpu.memory_space<vmem>>, vector<1x8x8xbf16>,
      %367 = vector.extract_strided_slice %293 {offsets = [0, 56], sizes = [8, 8], strides = [1, 1]} : vector<8x64xf32> to vector<8x8xf32>
      %368 = arith.truncf %367 : vector<8x8xf32> to vector<8x8xbf16>
      %c3_200 = arith.constant 3 : index
      %c0_201 = arith.constant 0 : index
      %c0_202 = arith.constant 0 : index
      %369 = vector.load %arg25[%c3_200, %c0_201, %c0_202] : memref<4x8x8xbf16, #tpu.memory_space<vmem>>, vector<1x8x8xbf16>
      %370 = vector.shape_cast %369 : vector<1x8x8xbf16> to vector<8x8xbf16>
      %371 = vector.shape_cast %368 : vector<8x8xbf16> to vector<1x8x8xbf16>
      tpu.vector_store %arg25[%c3_200, %c0_201, %c0_202], %371 {strides = array<i32>} : memref<4x8x8xbf16, #tpu.memory_space<vmem>>, vector<1x8x8xbf16>,
      %372 = vector.extract_strided_slice %301 {offsets = [0, 24], sizes = [8, 8], strides = [1, 1]} : vector<8x64xf32> to vector<8x8xf32>
      %373 = arith.truncf %372 : vector<8x8xf32> to vector<8x8xbf16>
      %c3_203 = arith.constant 3 : index
      %c0_204 = arith.constant 0 : index
      %c0_205 = arith.constant 0 : index
      %374 = vector.load %arg26[%c3_203, %c0_204, %c0_205] : memref<4x8x8xbf16, #tpu.memory_space<vmem>>, vector<1x8x8xbf16>
      %375 = vector.shape_cast %374 : vector<1x8x8xbf16> to vector<8x8xbf16>
      %376 = vector.shape_cast %373 : vector<8x8xbf16> to vector<1x8x8xbf16>
      tpu.vector_store %arg26[%c3_203, %c0_204, %c0_205], %376 {strides = array<i32>} : memref<4x8x8xbf16, #tpu.memory_space<vmem>>, vector<1x8x8xbf16>,
      %377 = vector.extract_strided_slice %301 {offsets = [0, 56], sizes = [8, 8], strides = [1, 1]} : vector<8x64xf32> to vector<8x8xf32>
      %378 = arith.truncf %377 : vector<8x8xf32> to vector<8x8xbf16>
      %c3_206 = arith.constant 3 : index
      %c0_207 = arith.constant 0 : index
      %c0_208 = arith.constant 0 : index
      %379 = vector.load %arg27[%c3_206, %c0_207, %c0_208] : memref<4x8x8xbf16, #tpu.memory_space<vmem>>, vector<1x8x8xbf16>
      %380 = vector.shape_cast %379 : vector<1x8x8xbf16> to vector<8x8xbf16>
      %381 = vector.shape_cast %378 : vector<8x8xbf16> to vector<1x8x8xbf16>
      tpu.vector_store %arg27[%c3_206, %c0_207, %c0_208], %381 {strides = array<i32>} : memref<4x8x8xbf16, #tpu.memory_space<vmem>>, vector<1x8x8xbf16>,
    } else {
    }
    %c0 = arith.constant 0 : index
    %5 = arith.index_cast %1 : i32 to index
    %c0_1 = arith.constant 0 : index
    %6 = vector.load %arg2[%c0, %5, %c0_1] : memref<1x8x32xf32, #tpu.memory_space<vmem>>, vector<1x8x32xf32>
    %7 = vector.shape_cast %6 : vector<1x8x32xf32> to vector<8x32xf32>
    %c0_2 = arith.constant 0 : index
    %c0_3 = arith.constant 0 : index
    %8 = vector.load %arg7[%c0_2, %c0_3] : memref<3x32xf32, #tpu.memory_space<vmem>>, vector<1x32xf32>
    %9 = vector.shape_cast %8 : vector<1x32xf32> to vector<32xf32>
    %c0_4 = arith.constant 0 : index
    %c0_5 = arith.constant 0 : index
    %10 = vector.load %arg8[%c0_4, %c0_5] : memref<3x32xf32, #tpu.memory_space<vmem>>, vector<1x32xf32>
    %11 = vector.shape_cast %10 : vector<1x32xf32> to vector<32xf32>
    %cst = arith.constant dense<0.000000e+00> : vector<8xf32>
    %12 = vector.multi_reduction <add>, %7, %cst [1] : vector<8x32xf32> to vector<8xf32>
    %13 = vector.shape_cast %12 : vector<8xf32> to vector<8x1xf32>
    %cst_6 = arith.constant 3.200000e+01 : f32
    %14 = vector.broadcast %cst_6 : f32 to vector<8x1xf32>
    %15 = arith.divf %13, %14 : vector<8x1xf32>
    %16 = vector.broadcast %15 : vector<8x1xf32> to vector<8x32xf32>
    %17 = arith.subf %7, %16 : vector<8x32xf32>
    %18 = arith.mulf %17, %17 : vector<8x32xf32>
    %cst_7 = arith.constant dense<0.000000e+00> : vector<8xf32>
    %19 = vector.multi_reduction <add>, %18, %cst_7 [1] : vector<8x32xf32> to vector<8xf32>
    %20 = vector.shape_cast %19 : vector<8xf32> to vector<8x1xf32>
    %cst_8 = arith.constant 3.200000e+01 : f32
    %21 = vector.broadcast %cst_8 : f32 to vector<8x1xf32>
    %22 = arith.divf %20, %21 : vector<8x1xf32>
    %23 = vector.broadcast %15 : vector<8x1xf32> to vector<8x32xf32>
    %24 = arith.subf %7, %23 : vector<8x32xf32>
    %cst_9 = arith.constant 9.99999974E-6 : f32
    %25 = vector.broadcast %cst_9 : f32 to vector<8x1xf32>
    %26 = arith.addf %22, %25 : vector<8x1xf32>
    %27 = math.rsqrt %26 : vector<8x1xf32>
    %28 = vector.broadcast %27 : vector<8x1xf32> to vector<8x32xf32>
    %29 = arith.mulf %24, %28 : vector<8x32xf32>
    %30 = vector.shape_cast %9 : vector<32xf32> to vector<1x32xf32>
    %31 = vector.broadcast %30 : vector<1x32xf32> to vector<8x32xf32>
    %32 = arith.mulf %29, %31 : vector<8x32xf32>
    %33 = vector.shape_cast %11 : vector<32xf32> to vector<1x32xf32>
    %34 = vector.broadcast %33 : vector<1x32xf32> to vector<8x32xf32>
    %35 = arith.addf %32, %34 : vector<8x32xf32>
    %c0_10 = arith.constant 0 : index
    %c0_11 = arith.constant 0 : index
    %36 = vector.load %arg9[%c0_10, %c0_11] : memref<32x96xbf16, #tpu.memory_space<vmem>>, vector<32x32xbf16>
    %c0_12 = arith.constant 0 : index
    %c0_13 = arith.constant 0 : index
    %37 = vector.load %arg10[%c0_12, %c0_13] : memref<1x96xf32, #tpu.memory_space<vmem>>, vector<1x32xf32>
    %38 = arith.truncf %35 : vector<8x32xf32> to vector<8x32xbf16>
    %cst_14 = arith.constant dense<0.000000e+00> : vector<8x32xf32>
    %39 = tpu.matmul %38, %36, %cst_14 {dimension_numbers = #tpu.dot_dimension_numbers<[1], [0], [0], [1], [0, 0, 1, 1], [], []>} : vector<8x32xbf16>, vector<32x32xbf16>, vector<8x32xf32> -> vector<8x32xf32>
    %40 = vector.broadcast %37 : vector<1x32xf32> to vector<8x32xf32>
    %41 = arith.addf %39, %40 : vector<8x32xf32>
    %c0_15 = arith.constant 0 : index
    %c0_16 = arith.constant 0 : index
    %c0_17 = arith.constant 0 : index
    %42 = vector.load %arg4[%c0_15, %c0_16, %c0_17] : memref<1x1x8xf32, #tpu.memory_space<vmem>>, vector<1x1x8xf32>
    %43 = vector.shape_cast %42 : vector<1x1x8xf32> to vector<1x8xf32>
    %44 = arith.index_cast %1 : i32 to index
    %c0_18 = arith.constant 0 : index
    %45 = vector.load %arg5[%44, %c0_18] : memref<8x8xf32, #tpu.memory_space<vmem>>, vector<8x8xf32>
    %46 = vector.broadcast %43 : vector<1x8xf32> to vector<8x8xf32>
    %47 = arith.addf %46, %45 : vector<8x8xf32>
    %48 = vector.shape_cast %47 : vector<8x8xf32> to vector<1x8x8xf32>
    %c0_19 = arith.constant 0 : index
    %c0_20 = arith.constant 0 : index
    %c0_21 = arith.constant 0 : index
    %49 = vector.load %arg24[%c0_19, %c0_20, %c0_21] : memref<4x8x8xbf16, #tpu.memory_space<vmem>>, vector<4x8x8xbf16>
    %c0_22 = arith.constant 0 : index
    %c0_23 = arith.constant 0 : index
    %c0_24 = arith.constant 0 : index
    %50 = vector.load %arg25[%c0_22, %c0_23, %c0_24] : memref<4x8x8xbf16, #tpu.memory_space<vmem>>, vector<4x8x8xbf16>
    %cst_25 = arith.constant 0.353553385 : f32
    %51 = vector.broadcast %cst_25 : f32 to vector<8x32xf32>
    %52 = arith.mulf %41, %51 : vector<8x32xf32>
    %53 = vector.extract_strided_slice %52 {offsets = [0, 0], sizes = [8, 8], strides = [1, 1]} : vector<8x32xf32> to vector<8x8xf32>
    %54 = arith.truncf %53 : vector<8x8xf32> to vector<8x8xbf16>
    %c0_26 = arith.constant 0 : index
    %c0_27 = arith.constant 0 : index
    %c0_28 = arith.constant 0 : index
    %55 = vector.load %arg28[%c0_26, %c0_27, %c0_28] : memref<4x8x8xbf16, #tpu.memory_space<vmem>>, vector<1x8x8xbf16>
    %56 = vector.shape_cast %55 : vector<1x8x8xbf16> to vector<8x8xbf16>
    %57 = vector.shape_cast %54 : vector<8x8xbf16> to vector<1x8x8xbf16>
    tpu.vector_store %arg28[%c0_26, %c0_27, %c0_28], %57 {strides = array<i32>} : memref<4x8x8xbf16, #tpu.memory_space<vmem>>, vector<1x8x8xbf16>,
    %58 = vector.extract_strided_slice %52 {offsets = [0, 8], sizes = [8, 8], strides = [1, 1]} : vector<8x32xf32> to vector<8x8xf32>
    %59 = arith.truncf %58 : vector<8x8xf32> to vector<8x8xbf16>
    %c1 = arith.constant 1 : index
    %c0_29 = arith.constant 0 : index
    %c0_30 = arith.constant 0 : index
    %60 = vector.load %arg28[%c1, %c0_29, %c0_30] : memref<4x8x8xbf16, #tpu.memory_space<vmem>>, vector<1x8x8xbf16>
    %61 = vector.shape_cast %60 : vector<1x8x8xbf16> to vector<8x8xbf16>
    %62 = vector.shape_cast %59 : vector<8x8xbf16> to vector<1x8x8xbf16>
    tpu.vector_store %arg28[%c1, %c0_29, %c0_30], %62 {strides = array<i32>} : memref<4x8x8xbf16, #tpu.memory_space<vmem>>, vector<1x8x8xbf16>,
    %63 = vector.extract_strided_slice %52 {offsets = [0, 16], sizes = [8, 8], strides = [1, 1]} : vector<8x32xf32> to vector<8x8xf32>
    %64 = arith.truncf %63 : vector<8x8xf32> to vector<8x8xbf16>
    %c2 = arith.constant 2 : index
    %c0_31 = arith.constant 0 : index
    %c0_32 = arith.constant 0 : index
    %65 = vector.load %arg28[%c2, %c0_31, %c0_32] : memref<4x8x8xbf16, #tpu.memory_space<vmem>>, vector<1x8x8xbf16>
    %66 = vector.shape_cast %65 : vector<1x8x8xbf16> to vector<8x8xbf16>
    %67 = vector.shape_cast %64 : vector<8x8xbf16> to vector<1x8x8xbf16>
    tpu.vector_store %arg28[%c2, %c0_31, %c0_32], %67 {strides = array<i32>} : memref<4x8x8xbf16, #tpu.memory_space<vmem>>, vector<1x8x8xbf16>,
    %68 = vector.extract_strided_slice %52 {offsets = [0, 24], sizes = [8, 8], strides = [1, 1]} : vector<8x32xf32> to vector<8x8xf32>
    %69 = arith.truncf %68 : vector<8x8xf32> to vector<8x8xbf16>
    %c3 = arith.constant 3 : index
    %c0_33 = arith.constant 0 : index
    %c0_34 = arith.constant 0 : index
    %70 = vector.load %arg28[%c3, %c0_33, %c0_34] : memref<4x8x8xbf16, #tpu.memory_space<vmem>>, vector<1x8x8xbf16>
    %71 = vector.shape_cast %70 : vector<1x8x8xbf16> to vector<8x8xbf16>
    %72 = vector.shape_cast %69 : vector<8x8xbf16> to vector<1x8x8xbf16>
    tpu.vector_store %arg28[%c3, %c0_33, %c0_34], %72 {strides = array<i32>} : memref<4x8x8xbf16, #tpu.memory_space<vmem>>, vector<1x8x8xbf16>,
    %c0_35 = arith.constant 0 : index
    %c0_36 = arith.constant 0 : index
    %c0_37 = arith.constant 0 : index
    %73 = vector.load %arg28[%c0_35, %c0_36, %c0_37] : memref<4x8x8xbf16, #tpu.memory_space<vmem>>, vector<4x8x8xbf16>
    "tpu.trace_start"() <{level = 10 : i32, message = "hqd,hkd->hqk"}> : () -> ()
    %cst_38 = arith.constant dense<0.000000e+00> : vector<4x8x8xf32>
    %74 = tpu.matmul %73, %49, %cst_38 {dimension_numbers = #tpu.dot_dimension_numbers<[2], [2], [1], [1], [0, 0, 0, 1, 1, 1], [0], [0]>} : vector<4x8x8xbf16>, vector<4x8x8xbf16>, vector<4x8x8xf32> -> vector<4x8x8xf32>
    "tpu.trace_stop"() : () -> ()
    %75 = vector.broadcast %48 : vector<1x8x8xf32> to vector<4x8x8xf32>
    %76 = arith.addf %74, %75 : vector<4x8x8xf32>
    %cst_39 = arith.constant dense<0xFF800000> : vector<4x8xf32>
    %77 = vector.multi_reduction <maximumf>, %76, %cst_39 [2] : vector<4x8x8xf32> to vector<4x8xf32>
    %78 = vector.shape_cast %77 : vector<4x8xf32> to vector<4x8x1xf32>
    %79 = vector.broadcast %78 : vector<4x8x1xf32> to vector<4x8x8xf32>
    %80 = arith.subf %76, %79 : vector<4x8x8xf32>
    %81 = math.exp %80 : vector<4x8x8xf32>
    %cst_40 = arith.constant dense<0.000000e+00> : vector<4x8xf32>
    %82 = vector.multi_reduction <add>, %81, %cst_40 [2] : vector<4x8x8xf32> to vector<4x8xf32>
    %83 = vector.shape_cast %82 : vector<4x8xf32> to vector<4x8x1xf32>
    %84 = arith.truncf %81 : vector<4x8x8xf32> to vector<4x8x8xbf16>
    "tpu.trace_start"() <{level = 10 : i32, message = "hqk,hkd->hqd"}> : () -> ()
    %cst_41 = arith.constant dense<0.000000e+00> : vector<4x8x8xf32>
    %85 = tpu.matmul %84, %50, %cst_41 {dimension_numbers = #tpu.dot_dimension_numbers<[2], [1], [1], [2], [0, 0, 0, 1, 1, 2], [0], [0]>} : vector<4x8x8xbf16>, vector<4x8x8xbf16>, vector<4x8x8xf32> -> vector<4x8x8xf32>
    "tpu.trace_stop"() : () -> ()
    %86 = tpu.reciprocal %83 {approx = true} : vector<4x8x1xf32> -> vector<4x8x1xf32>
    %87 = vector.broadcast %86 : vector<4x8x1xf32> to vector<4x8x8xf32>
    %88 = arith.mulf %85, %87 : vector<4x8x8xf32>
    %89 = vector.extract_strided_slice %88 {offsets = [0, 0, 0], sizes = [1, 8, 8], strides = [1, 1, 1]} : vector<4x8x8xf32> to vector<1x8x8xf32>
    %90 = vector.shape_cast %89 : vector<1x8x8xf32> to vector<8x8xf32>
    %c0_42 = arith.constant 0 : index
    %c0_43 = arith.constant 0 : index
    %91 = vector.load %arg29[%c0_42, %c0_43] : memref<8x32xf32, #tpu.memory_space<vmem>>, vector<8x8xf32>
    tpu.vector_store %arg29[%c0_42, %c0_43], %90 {strides = array<i32>} : memref<8x32xf32, #tpu.memory_space<vmem>>, vector<8x8xf32>,
    %92 = vector.extract_strided_slice %88 {offsets = [1, 0, 0], sizes = [1, 8, 8], strides = [1, 1, 1]} : vector<4x8x8xf32> to vector<1x8x8xf32>
    %93 = vector.shape_cast %92 : vector<1x8x8xf32> to vector<8x8xf32>
    %c0_44 = arith.constant 0 : index
    %c8 = arith.constant 8 : index
    %94 = vector.load %arg29[%c0_44, %c8] : memref<8x32xf32, #tpu.memory_space<vmem>>, vector<8x8xf32>
    tpu.vector_store %arg29[%c0_44, %c8], %93 {strides = array<i32>} : memref<8x32xf32, #tpu.memory_space<vmem>>, vector<8x8xf32>,
    %95 = vector.extract_strided_slice %88 {offsets = [2, 0, 0], sizes = [1, 8, 8], strides = [1, 1, 1]} : vector<4x8x8xf32> to vector<1x8x8xf32>
    %96 = vector.shape_cast %95 : vector<1x8x8xf32> to vector<8x8xf32>
    %c0_45 = arith.constant 0 : index
    %c16 = arith.constant 16 : index
    %97 = vector.load %arg29[%c0_45, %c16] : memref<8x32xf32, #tpu.memory_space<vmem>>, vector<8x8xf32>
    tpu.vector_store %arg29[%c0_45, %c16], %96 {strides = array<i32>} : memref<8x32xf32, #tpu.memory_space<vmem>>, vector<8x8xf32>,
    %98 = vector.extract_strided_slice %88 {offsets = [3, 0, 0], sizes = [1, 8, 8], strides = [1, 1, 1]} : vector<4x8x8xf32> to vector<1x8x8xf32>
    %99 = vector.shape_cast %98 : vector<1x8x8xf32> to vector<8x8xf32>
    %c0_46 = arith.constant 0 : index
    %c24 = arith.constant 24 : index
    %100 = vector.load %arg29[%c0_46, %c24] : memref<8x32xf32, #tpu.memory_space<vmem>>, vector<8x8xf32>
    tpu.vector_store %arg29[%c0_46, %c24], %99 {strides = array<i32>} : memref<8x32xf32, #tpu.memory_space<vmem>>, vector<8x8xf32>,
    %c0_47 = arith.constant 0 : index
    %c0_48 = arith.constant 0 : index
    %101 = vector.load %arg29[%c0_47, %c0_48] : memref<8x32xf32, #tpu.memory_space<vmem>>, vector<8x32xf32>
    %c0_49 = arith.constant 0 : index
    %c0_50 = arith.constant 0 : index
    %102 = vector.load %arg11[%c0_49, %c0_50] : memref<32x32xbf16, #tpu.memory_space<vmem>>, vector<32x32xbf16>
    %c0_51 = arith.constant 0 : index
    %c0_52 = arith.constant 0 : index
    %103 = vector.load %arg12[%c0_51, %c0_52] : memref<1x32xf32, #tpu.memory_space<vmem>>, vector<1x32xf32>
    %104 = arith.truncf %101 : vector<8x32xf32> to vector<8x32xbf16>
    %cst_53 = arith.constant dense<0.000000e+00> : vector<8x32xf32>
    %105 = tpu.matmul %104, %102, %cst_53 {dimension_numbers = #tpu.dot_dimension_numbers<[1], [0], [0], [1], [0, 0, 1, 1], [], []>} : vector<8x32xbf16>, vector<32x32xbf16>, vector<8x32xf32> -> vector<8x32xf32>
    %106 = vector.broadcast %103 : vector<1x32xf32> to vector<8x32xf32>
    %107 = arith.addf %105, %106 : vector<8x32xf32>
    %108 = arith.addf %7, %107 : vector<8x32xf32>
    %c1_54 = arith.constant 1 : index
    %c0_55 = arith.constant 0 : index
    %109 = vector.load %arg7[%c1_54, %c0_55] : memref<3x32xf32, #tpu.memory_space<vmem>>, vector<1x32xf32>
    %110 = vector.shape_cast %109 : vector<1x32xf32> to vector<32xf32>
    %c1_56 = arith.constant 1 : index
    %c0_57 = arith.constant 0 : index
    %111 = vector.load %arg8[%c1_56, %c0_57] : memref<3x32xf32, #tpu.memory_space<vmem>>, vector<1x32xf32>
    %112 = vector.shape_cast %111 : vector<1x32xf32> to vector<32xf32>
    %cst_58 = arith.constant dense<0.000000e+00> : vector<8xf32>
    %113 = vector.multi_reduction <add>, %108, %cst_58 [1] : vector<8x32xf32> to vector<8xf32>
    %114 = vector.shape_cast %113 : vector<8xf32> to vector<8x1xf32>
    %cst_59 = arith.constant 3.200000e+01 : f32
    %115 = vector.broadcast %cst_59 : f32 to vector<8x1xf32>
    %116 = arith.divf %114, %115 : vector<8x1xf32>
    %117 = vector.broadcast %116 : vector<8x1xf32> to vector<8x32xf32>
    %118 = arith.subf %108, %117 : vector<8x32xf32>
    %119 = arith.mulf %118, %118 : vector<8x32xf32>
    %cst_60 = arith.constant dense<0.000000e+00> : vector<8xf32>
    %120 = vector.multi_reduction <add>, %119, %cst_60 [1] : vector<8x32xf32> to vector<8xf32>
    %121 = vector.shape_cast %120 : vector<8xf32> to vector<8x1xf32>
    %cst_61 = arith.constant 3.200000e+01 : f32
    %122 = vector.broadcast %cst_61 : f32 to vector<8x1xf32>
    %123 = arith.divf %121, %122 : vector<8x1xf32>
    %124 = vector.broadcast %116 : vector<8x1xf32> to vector<8x32xf32>
    %125 = arith.subf %108, %124 : vector<8x32xf32>
    %cst_62 = arith.constant 9.99999974E-6 : f32
    %126 = vector.broadcast %cst_62 : f32 to vector<8x1xf32>
    %127 = arith.addf %123, %126 : vector<8x1xf32>
    %128 = math.rsqrt %127 : vector<8x1xf32>
    %129 = vector.broadcast %128 : vector<8x1xf32> to vector<8x32xf32>
    %130 = arith.mulf %125, %129 : vector<8x32xf32>
    %131 = vector.shape_cast %110 : vector<32xf32> to vector<1x32xf32>
    %132 = vector.broadcast %131 : vector<1x32xf32> to vector<8x32xf32>
    %133 = arith.mulf %130, %132 : vector<8x32xf32>
    %134 = vector.shape_cast %112 : vector<32xf32> to vector<1x32xf32>
    %135 = vector.broadcast %134 : vector<1x32xf32> to vector<8x32xf32>
    %136 = arith.addf %133, %135 : vector<8x32xf32>
    %c0_63 = arith.constant 0 : index
    %c0_64 = arith.constant 0 : index
    %137 = vector.load %arg13[%c0_63, %c0_64] : memref<32x32xbf16, #tpu.memory_space<vmem>>, vector<32x32xbf16>
    %c0_65 = arith.constant 0 : index
    %c0_66 = arith.constant 0 : index
    %138 = vector.load %arg14[%c0_65, %c0_66] : memref<1x32xf32, #tpu.memory_space<vmem>>, vector<1x32xf32>
    %139 = arith.truncf %136 : vector<8x32xf32> to vector<8x32xbf16>
    %cst_67 = arith.constant dense<0.000000e+00> : vector<8x32xf32>
    %140 = tpu.matmul %139, %137, %cst_67 {dimension_numbers = #tpu.dot_dimension_numbers<[1], [0], [0], [1], [0, 0, 1, 1], [], []>} : vector<8x32xbf16>, vector<32x32xbf16>, vector<8x32xf32> -> vector<8x32xf32>
    %141 = vector.broadcast %138 : vector<1x32xf32> to vector<8x32xf32>
    %142 = arith.addf %140, %141 : vector<8x32xf32>
    %c0_68 = arith.constant 0 : index
    %c0_69 = arith.constant 0 : index
    %c0_70 = arith.constant 0 : index
    %143 = vector.load %arg6[%c0_68, %c0_69, %c0_70] : memref<1x1x8xf32, #tpu.memory_space<vmem>>, vector<1x1x8xf32>
    %144 = vector.shape_cast %143 : vector<1x1x8xf32> to vector<1x8xf32>
    %145 = vector.shape_cast %144 : vector<1x8xf32> to vector<1x1x8xf32>
    %c0_71 = arith.constant 0 : index
    %c0_72 = arith.constant 0 : index
    %c0_73 = arith.constant 0 : index
    %146 = vector.load %arg26[%c0_71, %c0_72, %c0_73] : memref<4x8x8xbf16, #tpu.memory_space<vmem>>, vector<4x8x8xbf16>
    %c0_74 = arith.constant 0 : index
    %c0_75 = arith.constant 0 : index
    %c0_76 = arith.constant 0 : index
    %147 = vector.load %arg27[%c0_74, %c0_75, %c0_76] : memref<4x8x8xbf16, #tpu.memory_space<vmem>>, vector<4x8x8xbf16>
    %cst_77 = arith.constant 0.353553385 : f32
    %148 = vector.broadcast %cst_77 : f32 to vector<8x32xf32>
    %149 = arith.mulf %142, %148 : vector<8x32xf32>
    %150 = vector.extract_strided_slice %149 {offsets = [0, 0], sizes = [8, 8], strides = [1, 1]} : vector<8x32xf32> to vector<8x8xf32>
    %151 = arith.truncf %150 : vector<8x8xf32> to vector<8x8xbf16>
    %c0_78 = arith.constant 0 : index
    %c0_79 = arith.constant 0 : index
    %c0_80 = arith.constant 0 : index
    %152 = vector.load %arg28[%c0_78, %c0_79, %c0_80] : memref<4x8x8xbf16, #tpu.memory_space<vmem>>, vector<1x8x8xbf16>
    %153 = vector.shape_cast %152 : vector<1x8x8xbf16> to vector<8x8xbf16>
    %154 = vector.shape_cast %151 : vector<8x8xbf16> to vector<1x8x8xbf16>
    tpu.vector_store %arg28[%c0_78, %c0_79, %c0_80], %154 {strides = array<i32>} : memref<4x8x8xbf16, #tpu.memory_space<vmem>>, vector<1x8x8xbf16>,
    %155 = vector.extract_strided_slice %149 {offsets = [0, 8], sizes = [8, 8], strides = [1, 1]} : vector<8x32xf32> to vector<8x8xf32>
    %156 = arith.truncf %155 : vector<8x8xf32> to vector<8x8xbf16>
    %c1_81 = arith.constant 1 : index
    %c0_82 = arith.constant 0 : index
    %c0_83 = arith.constant 0 : index
    %157 = vector.load %arg28[%c1_81, %c0_82, %c0_83] : memref<4x8x8xbf16, #tpu.memory_space<vmem>>, vector<1x8x8xbf16>
    %158 = vector.shape_cast %157 : vector<1x8x8xbf16> to vector<8x8xbf16>
    %159 = vector.shape_cast %156 : vector<8x8xbf16> to vector<1x8x8xbf16>
    tpu.vector_store %arg28[%c1_81, %c0_82, %c0_83], %159 {strides = array<i32>} : memref<4x8x8xbf16, #tpu.memory_space<vmem>>, vector<1x8x8xbf16>,
    %160 = vector.extract_strided_slice %149 {offsets = [0, 16], sizes = [8, 8], strides = [1, 1]} : vector<8x32xf32> to vector<8x8xf32>
    %161 = arith.truncf %160 : vector<8x8xf32> to vector<8x8xbf16>
    %c2_84 = arith.constant 2 : index
    %c0_85 = arith.constant 0 : index
    %c0_86 = arith.constant 0 : index
    %162 = vector.load %arg28[%c2_84, %c0_85, %c0_86] : memref<4x8x8xbf16, #tpu.memory_space<vmem>>, vector<1x8x8xbf16>
    %163 = vector.shape_cast %162 : vector<1x8x8xbf16> to vector<8x8xbf16>
    %164 = vector.shape_cast %161 : vector<8x8xbf16> to vector<1x8x8xbf16>
    tpu.vector_store %arg28[%c2_84, %c0_85, %c0_86], %164 {strides = array<i32>} : memref<4x8x8xbf16, #tpu.memory_space<vmem>>, vector<1x8x8xbf16>,
    %165 = vector.extract_strided_slice %149 {offsets = [0, 24], sizes = [8, 8], strides = [1, 1]} : vector<8x32xf32> to vector<8x8xf32>
    %166 = arith.truncf %165 : vector<8x8xf32> to vector<8x8xbf16>
    %c3_87 = arith.constant 3 : index
    %c0_88 = arith.constant 0 : index
    %c0_89 = arith.constant 0 : index
    %167 = vector.load %arg28[%c3_87, %c0_88, %c0_89] : memref<4x8x8xbf16, #tpu.memory_space<vmem>>, vector<1x8x8xbf16>
    %168 = vector.shape_cast %167 : vector<1x8x8xbf16> to vector<8x8xbf16>
    %169 = vector.shape_cast %166 : vector<8x8xbf16> to vector<1x8x8xbf16>
    tpu.vector_store %arg28[%c3_87, %c0_88, %c0_89], %169 {strides = array<i32>} : memref<4x8x8xbf16, #tpu.memory_space<vmem>>, vector<1x8x8xbf16>,
    %c0_90 = arith.constant 0 : index
    %c0_91 = arith.constant 0 : index
    %c0_92 = arith.constant 0 : index
    %170 = vector.load %arg28[%c0_90, %c0_91, %c0_92] : memref<4x8x8xbf16, #tpu.memory_space<vmem>>, vector<4x8x8xbf16>
    "tpu.trace_start"() <{level = 10 : i32, message = "hqd,hkd->hqk"}> : () -> ()
    %cst_93 = arith.constant dense<0.000000e+00> : vector<4x8x8xf32>
    %171 = tpu.matmul %170, %146, %cst_93 {dimension_numbers = #tpu.dot_dimension_numbers<[2], [2], [1], [1], [0, 0, 0, 1, 1, 1], [0], [0]>} : vector<4x8x8xbf16>, vector<4x8x8xbf16>, vector<4x8x8xf32> -> vector<4x8x8xf32>
    "tpu.trace_stop"() : () -> ()
    %172 = vector.broadcast %145 : vector<1x1x8xf32> to vector<4x8x8xf32>
    %173 = arith.addf %171, %172 : vector<4x8x8xf32>
    %cst_94 = arith.constant dense<0xFF800000> : vector<4x8xf32>
    %174 = vector.multi_reduction <maximumf>, %173, %cst_94 [2] : vector<4x8x8xf32> to vector<4x8xf32>
    %175 = vector.shape_cast %174 : vector<4x8xf32> to vector<4x8x1xf32>
    %176 = vector.broadcast %175 : vector<4x8x1xf32> to vector<4x8x8xf32>
    %177 = arith.subf %173, %176 : vector<4x8x8xf32>
    %178 = math.exp %177 : vector<4x8x8xf32>
    %cst_95 = arith.constant dense<0.000000e+00> : vector<4x8xf32>
    %179 = vector.multi_reduction <add>, %178, %cst_95 [2] : vector<4x8x8xf32> to vector<4x8xf32>
    %180 = vector.shape_cast %179 : vector<4x8xf32> to vector<4x8x1xf32>
    %181 = arith.truncf %178 : vector<4x8x8xf32> to vector<4x8x8xbf16>
    "tpu.trace_start"() <{level = 10 : i32, message = "hqk,hkd->hqd"}> : () -> ()
    %cst_96 = arith.constant dense<0.000000e+00> : vector<4x8x8xf32>
    %182 = tpu.matmul %181, %147, %cst_96 {dimension_numbers = #tpu.dot_dimension_numbers<[2], [1], [1], [2], [0, 0, 0, 1, 1, 2], [0], [0]>} : vector<4x8x8xbf16>, vector<4x8x8xbf16>, vector<4x8x8xf32> -> vector<4x8x8xf32>
    "tpu.trace_stop"() : () -> ()
    %183 = tpu.reciprocal %180 {approx = true} : vector<4x8x1xf32> -> vector<4x8x1xf32>
    %184 = vector.broadcast %183 : vector<4x8x1xf32> to vector<4x8x8xf32>
    %185 = arith.mulf %182, %184 : vector<4x8x8xf32>
    %186 = vector.extract_strided_slice %185 {offsets = [0, 0, 0], sizes = [1, 8, 8], strides = [1, 1, 1]} : vector<4x8x8xf32> to vector<1x8x8xf32>
    %187 = vector.shape_cast %186 : vector<1x8x8xf32> to vector<8x8xf32>
    %c0_97 = arith.constant 0 : index
    %c0_98 = arith.constant 0 : index
    %188 = vector.load %arg29[%c0_97, %c0_98] : memref<8x32xf32, #tpu.memory_space<vmem>>, vector<8x8xf32>
    tpu.vector_store %arg29[%c0_97, %c0_98], %187 {strides = array<i32>} : memref<8x32xf32, #tpu.memory_space<vmem>>, vector<8x8xf32>,
    %189 = vector.extract_strided_slice %185 {offsets = [1, 0, 0], sizes = [1, 8, 8], strides = [1, 1, 1]} : vector<4x8x8xf32> to vector<1x8x8xf32>
    %190 = vector.shape_cast %189 : vector<1x8x8xf32> to vector<8x8xf32>
    %c0_99 = arith.constant 0 : index
    %c8_100 = arith.constant 8 : index
    %191 = vector.load %arg29[%c0_99, %c8_100] : memref<8x32xf32, #tpu.memory_space<vmem>>, vector<8x8xf32>
    tpu.vector_store %arg29[%c0_99, %c8_100], %190 {strides = array<i32>} : memref<8x32xf32, #tpu.memory_space<vmem>>, vector<8x8xf32>,
    %192 = vector.extract_strided_slice %185 {offsets = [2, 0, 0], sizes = [1, 8, 8], strides = [1, 1, 1]} : vector<4x8x8xf32> to vector<1x8x8xf32>
    %193 = vector.shape_cast %192 : vector<1x8x8xf32> to vector<8x8xf32>
    %c0_101 = arith.constant 0 : index
    %c16_102 = arith.constant 16 : index
    %194 = vector.load %arg29[%c0_101, %c16_102] : memref<8x32xf32, #tpu.memory_space<vmem>>, vector<8x8xf32>
    tpu.vector_store %arg29[%c0_101, %c16_102], %193 {strides = array<i32>} : memref<8x32xf32, #tpu.memory_space<vmem>>, vector<8x8xf32>,
    %195 = vector.extract_strided_slice %185 {offsets = [3, 0, 0], sizes = [1, 8, 8], strides = [1, 1, 1]} : vector<4x8x8xf32> to vector<1x8x8xf32>
    %196 = vector.shape_cast %195 : vector<1x8x8xf32> to vector<8x8xf32>
    %c0_103 = arith.constant 0 : index
    %c24_104 = arith.constant 24 : index
    %197 = vector.load %arg29[%c0_103, %c24_104] : memref<8x32xf32, #tpu.memory_space<vmem>>, vector<8x8xf32>
    tpu.vector_store %arg29[%c0_103, %c24_104], %196 {strides = array<i32>} : memref<8x32xf32, #tpu.memory_space<vmem>>, vector<8x8xf32>,
    %c0_105 = arith.constant 0 : index
    %c0_106 = arith.constant 0 : index
    %198 = vector.load %arg29[%c0_105, %c0_106] : memref<8x32xf32, #tpu.memory_space<vmem>>, vector<8x32xf32>
    %c0_107 = arith.constant 0 : index
    %c0_108 = arith.constant 0 : index
    %199 = vector.load %arg17[%c0_107, %c0_108] : memref<32x32xbf16, #tpu.memory_space<vmem>>, vector<32x32xbf16>
    %c0_109 = arith.constant 0 : index
    %c0_110 = arith.constant 0 : index
    %200 = vector.load %arg18[%c0_109, %c0_110] : memref<1x32xf32, #tpu.memory_space<vmem>>, vector<1x32xf32>
    %201 = arith.truncf %198 : vector<8x32xf32> to vector<8x32xbf16>
    %cst_111 = arith.constant dense<0.000000e+00> : vector<8x32xf32>
    %202 = tpu.matmul %201, %199, %cst_111 {dimension_numbers = #tpu.dot_dimension_numbers<[1], [0], [0], [1], [0, 0, 1, 1], [], []>} : vector<8x32xbf16>, vector<32x32xbf16>, vector<8x32xf32> -> vector<8x32xf32>
    %203 = vector.broadcast %200 : vector<1x32xf32> to vector<8x32xf32>
    %204 = arith.addf %202, %203 : vector<8x32xf32>
    %205 = arith.addf %108, %204 : vector<8x32xf32>
    %c2_112 = arith.constant 2 : index
    %c0_113 = arith.constant 0 : index
    %206 = vector.load %arg7[%c2_112, %c0_113] : memref<3x32xf32, #tpu.memory_space<vmem>>, vector<1x32xf32>
    %207 = vector.shape_cast %206 : vector<1x32xf32> to vector<32xf32>
    %c2_114 = arith.constant 2 : index
    %c0_115 = arith.constant 0 : index
    %208 = vector.load %arg8[%c2_114, %c0_115] : memref<3x32xf32, #tpu.memory_space<vmem>>, vector<1x32xf32>
    %209 = vector.shape_cast %208 : vector<1x32xf32> to vector<32xf32>
    %cst_116 = arith.constant dense<0.000000e+00> : vector<8xf32>
    %210 = vector.multi_reduction <add>, %205, %cst_116 [1] : vector<8x32xf32> to vector<8xf32>
    %211 = vector.shape_cast %210 : vector<8xf32> to vector<8x1xf32>
    %cst_117 = arith.constant 3.200000e+01 : f32
    %212 = vector.broadcast %cst_117 : f32 to vector<8x1xf32>
    %213 = arith.divf %211, %212 : vector<8x1xf32>
    %214 = vector.broadcast %213 : vector<8x1xf32> to vector<8x32xf32>
    %215 = arith.subf %205, %214 : vector<8x32xf32>
    %216 = arith.mulf %215, %215 : vector<8x32xf32>
    %cst_118 = arith.constant dense<0.000000e+00> : vector<8xf32>
    %217 = vector.multi_reduction <add>, %216, %cst_118 [1] : vector<8x32xf32> to vector<8xf32>
    %218 = vector.shape_cast %217 : vector<8xf32> to vector<8x1xf32>
    %cst_119 = arith.constant 3.200000e+01 : f32
    %219 = vector.broadcast %cst_119 : f32 to vector<8x1xf32>
    %220 = arith.divf %218, %219 : vector<8x1xf32>
    %221 = vector.broadcast %213 : vector<8x1xf32> to vector<8x32xf32>
    %222 = arith.subf %205, %221 : vector<8x32xf32>
    %cst_120 = arith.constant 9.99999974E-6 : f32
    %223 = vector.broadcast %cst_120 : f32 to vector<8x1xf32>
    %224 = arith.addf %220, %223 : vector<8x1xf32>
    %225 = math.rsqrt %224 : vector<8x1xf32>
    %226 = vector.broadcast %225 : vector<8x1xf32> to vector<8x32xf32>
    %227 = arith.mulf %222, %226 : vector<8x32xf32>
    %228 = vector.shape_cast %207 : vector<32xf32> to vector<1x32xf32>
    %229 = vector.broadcast %228 : vector<1x32xf32> to vector<8x32xf32>
    %230 = arith.mulf %227, %229 : vector<8x32xf32>
    %231 = vector.shape_cast %209 : vector<32xf32> to vector<1x32xf32>
    %232 = vector.broadcast %231 : vector<1x32xf32> to vector<8x32xf32>
    %233 = arith.addf %230, %232 : vector<8x32xf32>
    %234 = arith.truncf %233 : vector<8x32xf32> to vector<8x32xbf16>
    %c0_121 = arith.constant 0 : index
    %c0_122 = arith.constant 0 : index
    %235 = vector.load %arg19[%c0_121, %c0_122] : memref<32x64xbf16, #tpu.memory_space<vmem>>, vector<32x64xbf16>
    %cst_123 = arith.constant dense<0.000000e+00> : vector<8x64xf32>
    %236 = tpu.matmul %234, %235, %cst_123 {dimension_numbers = #tpu.dot_dimension_numbers<[1], [0], [0], [1], [0, 0, 1, 1], [], []>} : vector<8x32xbf16>, vector<32x64xbf16>, vector<8x64xf32> -> vector<8x64xf32>
    %c0_124 = arith.constant 0 : index
    %c0_125 = arith.constant 0 : index
    %237 = vector.load %arg20[%c0_124, %c0_125] : memref<1x64xf32, #tpu.memory_space<vmem>>, vector<1x64xf32>
    %238 = vector.broadcast %237 : vector<1x64xf32> to vector<8x64xf32>
    %239 = arith.addf %236, %238 : vector<8x64xf32>
    %cst_126 = arith.constant 5.000000e-01 : f32
    %240 = vector.broadcast %cst_126 : f32 to vector<8x64xf32>
    %241 = arith.mulf %240, %239 : vector<8x64xf32>
    %cst_127 = arith.constant 0.707106769 : f32
    %242 = vector.broadcast %cst_127 : f32 to vector<8x64xf32>
    %243 = arith.mulf %239, %242 : vector<8x64xf32>
    %244 = math.erf %243 : vector<8x64xf32>
    %cst_128 = arith.constant 1.000000e+00 : f32
    %245 = vector.broadcast %cst_128 : f32 to vector<8x64xf32>
    %246 = arith.addf %245, %244 : vector<8x64xf32>
    %247 = arith.mulf %241, %246 : vector<8x64xf32>
    %248 = arith.truncf %247 : vector<8x64xf32> to vector<8x64xbf16>
    %c0_129 = arith.constant 0 : index
    %c0_130 = arith.constant 0 : index
    %249 = vector.load %arg21[%c0_129, %c0_130] : memref<64x32xbf16, #tpu.memory_space<vmem>>, vector<64x32xbf16>
    %cst_131 = arith.constant dense<0.000000e+00> : vector<8x32xf32>
    %250 = tpu.matmul %248, %249, %cst_131 {dimension_numbers = #tpu.dot_dimension_numbers<[1], [0], [0], [1], [0, 0, 1, 1], [], []>} : vector<8x64xbf16>, vector<64x32xbf16>, vector<8x32xf32> -> vector<8x32xf32>
    %251 = arith.addf %205, %250 : vector<8x32xf32>
    %c0_132 = arith.constant 0 : index
    %c0_133 = arith.constant 0 : index
    %252 = vector.load %arg22[%c0_132, %c0_133] : memref<1x32xf32, #tpu.memory_space<vmem>>, vector<1x32xf32>
    %253 = vector.broadcast %252 : vector<1x32xf32> to vector<8x32xf32>
    %254 = arith.addf %251, %253 : vector<8x32xf32>
    %c0_134 = arith.constant 0 : index
    %c0_135 = arith.constant 0 : index
    %c0_136 = arith.constant 0 : index
    %255 = vector.load %arg23[%c0_134, %c0_135, %c0_136] : memref<1x8x32xf32, #tpu.memory_space<vmem>>, vector<1x8x32xf32>
    %256 = vector.shape_cast %255 : vector<1x8x32xf32> to vector<8x32xf32>
    %257 = vector.shape_cast %254 : vector<8x32xf32> to vector<1x8x32xf32>
    tpu.vector_store %arg23[%c0_134, %c0_135, %c0_136], %257 {strides = array<i32>} : memref<1x8x32xf32, #tpu.memory_space<vmem>>, vector<1x8x32xf32>,
    return
  }
  func.func @transform_0(%arg0: i32, %arg1: i32) -> (i32, i32, i32) {
    %c0_i32 = arith.constant 0 : i32
    %c0_i32_0 = arith.constant 0 : i32
    %c0_i32_1 = arith.constant 0 : i32
    return %arg0, %c0_i32, %c0_i32_0 : i32, i32, i32
  }
  func.func @transform_1(%arg0: i32, %arg1: i32) -> (i32, i32, i32) {
    %c0_i32 = arith.constant 0 : i32
    %c0_i32_0 = arith.constant 0 : i32
    %c0_i32_1 = arith.constant 0 : i32
    return %arg0, %c0_i32, %c0_i32_0 : i32, i32, i32
  }
  func.func @transform_2(%arg0: i32, %arg1: i32) -> (i32, i32, i32) {
    %c0_i32 = arith.constant 0 : i32
    %c0_i32_0 = arith.constant 0 : i32
    %c0_i32_1 = arith.constant 0 : i32
    return %arg0, %c0_i32, %c0_i32_0 : i32, i32, i32
  }
  func.func @transform_3(%arg0: i32, %arg1: i32) -> (i32, i32) {
    %c0_i32 = arith.constant 0 : i32
    %c0_i32_0 = arith.constant 0 : i32
    %c0_i32_1 = arith.constant 0 : i32
    return %c0_i32, %c0_i32_0 : i32, i32
  }
  func.func @transform_4(%arg0: i32, %arg1: i32) -> (i32, i32, i32) {
    %c0_i32 = arith.constant 0 : i32
    %c0_i32_0 = arith.constant 0 : i32
    %c0_i32_1 = arith.constant 0 : i32
    return %arg0, %c0_i32, %c0_i32_0 : i32, i32, i32
  }
  func.func @transform_5(%arg0: i32, %arg1: i32) -> (i32, i32) {
    %c0_i32 = arith.constant 0 : i32
    %c0_i32_0 = arith.constant 0 : i32
    %c0_i32_1 = arith.constant 0 : i32
    return %c0_i32, %c0_i32_0 : i32, i32
  }
  func.func @transform_6(%arg0: i32, %arg1: i32) -> (i32, i32) {
    %c0_i32 = arith.constant 0 : i32
    %c0_i32_0 = arith.constant 0 : i32
    %c0_i32_1 = arith.constant 0 : i32
    return %c0_i32, %c0_i32_0 : i32, i32
  }
  func.func @transform_7(%arg0: i32, %arg1: i32) -> (i32, i32) {
    %c0_i32 = arith.constant 0 : i32
    %c0_i32_0 = arith.constant 0 : i32
    %c0_i32_1 = arith.constant 0 : i32
    return %c0_i32, %c0_i32_0 : i32, i32
  }
  func.func @transform_8(%arg0: i32, %arg1: i32) -> (i32, i32) {
    %c0_i32 = arith.constant 0 : i32
    %c0_i32_0 = arith.constant 0 : i32
    %c0_i32_1 = arith.constant 0 : i32
    return %c0_i32, %c0_i32_0 : i32, i32
  }
  func.func @transform_9(%arg0: i32, %arg1: i32) -> (i32, i32) {
    %c0_i32 = arith.constant 0 : i32
    %c0_i32_0 = arith.constant 0 : i32
    %c0_i32_1 = arith.constant 0 : i32
    return %c0_i32, %c0_i32_0 : i32, i32
  }
  func.func @transform_10(%arg0: i32, %arg1: i32) -> (i32, i32) {
    %c0_i32 = arith.constant 0 : i32
    %c0_i32_0 = arith.constant 0 : i32
    %c0_i32_1 = arith.constant 0 : i32
    return %c0_i32, %c0_i32_0 : i32, i32
  }
  func.func @transform_11(%arg0: i32, %arg1: i32) -> (i32, i32) {
    %c0_i32 = arith.constant 0 : i32
    %c0_i32_0 = arith.constant 0 : i32
    %c0_i32_1 = arith.constant 0 : i32
    return %c0_i32, %c0_i32_0 : i32, i32
  }
  func.func @transform_12(%arg0: i32, %arg1: i32) -> (i32, i32) {
    %c0_i32 = arith.constant 0 : i32
    %c0_i32_0 = arith.constant 0 : i32
    %c0_i32_1 = arith.constant 0 : i32
    return %c0_i32, %c0_i32_0 : i32, i32
  }
  func.func @transform_13(%arg0: i32, %arg1: i32) -> (i32, i32) {
    %c0_i32 = arith.constant 0 : i32
    %c0_i32_0 = arith.constant 0 : i32
    %c0_i32_1 = arith.constant 0 : i32
    return %c0_i32, %c0_i32_0 : i32, i32
  }
  func.func @transform_14(%arg0: i32, %arg1: i32) -> (i32, i32) {
    %c0_i32 = arith.constant 0 : i32
    %c0_i32_0 = arith.constant 0 : i32
    %c0_i32_1 = arith.constant 0 : i32
    return %c0_i32, %c0_i32_0 : i32, i32
  }
  func.func @transform_15(%arg0: i32, %arg1: i32) -> (i32, i32) {
    %c0_i32 = arith.constant 0 : i32
    %c0_i32_0 = arith.constant 0 : i32
    %c0_i32_1 = arith.constant 0 : i32
    return %c0_i32, %c0_i32_0 : i32, i32
  }
  func.func @transform_16(%arg0: i32, %arg1: i32) -> (i32, i32) {
    %c0_i32 = arith.constant 0 : i32
    %c0_i32_0 = arith.constant 0 : i32
    %c0_i32_1 = arith.constant 0 : i32
    return %c0_i32, %c0_i32_0 : i32, i32
  }
  func.func @transform_17(%arg0: i32, %arg1: i32) -> (i32, i32) {
    %c0_i32 = arith.constant 0 : i32
    %c0_i32_0 = arith.constant 0 : i32
    %c0_i32_1 = arith.constant 0 : i32
    return %c0_i32, %c0_i32_0 : i32, i32
  }
  func.func @transform_18(%arg0: i32, %arg1: i32) -> (i32, i32) {
    %c0_i32 = arith.constant 0 : i32
    %c0_i32_0 = arith.constant 0 : i32
    %c0_i32_1 = arith.constant 0 : i32
    return %c0_i32, %c0_i32_0 : i32, i32
  }
  func.func @transform_19(%arg0: i32, %arg1: i32) -> (i32, i32) {
    %c0_i32 = arith.constant 0 : i32
    %c0_i32_0 = arith.constant 0 : i32
    %c0_i32_1 = arith.constant 0 : i32
    return %c0_i32, %c0_i32_0 : i32, i32
  }
  func.func @transform_20(%arg0: i32, %arg1: i32) -> (i32, i32) {
    %c0_i32 = arith.constant 0 : i32
    %c0_i32_0 = arith.constant 0 : i32
    %c0_i32_1 = arith.constant 0 : i32
    return %c0_i32, %c0_i32_0 : i32, i32
  }
  func.func @transform_21(%arg0: i32, %arg1: i32) -> (i32, i32, i32) {
    %c0_i32 = arith.constant 0 : i32
    %c0_i32_0 = arith.constant 0 : i32
    return %arg0, %arg1, %c0_i32 : i32, i32, i32
  }
}

module attributes {stable_mosaic.version = 11 : i64} {
  func.func @kernel(%arg0: i32, %arg1: i32, %arg2: memref<1x8x32xf32, #tpu.memory_space<vmem>>, %arg3: memref<1x8x32xf32, #tpu.memory_space<vmem>>, %arg4: memref<1x1x8xf32, #tpu.memory_space<vmem>>, %arg5: memref<8x8xf32, #tpu.memory_space<vmem>>, %arg6: memref<1x1x8xf32, #tpu.memory_space<vmem>>, %arg7: memref<3x32xf32, #tpu.memory_space<vmem>>, %arg8: memref<3x32xf32, #tpu.memory_space<vmem>>, %arg9: memref<32x96xbf16, #tpu.memory_space<vmem>>, %arg10: memref<1x96xf32, #tpu.memory_space<vmem>>, %arg11: memref<32x32xbf16, #tpu.memory_space<vmem>>, %arg12: memref<1x32xf32, #tpu.memory_space<vmem>>, %arg13: memref<32x32xbf16, #tpu.memory_space<vmem>>, %arg14: memref<1x32xf32, #tpu.memory_space<vmem>>, %arg15: memref<32x64xbf16, #tpu.memory_space<vmem>>, %arg16: memref<1x64xf32, #tpu.memory_space<vmem>>, %arg17: memref<32x32xbf16, #tpu.memory_space<vmem>>, %arg18: memref<1x32xf32, #tpu.memory_space<vmem>>, %arg19: memref<32x64xbf16, #tpu.memory_space<vmem>>, %arg20: memref<1x64xf32, #tpu.memory_space<vmem>>, %arg21: memref<64x32xbf16, #tpu.memory_space<vmem>>, %arg22: memref<1x32xf32, #tpu.memory_space<vmem>>, %arg23: memref<1x8x32xf32, #tpu.memory_space<vmem>>, %arg24: memref<4x8x8xbf16, #tpu.memory_space<vmem>>, %arg25: memref<4x8x8xbf16, #tpu.memory_space<vmem>>, %arg26: memref<4x8x8xbf16, #tpu.memory_space<vmem>>, %arg27: memref<4x8x8xbf16, #tpu.memory_space<vmem>>, %arg28: memref<4x8x8xbf16, #tpu.memory_space<vmem>>, %arg29: memref<8x32xf32, #tpu.memory_space<vmem>>) attributes {dimension_semantics = [#tpu.dimension_semantics<parallel>, #tpu.dimension_semantics<arbitrary>], iteration_bounds = array<i64: 2, 1>, scalar_prefetch = 0 : i64, scratch_operands = 6 : i64, tpu.core_type = #tpu.core_type<tc>, window_params = [{transform_indices = @transform_0, window_bounds = array<i64: 1, 8, 32>}, {transform_indices = @transform_1, window_bounds = array<i64: 1, 8, 32>}, {transform_indices = @transform_2, window_bounds = array<i64: 1, 1, 8>}, {pipeline_mode = #tpu.pipeline_mode<synchronous>, transform_indices = @transform_3, window_bounds = array<i64: 8, 8>}, {transform_indices = @transform_4, window_bounds = array<i64: 1, 1, 8>}, {pipeline_mode = #tpu.pipeline_mode<synchronous>, transform_indices = @transform_5, window_bounds = array<i64: 3, 32>}, {pipeline_mode = #tpu.pipeline_mode<synchronous>, transform_indices = @transform_6, window_bounds = array<i64: 3, 32>}, {pipeline_mode = #tpu.pipeline_mode<synchronous>, transform_indices = @transform_7, window_bounds = array<i64: 32, 96>}, {pipeline_mode = #tpu.pipeline_mode<synchronous>, transform_indices = @transform_8, window_bounds = array<i64: 1, 96>}, {pipeline_mode = #tpu.pipeline_mode<synchronous>, transform_indices = @transform_9, window_bounds = array<i64: 32, 32>}, {pipeline_mode = #tpu.pipeline_mode<synchronous>, transform_indices = @transform_10, window_bounds = array<i64: 1, 32>}, {pipeline_mode = #tpu.pipeline_mode<synchronous>, transform_indices = @transform_11, window_bounds = array<i64: 32, 32>}, {pipeline_mode = #tpu.pipeline_mode<synchronous>, transform_indices = @transform_12, window_bounds = array<i64: 1, 32>}, {pipeline_mode = #tpu.pipeline_mode<synchronous>, transform_indices = @transform_13, window_bounds = array<i64: 32, 64>}, {pipeline_mode = #tpu.pipeline_mode<synchronous>, transform_indices = @transform_14, window_bounds = array<i64: 1, 64>}, {pipeline_mode = #tpu.pipeline_mode<synchronous>, transform_indices = @transform_15, window_bounds = array<i64: 32, 32>}, {pipeline_mode = #tpu.pipeline_mode<synchronous>, transform_indices = @transform_16, window_bounds = array<i64: 1, 32>}, {pipeline_mode = #tpu.pipeline_mode<synchronous>, transform_indices = @transform_17, window_bounds = array<i64: 32, 64>}, {pipeline_mode = #tpu.pipeline_mode<synchronous>, transform_indices = @transform_18, window_bounds = array<i64: 1, 64>}, {pipeline_mode = #tpu.pipeline_mode<synchronous>, transform_indices = @transform_19, window_bounds = array<i64: 64, 32>}, {pipeline_mode = #tpu.pipeline_mode<synchronous>, transform_indices = @transform_20, window_bounds = array<i64: 1, 32>}, {transform_indices = @transform_21, window_bounds = array<i64: 1, 8, 32>}]} {
    %c8_i32 = arith.constant 8 : i32
    %0 = arith.muli %arg1, %c8_i32 : i32
    %1 = tpu.assume_multiple %0, 8 : i32
    %c0_i32 = arith.constant 0 : i32
    %2 = arith.cmpi eq, %arg1, %c0_i32 : i32
    %3 = arith.extui %2 : i1 to i32
    %c0_i32_0 = arith.constant 0 : i32
    %4 = arith.cmpi ne, %3, %c0_i32_0 : i32
    scf.if %4 {
      %c0_137 = arith.constant 0 : index
      %c0_138 = arith.constant 0 : index
      %c0_139 = arith.constant 0 : index
      %258 = vector.load %arg2[%c0_137, %c0_138, %c0_139] : memref<1x8x32xf32, #tpu.memory_space<vmem>>, vector<1x8x32xf32>
      %259 = vector.shape_cast %258 : vector<1x8x32xf32> to vector<8x32xf32>
      %c0_140 = arith.constant 0 : index
      %c0_141 = arith.constant 0 : index
      %260 = vector.load %arg7[%c0_140, %c0_141] : memref<3x32xf32, #tpu.memory_space<vmem>>, vector<1x32xf32>
      %261 = vector.shape_cast %260 : vector<1x32xf32> to vector<32xf32>
      %c0_142 = arith.constant 0 : index
      %c0_143 = arith.constant 0 : index
      %262 = vector.load %arg8[%c0_142, %c0_143] : memref<3x32xf32, #tpu.memory_space<vmem>>, vector<1x32xf32>
      %263 = vector.shape_cast %262 : vector<1x32xf32> to vector<32xf32>
      %cst_144 = arith.constant dense<0.000000e+00> : vector<8xf32>
      %264 = vector.multi_reduction <add>, %259, %cst_144 [1] : vector<8x32xf32> to vector<8xf32>
      %265 = vector.shape_cast %264 : vector<8xf32> to vector<8x1xf32>
      %cst_145 = arith.constant 3.200000e+01 : f32
      %266 = vector.broadcast %cst_145 : f32 to vector<8x1xf32>
      %267 = arith.divf %265, %266 : vector<8x1xf32>
      %268 = vector.broadcast %267 : vector<8x1xf32> to vector<8x32xf32>
      %269 = arith.subf %259, %268 : vector<8x32xf32>
      %270 = arith.mulf %269, %269 : vector<8x32xf32>
      %cst_146 = arith.constant dense<0.000000e+00> : vector<8xf32>
      %271 = vector.multi_reduction <add>, %270, %cst_146 [1] : vector<8x32xf32> to vector<8xf32>
      %272 = vector.shape_cast %271 : vector<8xf32> to vector<8x1xf32>
      %cst_147 = arith.constant 3.200000e+01 : f32
      %273 = vector.broadcast %cst_147 : f32 to vector<8x1xf32>
      %274 = arith.divf %272, %273 : vector<8x1xf32>
      %275 = vector.broadcast %267 : vector<8x1xf32> to vector<8x32xf32>
      %276 = arith.subf %259, %275 : vector<8x32xf32>
      %cst_148 = arith.constant 9.99999974E-6 : f32
      %277 = vector.broadcast %cst_148 : f32 to vector<8x1xf32>
      %278 = arith.addf %274, %277 : vector<8x1xf32>
      %279 = math.rsqrt %278 : vector<8x1xf32>
      %280 = vector.broadcast %279 : vector<8x1xf32> to vector<8x32xf32>
      %281 = arith.mulf %276, %280 : vector<8x32xf32>
      %282 = vector.shape_cast %261 : vector<32xf32> to vector<1x32xf32>
      %283 = vector.broadcast %282 : vector<1x32xf32> to vector<8x32xf32>
      %284 = arith.mulf %281, %283 : vector<8x32xf32>
      %285 = vector.shape_cast %263 : vector<32xf32> to vector<1x32xf32>
      %286 = vector.broadcast %285 : vector<1x32xf32> to vector<8x32xf32>
      %287 = arith.addf %284, %286 : vector<8x32xf32>
      %c0_149 = arith.constant 0 : index
      %c32 = arith.constant 32 : index
      %288 = vector.load %arg9[%c0_149, %c32] : memref<32x96xbf16, #tpu.memory_space<vmem>>, vector<32x64xbf16>
      %c0_150 = arith.constant 0 : index
      %c32_151 = arith.constant 32 : index
      %289 = vector.load %arg10[%c0_150, %c32_151] : memref<1x96xf32, #tpu.memory_space<vmem>>, vector<1x64xf32>
      %290 = arith.truncf %287 : vector<8x32xf32> to vector<8x32xbf16>
      %cst_152 = arith.constant dense<0.000000e+00> : vector<8x64xf32>
      %291 = tpu.matmul %290, %288, %cst_152 {dimension_numbers = #tpu.dot_dimension_numbers<[1], [0], [0], [1], [0, 0, 1, 1], [], []>} : vector<8x32xbf16>, vector<32x64xbf16>, vector<8x64xf32> -> vector<8x64xf32>
      %292 = vector.broadcast %289 : vector<1x64xf32> to vector<8x64xf32>
      %293 = arith.addf %291, %292 : vector<8x64xf32>
      %c0_153 = arith.constant 0 : index
      %c0_154 = arith.constant 0 : index
      %c0_155 = arith.constant 0 : index
      %294 = vector.load %arg3[%c0_153, %c0_154, %c0_155] : memref<1x8x32xf32, #tpu.memory_space<vmem>>, vector<1x8x32xf32>
      %295 = vector.shape_cast %294 : vector<1x8x32xf32> to vector<8x32xf32>
      %c0_156 = arith.constant 0 : index
      %c0_157 = arith.constant 0 : index
      %296 = vector.load %arg15[%c0_156, %c0_157] : memref<32x64xbf16, #tpu.memory_space<vmem>>, vector<32x64xbf16>
      %c0_158 = arith.constant 0 : index
      %c0_159 = arith.constant 0 : index
      %297 = vector.load %arg16[%c0_158, %c0_159] : memref<1x64xf32, #tpu.memory_space<vmem>>, vector<1x64xf32>
      %298 = arith.truncf %295 : vector<8x32xf32> to vector<8x32xbf16>
      %cst_160 = arith.constant dense<0.000000e+00> : vector<8x64xf32>
      %299 = tpu.matmul %298, %296, %cst_160 {dimension_numbers = #tpu.dot_dimension_numbers<[1], [0], [0], [1], [0, 0, 1, 1], [], []>} : vector<8x32xbf16>, vector<32x64xbf16>, vector<8x64xf32> -> vector<8x64xf32>
      %300 = vector.broadcast %297 : vector<1x64xf32> to vector<8x64xf32>
      %301 = arith.addf %299, %300 : vector<8x64xf32>
      %302 = vector.extract_strided_slice %293 {offsets = [0, 0], sizes = [8, 8], strides = [1, 1]} : vector<8x64xf32> to vector<8x8xf32>
      %303 = arith.truncf %302 : vector<8x8xf32> to vector<8x8xbf16>
      %c0_161 = arith.constant 0 : index
      %c0_162 = arith.constant 0 : index
      %c0_163 = arith.constant 0 : index
      %304 = vector.load %arg24[%c0_161, %c0_162, %c0_163] : memref<4x8x8xbf16, #tpu.memory_space<vmem>>, vector<1x8x8xbf16>
      %305 = vector.shape_cast %304 : vector<1x8x8xbf16> to vector<8x8xbf16>
      %306 = vector.shape_cast %303 : vector<8x8xbf16> to vector<1x8x8xbf16>
      tpu.vector_store %arg24[%c0_161, %c0_162, %c0_163], %306 {strides = array<i32>} : memref<4x8x8xbf16, #tpu.memory_space<vmem>>, vector<1x8x8xbf16>,
      %307 = vector.extract_strided_slice %293 {offsets = [0, 32], sizes = [8, 8], strides = [1, 1]} : vector<8x64xf32> to vector<8x8xf32>
      %308 = arith.truncf %307 : vector<8x8xf32> to vector<8x8xbf16>
      %c0_164 = arith.constant 0 : index
      %c0_165 = arith.constant 0 : index
      %c0_166 = arith.constant 0 : index
      %309 = vector.load %arg25[%c0_164, %c0_165, %c0_166] : memref<4x8x8xbf16, #tpu.memory_space<vmem>>, vector<1x8x8xbf16>
      %310 = vector.shape_cast %309 : vector<1x8x8xbf16> to vector<8x8xbf16>
      %311 = vector.shape_cast %308 : vector<8x8xbf16> to vector<1x8x8xbf16>
      tpu.vector_store %arg25[%c0_164, %c0_165, %c0_166], %311 {strides = array<i32>} : memref<4x8x8xbf16, #tpu.memory_space<vmem>>, vector<1x8x8xbf16>,
      %312 = vector.extract_strided_slice %301 {offsets = [0, 0], sizes = [8, 8], strides = [1, 1]} : vector<8x64xf32> to vector<8x8xf32>
      %313 = arith.truncf %312 : vector<8x8xf32> to vector<8x8xbf16>
      %c0_167 = arith.constant 0 : index
      %c0_168 = arith.constant 0 : index
      %c0_169 = arith.constant 0 : index
      %314 = vector.load %arg26[%c0_167, %c0_168, %c0_169] : memref<4x8x8xbf16, #tpu.memory_space<vmem>>, vector<1x8x8xbf16>
      %315 = vector.shape_cast %314 : vector<1x8x8xbf16> to vector<8x8xbf16>
      %316 = vector.shape_cast %313 : vector<8x8xbf16> to vector<1x8x8xbf16>
      tpu.vector_store %arg26[%c0_167, %c0_168, %c0_169], %316 {strides = array<i32>} : memref<4x8x8xbf16, #tpu.memory_space<vmem>>, vector<1x8x8xbf16>,
      %317 = vector.extract_strided_slice %301 {offsets = [0, 32], sizes = [8, 8], strides = [1, 1]} : vector<8x64xf32> to vector<8x8xf32>
      %318 = arith.truncf %317 : vector<8x8xf32> to vector<8x8xbf16>
      %c0_170 = arith.constant 0 : index
      %c0_171 = arith.constant 0 : index
      %c0_172 = arith.constant 0 : index
      %319 = vector.load %arg27[%c0_170, %c0_171, %c0_172] : memref<4x8x8xbf16, #tpu.memory_space<vmem>>, vector<1x8x8xbf16>
      %320 = vector.shape_cast %319 : vector<1x8x8xbf16> to vector<8x8xbf16>
      %321 = vector.shape_cast %318 : vector<8x8xbf16> to vector<1x8x8xbf16>
      tpu.vector_store %arg27[%c0_170, %c0_171, %c0_172], %321 {strides = array<i32>} : memref<4x8x8xbf16, #tpu.memory_space<vmem>>, vector<1x8x8xbf16>,
      %322 = vector.extract_strided_slice %293 {offsets = [0, 8], sizes = [8, 8], strides = [1, 1]} : vector<8x64xf32> to vector<8x8xf32>
      %323 = arith.truncf %322 : vector<8x8xf32> to vector<8x8xbf16>
      %c1_173 = arith.constant 1 : index
      %c0_174 = arith.constant 0 : index
      %c0_175 = arith.constant 0 : index
      %324 = vector.load %arg24[%c1_173, %c0_174, %c0_175] : memref<4x8x8xbf16, #tpu.memory_space<vmem>>, vector<1x8x8xbf16>
      %325 = vector.shape_cast %324 : vector<1x8x8xbf16> to vector<8x8xbf16>
      %326 = vector.shape_cast %323 : vector<8x8xbf16> to vector<1x8x8xbf16>
      tpu.vector_store %arg24[%c1_173, %c0_174, %c0_175], %326 {strides = array<i32>} : memref<4x8x8xbf16, #tpu.memory_space<vmem>>, vector<1x8x8xbf16>,
      %327 = vector.extract_strided_slice %293 {offsets = [0, 40], sizes = [8, 8], strides = [1, 1]} : vector<8x64xf32> to vector<8x8xf32>
      %328 = arith.truncf %327 : vector<8x8xf32> to vector<8x8xbf16>
      %c1_176 = arith.constant 1 : index
      %c0_177 = arith.constant 0 : index
      %c0_178 = arith.constant 0 : index
      %329 = vector.load %arg25[%c1_176, %c0_177, %c0_178] : memref<4x8x8xbf16, #tpu.memory_space<vmem>>, vector<1x8x8xbf16>
      %330 = vector.shape_cast %329 : vector<1x8x8xbf16> to vector<8x8xbf16>
      %331 = vector.shape_cast %328 : vector<8x8xbf16> to vector<1x8x8xbf16>
      tpu.vector_store %arg25[%c1_176, %c0_177, %c0_178], %331 {strides = array<i32>} : memref<4x8x8xbf16, #tpu.memory_space<vmem>>, vector<1x8x8xbf16>,
      %332 = vector.extract_strided_slice %301 {offsets = [0, 8], sizes = [8, 8], strides = [1, 1]} : vector<8x64xf32> to vector<8x8xf32>
      %333 = arith.truncf %332 : vector<8x8xf32> to vector<8x8xbf16>
      %c1_179 = arith.constant 1 : index
      %c0_180 = arith.constant 0 : index
      %c0_181 = arith.constant 0 : index
      %334 = vector.load %arg26[%c1_179, %c0_180, %c0_181] : memref<4x8x8xbf16, #tpu.memory_space<vmem>>, vector<1x8x8xbf16>
      %335 = vector.shape_cast %334 : vector<1x8x8xbf16> to vector<8x8xbf16>
      %336 = vector.shape_cast %333 : vector<8x8xbf16> to vector<1x8x8xbf16>
      tpu.vector_store %arg26[%c1_179, %c0_180, %c0_181], %336 {strides = array<i32>} : memref<4x8x8xbf16, #tpu.memory_space<vmem>>, vector<1x8x8xbf16>,
      %337 = vector.extract_strided_slice %301 {offsets = [0, 40], sizes = [8, 8], strides = [1, 1]} : vector<8x64xf32> to vector<8x8xf32>
      %338 = arith.truncf %337 : vector<8x8xf32> to vector<8x8xbf16>
      %c1_182 = arith.constant 1 : index
      %c0_183 = arith.constant 0 : index
      %c0_184 = arith.constant 0 : index
      %339 = vector.load %arg27[%c1_182, %c0_183, %c0_184] : memref<4x8x8xbf16, #tpu.memory_space<vmem>>, vector<1x8x8xbf16>
      %340 = vector.shape_cast %339 : vector<1x8x8xbf16> to vector<8x8xbf16>
      %341 = vector.shape_cast %338 : vector<8x8xbf16> to vector<1x8x8xbf16>
      tpu.vector_store %arg27[%c1_182, %c0_183, %c0_184], %341 {strides = array<i32>} : memref<4x8x8xbf16, #tpu.memory_space<vmem>>, vector<1x8x8xbf16>,
      %342 = vector.extract_strided_slice %293 {offsets = [0, 16], sizes = [8, 8], strides = [1, 1]} : vector<8x64xf32> to vector<8x8xf32>
      %343 = arith.truncf %342 : vector<8x8xf32> to vector<8x8xbf16>
      %c2_185 = arith.constant 2 : index
      %c0_186 = arith.constant 0 : index
      %c0_187 = arith.constant 0 : index
      %344 = vector.load %arg24[%c2_185, %c0_186, %c0_187] : memref<4x8x8xbf16, #tpu.memory_space<vmem>>, vector<1x8x8xbf16>
      %345 = vector.shape_cast %344 : vector<1x8x8xbf16> to vector<8x8xbf16>
      %346 = vector.shape_cast %343 : vector<8x8xbf16> to vector<1x8x8xbf16>
      tpu.vector_store %arg24[%c2_185, %c0_186, %c0_187], %346 {strides = array<i32>} : memref<4x8x8xbf16, #tpu.memory_space<vmem>>, vector<1x8x8xbf16>,
      %347 = vector.extract_strided_slice %293 {offsets = [0, 48], sizes = [8, 8], strides = [1, 1]} : vector<8x64xf32> to vector<8x8xf32>
      %348 = arith.truncf %347 : vector<8x8xf32> to vector<8x8xbf16>
      %c2_188 = arith.constant 2 : index
      %c0_189 = arith.constant 0 : index
      %c0_190 = arith.constant 0 : index
      %349 = vector.load %arg25[%c2_188, %c0_189, %c0_190] : memref<4x8x8xbf16, #tpu.memory_space<vmem>>, vector<1x8x8xbf16>
      %350 = vector.shape_cast %349 : vector<1x8x8xbf16> to vector<8x8xbf16>
      %351 = vector.shape_cast %348 : vector<8x8xbf16> to vector<1x8x8xbf16>
      tpu.vector_store %arg25[%c2_188, %c0_189, %c0_190], %351 {strides = array<i32>} : memref<4x8x8xbf16, #tpu.memory_space<vmem>>, vector<1x8x8xbf16>,
      %352 = vector.extract_strided_slice %301 {offsets = [0, 16], sizes = [8, 8], strides = [1, 1]} : vector<8x64xf32> to vector<8x8xf32>
      %353 = arith.truncf %352 : vector<8x8xf32> to vector<8x8xbf16>
      %c2_191 = arith.constant 2 : index
      %c0_192 = arith.constant 0 : index
      %c0_193 = arith.constant 0 : index
      %354 = vector.load %arg26[%c2_191, %c0_192, %c0_193] : memref<4x8x8xbf16, #tpu.memory_space<vmem>>, vector<1x8x8xbf16>
      %355 = vector.shape_cast %354 : vector<1x8x8xbf16> to vector<8x8xbf16>
      %356 = vector.shape_cast %353 : vector<8x8xbf16> to vector<1x8x8xbf16>
      tpu.vector_store %arg26[%c2_191, %c0_192, %c0_193], %356 {strides = array<i32>} : memref<4x8x8xbf16, #tpu.memory_space<vmem>>, vector<1x8x8xbf16>,
      %357 = vector.extract_strided_slice %301 {offsets = [0, 48], sizes = [8, 8], strides = [1, 1]} : vector<8x64xf32> to vector<8x8xf32>
      %358 = arith.truncf %357 : vector<8x8xf32> to vector<8x8xbf16>
      %c2_194 = arith.constant 2 : index
      %c0_195 = arith.constant 0 : index
      %c0_196 = arith.constant 0 : index
      %359 = vector.load %arg27[%c2_194, %c0_195, %c0_196] : memref<4x8x8xbf16, #tpu.memory_space<vmem>>, vector<1x8x8xbf16>
      %360 = vector.shape_cast %359 : vector<1x8x8xbf16> to vector<8x8xbf16>
      %361 = vector.shape_cast %358 : vector<8x8xbf16> to vector<1x8x8xbf16>
      tpu.vector_store %arg27[%c2_194, %c0_195, %c0_196], %361 {strides = array<i32>} : memref<4x8x8xbf16, #tpu.memory_space<vmem>>, vector<1x8x8xbf16>,
      %362 = vector.extract_strided_slice %293 {offsets = [0, 24], sizes = [8, 8], strides = [1, 1]} : vector<8x64xf32> to vector<8x8xf32>
      %363 = arith.truncf %362 : vector<8x8xf32> to vector<8x8xbf16>
      %c3_197 = arith.constant 3 : index
      %c0_198 = arith.constant 0 : index
      %c0_199 = arith.constant 0 : index
      %364 = vector.load %arg24[%c3_197, %c0_198, %c0_199] : memref<4x8x8xbf16, #tpu.memory_space<vmem>>, vector<1x8x8xbf16>
      %365 = vector.shape_cast %364 : vector<1x8x8xbf16> to vector<8x8xbf16>
      %366 = vector.shape_cast %363 : vector<8x8xbf16> to vector<1x8x8xbf16>
      tpu.vector_store %arg24[%c3_197, %c0_198, %c0_199], %366 {strides = array<i32>} : memref<4x8x8xbf16, #tpu.memory_space<vmem>>, vector<1x8x8xbf16>,
      %367 = vector.extract_strided_slice %293 {offsets = [0, 56], sizes = [8, 8], strides = [1, 1]} : vector<8x64xf32> to vector<8x8xf32>
      %368 = arith.truncf %367 : vector<8x8xf32> to vector<8x8xbf16>
      %c3_200 = arith.constant 3 : index
      %c0_201 = arith.constant 0 : index
      %c0_202 = arith.constant 0 : index
      %369 = vector.load %arg25[%c3_200, %c0_201, %c0_202] : memref<4x8x8xbf16, #tpu.memory_space<vmem>>, vector<1x8x8xbf16>
      %370 = vector.shape_cast %369 : vector<1x8x8xbf16> to vector<8x8xbf16>
      %371 = vector.shape_cast %368 : vector<8x8xbf16> to vector<1x8x8xbf16>
      tpu.vector_store %arg25[%c3_200, %c0_201, %c0_202], %371 {strides = array<i32>} : memref<4x8x8xbf16, #tpu.memory_space<vmem>>, vector<1x8x8xbf16>,
      %372 = vector.extract_strided_slice %301 {offsets = [0, 24], sizes = [8, 8], strides = [1, 1]} : vector<8x64xf32> to vector<8x8xf32>
      %373 = arith.truncf %372 : vector<8x8xf32> to vector<8x8xbf16>
      %c3_203 = arith.constant 3 : index
      %c0_204 = arith.constant 0 : index
      %c0_205 = arith.constant 0 : index
      %374 = vector.load %arg26[%c3_203, %c0_204, %c0_205] : memref<4x8x8xbf16, #tpu.memory_space<vmem>>, vector<1x8x8xbf16>
      %375 = vector.shape_cast %374 : vector<1x8x8xbf16> to vector<8x8xbf16>
      %376 = vector.shape_cast %373 : vector<8x8xbf16> to vector<1x8x8xbf16>
      tpu.vector_store %arg26[%c3_203, %c0_204, %c0_205], %376 {strides = array<i32>} : memref<4x8x8xbf16, #tpu.memory_space<vmem>>, vector<1x8x8xbf16>,
      %377 = vector.extract_strided_slice %301 {offsets = [0, 56], sizes = [8, 8], strides = [1, 1]} : vector<8x64xf32> to vector<8x8xf32>
      %378 = arith.truncf %377 : vector<8x8xf32> to vector<8x8xbf16>
      %c3_206 = arith.constant 3 : index
      %c0_207 = arith.constant 0 : index
      %c0_208 = arith.constant 0 : index
      %379 = vector.load %arg27[%c3_206, %c0_207, %c0_208] : memref<4x8x8xbf16, #tpu.memory_space<vmem>>, vector<1x8x8xbf16>
      %380 = vector.shape_cast %379 : vector<1x8x8xbf16> to vector<8x8xbf16>
      %381 = vector.shape_cast %378 : vector<8x8xbf16> to vector<1x8x8xbf16>
      tpu.vector_store %arg27[%c3_206, %c0_207, %c0_208], %381 {strides = array<i32>} : memref<4x8x8xbf16, #tpu.memory_space<vmem>>, vector<1x8x8xbf16>,
    } else {
    }
    %c0 = arith.constant 0 : index
    %5 = arith.index_cast %1 : i32 to index
    %c0_1 = arith.constant 0 : index
    %6 = vector.load %arg2[%c0, %5, %c0_1] : memref<1x8x32xf32, #tpu.memory_space<vmem>>, vector<1x8x32xf32>
    %7 = vector.shape_cast %6 : vector<1x8x32xf32> to vector<8x32xf32>
    %c0_2 = arith.constant 0 : index
    %c0_3 = arith.constant 0 : index
    %8 = vector.load %arg7[%c0_2, %c0_3] : memref<3x32xf32, #tpu.memory_space<vmem>>, vector<1x32xf32>
    %9 = vector.shape_cast %8 : vector<1x32xf32> to vector<32xf32>
    %c0_4 = arith.constant 0 : index
    %c0_5 = arith.constant 0 : index
    %10 = vector.load %arg8[%c0_4, %c0_5] : memref<3x32xf32, #tpu.memory_space<vmem>>, vector<1x32xf32>
    %11 = vector.shape_cast %10 : vector<1x32xf32> to vector<32xf32>
    %cst = arith.constant dense<0.000000e+00> : vector<8xf32>
    %12 = vector.multi_reduction <add>, %7, %cst [1] : vector<8x32xf32> to vector<8xf32>
    %13 = vector.shape_cast %12 : vector<8xf32> to vector<8x1xf32>
    %cst_6 = arith.constant 3.200000e+01 : f32
    %14 = vector.broadcast %cst_6 : f32 to vector<8x1xf32>
    %15 = arith.divf %13, %14 : vector<8x1xf32>
    %16 = vector.broadcast %15 : vector<8x1xf32> to vector<8x32xf32>
    %17 = arith.subf %7, %16 : vector<8x32xf32>
    %18 = arith.mulf %17, %17 : vector<8x32xf32>
    %cst_7 = arith.constant dense<0.000000e+00> : vector<8xf32>
    %19 = vector.multi_reduction <add>, %18, %cst_7 [1] : vector<8x32xf32> to vector<8xf32>
    %20 = vector.shape_cast %19 : vector<8xf32> to vector<8x1xf32>
    %cst_8 = arith.constant 3.200000e+01 : f32
    %21 = vector.broadcast %cst_8 : f32 to vector<8x1xf32>
    %22 = arith.divf %20, %21 : vector<8x1xf32>
    %23 = vector.broadcast %15 : vector<8x1xf32> to vector<8x32xf32>
    %24 = arith.subf %7, %23 : vector<8x32xf32>
    %cst_9 = arith.constant 9.99999974E-6 : f32
    %25 = vector.broadcast %cst_9 : f32 to vector<8x1xf32>
    %26 = arith.addf %22, %25 : vector<8x1xf32>
    %27 = math.rsqrt %26 : vector<8x1xf32>
    %28 = vector.broadcast %27 : vector<8x1xf32> to vector<8x32xf32>
    %29 = arith.mulf %24, %28 : vector<8x32xf32>
    %30 = vector.shape_cast %9 : vector<32xf32> to vector<1x32xf32>
    %31 = vector.broadcast %30 : vector<1x32xf32> to vector<8x32xf32>
    %32 = arith.mulf %29, %31 : vector<8x32xf32>
    %33 = vector.shape_cast %11 : vector<32xf32> to vector<1x32xf32>
    %34 = vector.broadcast %33 : vector<1x32xf32> to vector<8x32xf32>
    %35 = arith.addf %32, %34 : vector<8x32xf32>
    %c0_10 = arith.constant 0 : index
    %c0_11 = arith.constant 0 : index
    %36 = vector.load %arg9[%c0_10, %c0_11] : memref<32x96xbf16, #tpu.memory_space<vmem>>, vector<32x32xbf16>
    %c0_12 = arith.constant 0 : index
    %c0_13 = arith.constant 0 : index
    %37 = vector.load %arg10[%c0_12, %c0_13] : memref<1x96xf32, #tpu.memory_space<vmem>>, vector<1x32xf32>
    %38 = arith.truncf %35 : vector<8x32xf32> to vector<8x32xbf16>
    %cst_14 = arith.constant dense<0.000000e+00> : vector<8x32xf32>
    %39 = tpu.matmul %38, %36, %cst_14 {dimension_numbers = #tpu.dot_dimension_numbers<[1], [0], [0], [1], [0, 0, 1, 1], [], []>} : vector<8x32xbf16>, vector<32x32xbf16>, vector<8x32xf32> -> vector<8x32xf32>
    %40 = vector.broadcast %37 : vector<1x32xf32> to vector<8x32xf32>
    %41 = arith.addf %39, %40 : vector<8x32xf32>
    %c0_15 = arith.constant 0 : index
    %c0_16 = arith.constant 0 : index
    %c0_17 = arith.constant 0 : index
    %42 = vector.load %arg4[%c0_15, %c0_16, %c0_17] : memref<1x1x8xf32, #tpu.memory_space<vmem>>, vector<1x1x8xf32>
    %43 = vector.shape_cast %42 : vector<1x1x8xf32> to vector<1x8xf32>
    %44 = arith.index_cast %1 : i32 to index
    %c0_18 = arith.constant 0 : index
    %45 = vector.load %arg5[%44, %c0_18] : memref<8x8xf32, #tpu.memory_space<vmem>>, vector<8x8xf32>
    %46 = vector.broadcast %43 : vector<1x8xf32> to vector<8x8xf32>
    %47 = arith.addf %46, %45 : vector<8x8xf32>
    %48 = vector.shape_cast %47 : vector<8x8xf32> to vector<1x8x8xf32>
    %c0_19 = arith.constant 0 : index
    %c0_20 = arith.constant 0 : index
    %c0_21 = arith.constant 0 : index
    %49 = vector.load %arg24[%c0_19, %c0_20, %c0_21] : memref<4x8x8xbf16, #tpu.memory_space<vmem>>, vector<4x8x8xbf16>
    %c0_22 = arith.constant 0 : index
    %c0_23 = arith.constant 0 : index
    %c0_24 = arith.constant 0 : index
    %50 = vector.load %arg25[%c0_22, %c0_23, %c0_24] : memref<4x8x8xbf16, #tpu.memory_space<vmem>>, vector<4x8x8xbf16>
    %cst_25 = arith.constant 0.353553385 : f32
    %51 = vector.broadcast %cst_25 : f32 to vector<8x32xf32>
    %52 = arith.mulf %41, %51 : vector<8x32xf32>
    %53 = vector.extract_strided_slice %52 {offsets = [0, 0], sizes = [8, 8], strides = [1, 1]} : vector<8x32xf32> to vector<8x8xf32>
    %54 = arith.truncf %53 : vector<8x8xf32> to vector<8x8xbf16>
    %c0_26 = arith.constant 0 : index
    %c0_27 = arith.constant 0 : index
    %c0_28 = arith.constant 0 : index
    %55 = vector.load %arg28[%c0_26, %c0_27, %c0_28] : memref<4x8x8xbf16, #tpu.memory_space<vmem>>, vector<1x8x8xbf16>
    %56 = vector.shape_cast %55 : vector<1x8x8xbf16> to vector<8x8xbf16>
    %57 = vector.shape_cast %54 : vector<8x8xbf16> to vector<1x8x8xbf16>
    tpu.vector_store %arg28[%c0_26, %c0_27, %c0_28], %57 {strides = array<i32>} : memref<4x8x8xbf16, #tpu.memory_space<vmem>>, vector<1x8x8xbf16>,
    %58 = vector.extract_strided_slice %52 {offsets = [0, 8], sizes = [8, 8], strides = [1, 1]} : vector<8x32xf32> to vector<8x8xf32>
    %59 = arith.truncf %58 : vector<8x8xf32> to vector<8x8xbf16>
    %c1 = arith.constant 1 : index
    %c0_29 = arith.constant 0 : index
    %c0_30 = arith.constant 0 : index
    %60 = vector.load %arg28[%c1, %c0_29, %c0_30] : memref<4x8x8xbf16, #tpu.memory_space<vmem>>, vector<1x8x8xbf16>
    %61 = vector.shape_cast %60 : vector<1x8x8xbf16> to vector<8x8xbf16>
    %62 = vector.shape_cast %59 : vector<8x8xbf16> to vector<1x8x8xbf16>
    tpu.vector_store %arg28[%c1, %c0_29, %c0_30], %62 {strides = array<i32>} : memref<4x8x8xbf16, #tpu.memory_space<vmem>>, vector<1x8x8xbf16>,
    %63 = vector.extract_strided_slice %52 {offsets = [0, 16], sizes = [8, 8], strides = [1, 1]} : vector<8x32xf32> to vector<8x8xf32>
    %64 = arith.truncf %63 : vector<8x8xf32> to vector<8x8xbf16>
    %c2 = arith.constant 2 : index
    %c0_31 = arith.constant 0 : index
    %c0_32 = arith.constant 0 : index
    %65 = vector.load %arg28[%c2, %c0_31, %c0_32] : memref<4x8x8xbf16, #tpu.memory_space<vmem>>, vector<1x8x8xbf16>
    %66 = vector.shape_cast %65 : vector<1x8x8xbf16> to vector<8x8xbf16>
    %67 = vector.shape_cast %64 : vector<8x8xbf16> to vector<1x8x8xbf16>
    tpu.vector_store %arg28[%c2, %c0_31, %c0_32], %67 {strides = array<i32>} : memref<4x8x8xbf16, #tpu.memory_space<vmem>>, vector<1x8x8xbf16>,
    %68 = vector.extract_strided_slice %52 {offsets = [0, 24], sizes = [8, 8], strides = [1, 1]} : vector<8x32xf32> to vector<8x8xf32>
    %69 = arith.truncf %68 : vector<8x8xf32> to vector<8x8xbf16>
    %c3 = arith.constant 3 : index
    %c0_33 = arith.constant 0 : index
    %c0_34 = arith.constant 0 : index
    %70 = vector.load %arg28[%c3, %c0_33, %c0_34] : memref<4x8x8xbf16, #tpu.memory_space<vmem>>, vector<1x8x8xbf16>
    %71 = vector.shape_cast %70 : vector<1x8x8xbf16> to vector<8x8xbf16>
    %72 = vector.shape_cast %69 : vector<8x8xbf16> to vector<1x8x8xbf16>
    tpu.vector_store %arg28[%c3, %c0_33, %c0_34], %72 {strides = array<i32>} : memref<4x8x8xbf16, #tpu.memory_space<vmem>>, vector<1x8x8xbf16>,
    %c0_35 = arith.constant 0 : index
    %c0_36 = arith.constant 0 : index
    %c0_37 = arith.constant 0 : index
    %73 = vector.load %arg28[%c0_35, %c0_36, %c0_37] : memref<4x8x8xbf16, #tpu.memory_space<vmem>>, vector<4x8x8xbf16>
    "tpu.trace_start"() <{level = 10 : i32, message = "hqd,hkd->hqk"}> : () -> ()
    %cst_38 = arith.constant dense<0.000000e+00> : vector<4x8x8xf32>
    %74 = tpu.matmul %73, %49, %cst_38 {dimension_numbers = #tpu.dot_dimension_numbers<[2], [2], [1], [1], [0, 0, 0, 1, 1, 1], [0], [0]>} : vector<4x8x8xbf16>, vector<4x8x8xbf16>, vector<4x8x8xf32> -> vector<4x8x8xf32>
    "tpu.trace_stop"() : () -> ()
    %75 = vector.broadcast %48 : vector<1x8x8xf32> to vector<4x8x8xf32>
    %76 = arith.addf %74, %75 : vector<4x8x8xf32>
    %cst_39 = arith.constant dense<0xFF800000> : vector<4x8xf32>
    %77 = vector.multi_reduction <maximumf>, %76, %cst_39 [2] : vector<4x8x8xf32> to vector<4x8xf32>
    %78 = vector.shape_cast %77 : vector<4x8xf32> to vector<4x8x1xf32>
    %79 = vector.broadcast %78 : vector<4x8x1xf32> to vector<4x8x8xf32>
    %80 = arith.subf %76, %79 : vector<4x8x8xf32>
    %81 = math.exp %80 : vector<4x8x8xf32>
    %cst_40 = arith.constant dense<0.000000e+00> : vector<4x8xf32>
    %82 = vector.multi_reduction <add>, %81, %cst_40 [2] : vector<4x8x8xf32> to vector<4x8xf32>
    %83 = vector.shape_cast %82 : vector<4x8xf32> to vector<4x8x1xf32>
    %84 = arith.truncf %81 : vector<4x8x8xf32> to vector<4x8x8xbf16>
    "tpu.trace_start"() <{level = 10 : i32, message = "hqk,hkd->hqd"}> : () -> ()
    %cst_41 = arith.constant dense<0.000000e+00> : vector<4x8x8xf32>
    %85 = tpu.matmul %84, %50, %cst_41 {dimension_numbers = #tpu.dot_dimension_numbers<[2], [1], [1], [2], [0, 0, 0, 1, 1, 2], [0], [0]>} : vector<4x8x8xbf16>, vector<4x8x8xbf16>, vector<4x8x8xf32> -> vector<4x8x8xf32>
    "tpu.trace_stop"() : () -> ()
    %86 = tpu.reciprocal %83 {approx = true} : vector<4x8x1xf32> -> vector<4x8x1xf32>
    %87 = vector.broadcast %86 : vector<4x8x1xf32> to vector<4x8x8xf32>
    %88 = arith.mulf %85, %87 : vector<4x8x8xf32>
    %89 = vector.extract_strided_slice %88 {offsets = [0, 0, 0], sizes = [1, 8, 8], strides = [1, 1, 1]} : vector<4x8x8xf32> to vector<1x8x8xf32>
    %90 = vector.shape_cast %89 : vector<1x8x8xf32> to vector<8x8xf32>
    %c0_42 = arith.constant 0 : index
    %c0_43 = arith.constant 0 : index
    %91 = vector.load %arg29[%c0_42, %c0_43] : memref<8x32xf32, #tpu.memory_space<vmem>>, vector<8x8xf32>
    tpu.vector_store %arg29[%c0_42, %c0_43], %90 {strides = array<i32>} : memref<8x32xf32, #tpu.memory_space<vmem>>, vector<8x8xf32>,
    %92 = vector.extract_strided_slice %88 {offsets = [1, 0, 0], sizes = [1, 8, 8], strides = [1, 1, 1]} : vector<4x8x8xf32> to vector<1x8x8xf32>
    %93 = vector.shape_cast %92 : vector<1x8x8xf32> to vector<8x8xf32>
    %c0_44 = arith.constant 0 : index
    %c8 = arith.constant 8 : index
    %94 = vector.load %arg29[%c0_44, %c8] : memref<8x32xf32, #tpu.memory_space<vmem>>, vector<8x8xf32>
    tpu.vector_store %arg29[%c0_44, %c8], %93 {strides = array<i32>} : memref<8x32xf32, #tpu.memory_space<vmem>>, vector<8x8xf32>,
    %95 = vector.extract_strided_slice %88 {offsets = [2, 0, 0], sizes = [1, 8, 8], strides = [1, 1, 1]} : vector<4x8x8xf32> to vector<1x8x8xf32>
    %96 = vector.shape_cast %95 : vector<1x8x8xf32> to vector<8x8xf32>
    %c0_45 = arith.constant 0 : index
    %c16 = arith.constant 16 : index
    %97 = vector.load %arg29[%c0_45, %c16] : memref<8x32xf32, #tpu.memory_space<vmem>>, vector<8x8xf32>
    tpu.vector_store %arg29[%c0_45, %c16], %96 {strides = array<i32>} : memref<8x32xf32, #tpu.memory_space<vmem>>, vector<8x8xf32>,
    %98 = vector.extract_strided_slice %88 {offsets = [3, 0, 0], sizes = [1, 8, 8], strides = [1, 1, 1]} : vector<4x8x8xf32> to vector<1x8x8xf32>
    %99 = vector.shape_cast %98 : vector<1x8x8xf32> to vector<8x8xf32>
    %c0_46 = arith.constant 0 : index
    %c24 = arith.constant 24 : index
    %100 = vector.load %arg29[%c0_46, %c24] : memref<8x32xf32, #tpu.memory_space<vmem>>, vector<8x8xf32>
    tpu.vector_store %arg29[%c0_46, %c24], %99 {strides = array<i32>} : memref<8x32xf32, #tpu.memory_space<vmem>>, vector<8x8xf32>,
    %c0_47 = arith.constant 0 : index
    %c0_48 = arith.constant 0 : index
    %101 = vector.load %arg29[%c0_47, %c0_48] : memref<8x32xf32, #tpu.memory_space<vmem>>, vector<8x32xf32>
    %c0_49 = arith.constant 0 : index
    %c0_50 = arith.constant 0 : index
    %102 = vector.load %arg11[%c0_49, %c0_50] : memref<32x32xbf16, #tpu.memory_space<vmem>>, vector<32x32xbf16>
    %c0_51 = arith.constant 0 : index
    %c0_52 = arith.constant 0 : index
    %103 = vector.load %arg12[%c0_51, %c0_52] : memref<1x32xf32, #tpu.memory_space<vmem>>, vector<1x32xf32>
    %104 = arith.truncf %101 : vector<8x32xf32> to vector<8x32xbf16>
    %cst_53 = arith.constant dense<0.000000e+00> : vector<8x32xf32>
    %105 = tpu.matmul %104, %102, %cst_53 {dimension_numbers = #tpu.dot_dimension_numbers<[1], [0], [0], [1], [0, 0, 1, 1], [], []>} : vector<8x32xbf16>, vector<32x32xbf16>, vector<8x32xf32> -> vector<8x32xf32>
    %106 = vector.broadcast %103 : vector<1x32xf32> to vector<8x32xf32>
    %107 = arith.addf %105, %106 : vector<8x32xf32>
    %108 = arith.addf %7, %107 : vector<8x32xf32>
    %c1_54 = arith.constant 1 : index
    %c0_55 = arith.constant 0 : index
    %109 = vector.load %arg7[%c1_54, %c0_55] : memref<3x32xf32, #tpu.memory_space<vmem>>, vector<1x32xf32>
    %110 = vector.shape_cast %109 : vector<1x32xf32> to vector<32xf32>
    %c1_56 = arith.constant 1 : index
    %c0_57 = arith.constant 0 : index
    %111 = vector.load %arg8[%c1_56, %c0_57] : memref<3x32xf32, #tpu.memory_space<vmem>>, vector<1x32xf32>
    %112 = vector.shape_cast %111 : vector<1x32xf32> to vector<32xf32>
    %cst_58 = arith.constant dense<0.000000e+00> : vector<8xf32>
    %113 = vector.multi_reduction <add>, %108, %cst_58 [1] : vector<8x32xf32> to vector<8xf32>
    %114 = vector.shape_cast %113 : vector<8xf32> to vector<8x1xf32>
    %cst_59 = arith.constant 3.200000e+01 : f32
    %115 = vector.broadcast %cst_59 : f32 to vector<8x1xf32>
    %116 = arith.divf %114, %115 : vector<8x1xf32>
    %117 = vector.broadcast %116 : vector<8x1xf32> to vector<8x32xf32>
    %118 = arith.subf %108, %117 : vector<8x32xf32>
    %119 = arith.mulf %118, %118 : vector<8x32xf32>
    %cst_60 = arith.constant dense<0.000000e+00> : vector<8xf32>
    %120 = vector.multi_reduction <add>, %119, %cst_60 [1] : vector<8x32xf32> to vector<8xf32>
    %121 = vector.shape_cast %120 : vector<8xf32> to vector<8x1xf32>
    %cst_61 = arith.constant 3.200000e+01 : f32
    %122 = vector.broadcast %cst_61 : f32 to vector<8x1xf32>
    %123 = arith.divf %121, %122 : vector<8x1xf32>
    %124 = vector.broadcast %116 : vector<8x1xf32> to vector<8x32xf32>
    %125 = arith.subf %108, %124 : vector<8x32xf32>
    %cst_62 = arith.constant 9.99999974E-6 : f32
    %126 = vector.broadcast %cst_62 : f32 to vector<8x1xf32>
    %127 = arith.addf %123, %126 : vector<8x1xf32>
    %128 = math.rsqrt %127 : vector<8x1xf32>
    %129 = vector.broadcast %128 : vector<8x1xf32> to vector<8x32xf32>
    %130 = arith.mulf %125, %129 : vector<8x32xf32>
    %131 = vector.shape_cast %110 : vector<32xf32> to vector<1x32xf32>
    %132 = vector.broadcast %131 : vector<1x32xf32> to vector<8x32xf32>
    %133 = arith.mulf %130, %132 : vector<8x32xf32>
    %134 = vector.shape_cast %112 : vector<32xf32> to vector<1x32xf32>
    %135 = vector.broadcast %134 : vector<1x32xf32> to vector<8x32xf32>
    %136 = arith.addf %133, %135 : vector<8x32xf32>
    %c0_63 = arith.constant 0 : index
    %c0_64 = arith.constant 0 : index
    %137 = vector.load %arg13[%c0_63, %c0_64] : memref<32x32xbf16, #tpu.memory_space<vmem>>, vector<32x32xbf16>
    %c0_65 = arith.constant 0 : index
    %c0_66 = arith.constant 0 : index
    %138 = vector.load %arg14[%c0_65, %c0_66] : memref<1x32xf32, #tpu.memory_space<vmem>>, vector<1x32xf32>
    %139 = arith.truncf %136 : vector<8x32xf32> to vector<8x32xbf16>
    %cst_67 = arith.constant dense<0.000000e+00> : vector<8x32xf32>
    %140 = tpu.matmul %139, %137, %cst_67 {dimension_numbers = #tpu.dot_dimension_numbers<[1], [0], [0], [1], [0, 0, 1, 1], [], []>} : vector<8x32xbf16>, vector<32x32xbf16>, vector<8x32xf32> -> vector<8x32xf32>
    %141 = vector.broadcast %138 : vector<1x32xf32> to vector<8x32xf32>
    %142 = arith.addf %140, %141 : vector<8x32xf32>
    %c0_68 = arith.constant 0 : index
    %c0_69 = arith.constant 0 : index
    %c0_70 = arith.constant 0 : index
    %143 = vector.load %arg6[%c0_68, %c0_69, %c0_70] : memref<1x1x8xf32, #tpu.memory_space<vmem>>, vector<1x1x8xf32>
    %144 = vector.shape_cast %143 : vector<1x1x8xf32> to vector<1x8xf32>
    %145 = vector.shape_cast %144 : vector<1x8xf32> to vector<1x1x8xf32>
    %c0_71 = arith.constant 0 : index
    %c0_72 = arith.constant 0 : index
    %c0_73 = arith.constant 0 : index
    %146 = vector.load %arg26[%c0_71, %c0_72, %c0_73] : memref<4x8x8xbf16, #tpu.memory_space<vmem>>, vector<4x8x8xbf16>
    %c0_74 = arith.constant 0 : index
    %c0_75 = arith.constant 0 : index
    %c0_76 = arith.constant 0 : index
    %147 = vector.load %arg27[%c0_74, %c0_75, %c0_76] : memref<4x8x8xbf16, #tpu.memory_space<vmem>>, vector<4x8x8xbf16>
    %cst_77 = arith.constant 0.353553385 : f32
    %148 = vector.broadcast %cst_77 : f32 to vector<8x32xf32>
    %149 = arith.mulf %142, %148 : vector<8x32xf32>
    %150 = vector.extract_strided_slice %149 {offsets = [0, 0], sizes = [8, 8], strides = [1, 1]} : vector<8x32xf32> to vector<8x8xf32>
    %151 = arith.truncf %150 : vector<8x8xf32> to vector<8x8xbf16>
    %c0_78 = arith.constant 0 : index
    %c0_79 = arith.constant 0 : index
    %c0_80 = arith.constant 0 : index
    %152 = vector.load %arg28[%c0_78, %c0_79, %c0_80] : memref<4x8x8xbf16, #tpu.memory_space<vmem>>, vector<1x8x8xbf16>
    %153 = vector.shape_cast %152 : vector<1x8x8xbf16> to vector<8x8xbf16>
    %154 = vector.shape_cast %151 : vector<8x8xbf16> to vector<1x8x8xbf16>
    tpu.vector_store %arg28[%c0_78, %c0_79, %c0_80], %154 {strides = array<i32>} : memref<4x8x8xbf16, #tpu.memory_space<vmem>>, vector<1x8x8xbf16>,
    %155 = vector.extract_strided_slice %149 {offsets = [0, 8], sizes = [8, 8], strides = [1, 1]} : vector<8x32xf32> to vector<8x8xf32>
    %156 = arith.truncf %155 : vector<8x8xf32> to vector<8x8xbf16>
    %c1_81 = arith.constant 1 : index
    %c0_82 = arith.constant 0 : index
    %c0_83 = arith.constant 0 : index
    %157 = vector.load %arg28[%c1_81, %c0_82, %c0_83] : memref<4x8x8xbf16, #tpu.memory_space<vmem>>, vector<1x8x8xbf16>
    %158 = vector.shape_cast %157 : vector<1x8x8xbf16> to vector<8x8xbf16>
    %159 = vector.shape_cast %156 : vector<8x8xbf16> to vector<1x8x8xbf16>
    tpu.vector_store %arg28[%c1_81, %c0_82, %c0_83], %159 {strides = array<i32>} : memref<4x8x8xbf16, #tpu.memory_space<vmem>>, vector<1x8x8xbf16>,
    %160 = vector.extract_strided_slice %149 {offsets = [0, 16], sizes = [8, 8], strides = [1, 1]} : vector<8x32xf32> to vector<8x8xf32>
    %161 = arith.truncf %160 : vector<8x8xf32> to vector<8x8xbf16>
    %c2_84 = arith.constant 2 : index
    %c0_85 = arith.constant 0 : index
    %c0_86 = arith.constant 0 : index
    %162 = vector.load %arg28[%c2_84, %c0_85, %c0_86] : memref<4x8x8xbf16, #tpu.memory_space<vmem>>, vector<1x8x8xbf16>
    %163 = vector.shape_cast %162 : vector<1x8x8xbf16> to vector<8x8xbf16>
    %164 = vector.shape_cast %161 : vector<8x8xbf16> to vector<1x8x8xbf16>
    tpu.vector_store %arg28[%c2_84, %c0_85, %c0_86], %164 {strides = array<i32>} : memref<4x8x8xbf16, #tpu.memory_space<vmem>>, vector<1x8x8xbf16>,
    %165 = vector.extract_strided_slice %149 {offsets = [0, 24], sizes = [8, 8], strides = [1, 1]} : vector<8x32xf32> to vector<8x8xf32>
    %166 = arith.truncf %165 : vector<8x8xf32> to vector<8x8xbf16>
    %c3_87 = arith.constant 3 : index
    %c0_88 = arith.constant 0 : index
    %c0_89 = arith.constant 0 : index
    %167 = vector.load %arg28[%c3_87, %c0_88, %c0_89] : memref<4x8x8xbf16, #tpu.memory_space<vmem>>, vector<1x8x8xbf16>
    %168 = vector.shape_cast %167 : vector<1x8x8xbf16> to vector<8x8xbf16>
    %169 = vector.shape_cast %166 : vector<8x8xbf16> to vector<1x8x8xbf16>
    tpu.vector_store %arg28[%c3_87, %c0_88, %c0_89], %169 {strides = array<i32>} : memref<4x8x8xbf16, #tpu.memory_space<vmem>>, vector<1x8x8xbf16>,
    %c0_90 = arith.constant 0 : index
    %c0_91 = arith.constant 0 : index
    %c0_92 = arith.constant 0 : index
    %170 = vector.load %arg28[%c0_90, %c0_91, %c0_92] : memref<4x8x8xbf16, #tpu.memory_space<vmem>>, vector<4x8x8xbf16>
    "tpu.trace_start"() <{level = 10 : i32, message = "hqd,hkd->hqk"}> : () -> ()
    %cst_93 = arith.constant dense<0.000000e+00> : vector<4x8x8xf32>
    %171 = tpu.matmul %170, %146, %cst_93 {dimension_numbers = #tpu.dot_dimension_numbers<[2], [2], [1], [1], [0, 0, 0, 1, 1, 1], [0], [0]>} : vector<4x8x8xbf16>, vector<4x8x8xbf16>, vector<4x8x8xf32> -> vector<4x8x8xf32>
    "tpu.trace_stop"() : () -> ()
    %172 = vector.broadcast %145 : vector<1x1x8xf32> to vector<4x8x8xf32>
    %173 = arith.addf %171, %172 : vector<4x8x8xf32>
    %cst_94 = arith.constant dense<0xFF800000> : vector<4x8xf32>
    %174 = vector.multi_reduction <maximumf>, %173, %cst_94 [2] : vector<4x8x8xf32> to vector<4x8xf32>
    %175 = vector.shape_cast %174 : vector<4x8xf32> to vector<4x8x1xf32>
    %176 = vector.broadcast %175 : vector<4x8x1xf32> to vector<4x8x8xf32>
    %177 = arith.subf %173, %176 : vector<4x8x8xf32>
    %178 = math.exp %177 : vector<4x8x8xf32>
    %cst_95 = arith.constant dense<0.000000e+00> : vector<4x8xf32>
    %179 = vector.multi_reduction <add>, %178, %cst_95 [2] : vector<4x8x8xf32> to vector<4x8xf32>
    %180 = vector.shape_cast %179 : vector<4x8xf32> to vector<4x8x1xf32>
    %181 = arith.truncf %178 : vector<4x8x8xf32> to vector<4x8x8xbf16>
    "tpu.trace_start"() <{level = 10 : i32, message = "hqk,hkd->hqd"}> : () -> ()
    %cst_96 = arith.constant dense<0.000000e+00> : vector<4x8x8xf32>
    %182 = tpu.matmul %181, %147, %cst_96 {dimension_numbers = #tpu.dot_dimension_numbers<[2], [1], [1], [2], [0, 0, 0, 1, 1, 2], [0], [0]>} : vector<4x8x8xbf16>, vector<4x8x8xbf16>, vector<4x8x8xf32> -> vector<4x8x8xf32>
    "tpu.trace_stop"() : () -> ()
    %183 = tpu.reciprocal %180 {approx = true} : vector<4x8x1xf32> -> vector<4x8x1xf32>
    %184 = vector.broadcast %183 : vector<4x8x1xf32> to vector<4x8x8xf32>
    %185 = arith.mulf %182, %184 : vector<4x8x8xf32>
    %186 = vector.extract_strided_slice %185 {offsets = [0, 0, 0], sizes = [1, 8, 8], strides = [1, 1, 1]} : vector<4x8x8xf32> to vector<1x8x8xf32>
    %187 = vector.shape_cast %186 : vector<1x8x8xf32> to vector<8x8xf32>
    %c0_97 = arith.constant 0 : index
    %c0_98 = arith.constant 0 : index
    %188 = vector.load %arg29[%c0_97, %c0_98] : memref<8x32xf32, #tpu.memory_space<vmem>>, vector<8x8xf32>
    tpu.vector_store %arg29[%c0_97, %c0_98], %187 {strides = array<i32>} : memref<8x32xf32, #tpu.memory_space<vmem>>, vector<8x8xf32>,
    %189 = vector.extract_strided_slice %185 {offsets = [1, 0, 0], sizes = [1, 8, 8], strides = [1, 1, 1]} : vector<4x8x8xf32> to vector<1x8x8xf32>
    %190 = vector.shape_cast %189 : vector<1x8x8xf32> to vector<8x8xf32>
    %c0_99 = arith.constant 0 : index
    %c8_100 = arith.constant 8 : index
    %191 = vector.load %arg29[%c0_99, %c8_100] : memref<8x32xf32, #tpu.memory_space<vmem>>, vector<8x8xf32>
    tpu.vector_store %arg29[%c0_99, %c8_100], %190 {strides = array<i32>} : memref<8x32xf32, #tpu.memory_space<vmem>>, vector<8x8xf32>,
    %192 = vector.extract_strided_slice %185 {offsets = [2, 0, 0], sizes = [1, 8, 8], strides = [1, 1, 1]} : vector<4x8x8xf32> to vector<1x8x8xf32>
    %193 = vector.shape_cast %192 : vector<1x8x8xf32> to vector<8x8xf32>
    %c0_101 = arith.constant 0 : index
    %c16_102 = arith.constant 16 : index
    %194 = vector.load %arg29[%c0_101, %c16_102] : memref<8x32xf32, #tpu.memory_space<vmem>>, vector<8x8xf32>
    tpu.vector_store %arg29[%c0_101, %c16_102], %193 {strides = array<i32>} : memref<8x32xf32, #tpu.memory_space<vmem>>, vector<8x8xf32>,
    %195 = vector.extract_strided_slice %185 {offsets = [3, 0, 0], sizes = [1, 8, 8], strides = [1, 1, 1]} : vector<4x8x8xf32> to vector<1x8x8xf32>
    %196 = vector.shape_cast %195 : vector<1x8x8xf32> to vector<8x8xf32>
    %c0_103 = arith.constant 0 : index
    %c24_104 = arith.constant 24 : index
    %197 = vector.load %arg29[%c0_103, %c24_104] : memref<8x32xf32, #tpu.memory_space<vmem>>, vector<8x8xf32>
    tpu.vector_store %arg29[%c0_103, %c24_104], %196 {strides = array<i32>} : memref<8x32xf32, #tpu.memory_space<vmem>>, vector<8x8xf32>,
    %c0_105 = arith.constant 0 : index
    %c0_106 = arith.constant 0 : index
    %198 = vector.load %arg29[%c0_105, %c0_106] : memref<8x32xf32, #tpu.memory_space<vmem>>, vector<8x32xf32>
    %c0_107 = arith.constant 0 : index
    %c0_108 = arith.constant 0 : index
    %199 = vector.load %arg17[%c0_107, %c0_108] : memref<32x32xbf16, #tpu.memory_space<vmem>>, vector<32x32xbf16>
    %c0_109 = arith.constant 0 : index
    %c0_110 = arith.constant 0 : index
    %200 = vector.load %arg18[%c0_109, %c0_110] : memref<1x32xf32, #tpu.memory_space<vmem>>, vector<1x32xf32>
    %201 = arith.truncf %198 : vector<8x32xf32> to vector<8x32xbf16>
    %cst_111 = arith.constant dense<0.000000e+00> : vector<8x32xf32>
    %202 = tpu.matmul %201, %199, %cst_111 {dimension_numbers = #tpu.dot_dimension_numbers<[1], [0], [0], [1], [0, 0, 1, 1], [], []>} : vector<8x32xbf16>, vector<32x32xbf16>, vector<8x32xf32> -> vector<8x32xf32>
    %203 = vector.broadcast %200 : vector<1x32xf32> to vector<8x32xf32>
    %204 = arith.addf %202, %203 : vector<8x32xf32>
    %205 = arith.addf %108, %204 : vector<8x32xf32>
    %c2_112 = arith.constant 2 : index
    %c0_113 = arith.constant 0 : index
    %206 = vector.load %arg7[%c2_112, %c0_113] : memref<3x32xf32, #tpu.memory_space<vmem>>, vector<1x32xf32>
    %207 = vector.shape_cast %206 : vector<1x32xf32> to vector<32xf32>
    %c2_114 = arith.constant 2 : index
    %c0_115 = arith.constant 0 : index
    %208 = vector.load %arg8[%c2_114, %c0_115] : memref<3x32xf32, #tpu.memory_space<vmem>>, vector<1x32xf32>
    %209 = vector.shape_cast %208 : vector<1x32xf32> to vector<32xf32>
    %cst_116 = arith.constant dense<0.000000e+00> : vector<8xf32>
    %210 = vector.multi_reduction <add>, %205, %cst_116 [1] : vector<8x32xf32> to vector<8xf32>
    %211 = vector.shape_cast %210 : vector<8xf32> to vector<8x1xf32>
    %cst_117 = arith.constant 3.200000e+01 : f32
    %212 = vector.broadcast %cst_117 : f32 to vector<8x1xf32>
    %213 = arith.divf %211, %212 : vector<8x1xf32>
    %214 = vector.broadcast %213 : vector<8x1xf32> to vector<8x32xf32>
    %215 = arith.subf %205, %214 : vector<8x32xf32>
    %216 = arith.mulf %215, %215 : vector<8x32xf32>
    %cst_118 = arith.constant dense<0.000000e+00> : vector<8xf32>
    %217 = vector.multi_reduction <add>, %216, %cst_118 [1] : vector<8x32xf32> to vector<8xf32>
    %218 = vector.shape_cast %217 : vector<8xf32> to vector<8x1xf32>
    %cst_119 = arith.constant 3.200000e+01 : f32
    %219 = vector.broadcast %cst_119 : f32 to vector<8x1xf32>
    %220 = arith.divf %218, %219 : vector<8x1xf32>
    %221 = vector.broadcast %213 : vector<8x1xf32> to vector<8x32xf32>
    %222 = arith.subf %205, %221 : vector<8x32xf32>
    %cst_120 = arith.constant 9.99999974E-6 : f32
    %223 = vector.broadcast %cst_120 : f32 to vector<8x1xf32>
    %224 = arith.addf %220, %223 : vector<8x1xf32>
    %225 = math.rsqrt %224 : vector<8x1xf32>
    %226 = vector.broadcast %225 : vector<8x1xf32> to vector<8x32xf32>
    %227 = arith.mulf %222, %226 : vector<8x32xf32>
    %228 = vector.shape_cast %207 : vector<32xf32> to vector<1x32xf32>
    %229 = vector.broadcast %228 : vector<1x32xf32> to vector<8x32xf32>
    %230 = arith.mulf %227, %229 : vector<8x32xf32>
    %231 = vector.shape_cast %209 : vector<32xf32> to vector<1x32xf32>
    %232 = vector.broadcast %231 : vector<1x32xf32> to vector<8x32xf32>
    %233 = arith.addf %230, %232 : vector<8x32xf32>
    %234 = arith.truncf %233 : vector<8x32xf32> to vector<8x32xbf16>
    %c0_121 = arith.constant 0 : index
    %c0_122 = arith.constant 0 : index
    %235 = vector.load %arg19[%c0_121, %c0_122] : memref<32x64xbf16, #tpu.memory_space<vmem>>, vector<32x64xbf16>
    %cst_123 = arith.constant dense<0.000000e+00> : vector<8x64xf32>
    %236 = tpu.matmul %234, %235, %cst_123 {dimension_numbers = #tpu.dot_dimension_numbers<[1], [0], [0], [1], [0, 0, 1, 1], [], []>} : vector<8x32xbf16>, vector<32x64xbf16>, vector<8x64xf32> -> vector<8x64xf32>
    %c0_124 = arith.constant 0 : index
    %c0_125 = arith.constant 0 : index
    %237 = vector.load %arg20[%c0_124, %c0_125] : memref<1x64xf32, #tpu.memory_space<vmem>>, vector<1x64xf32>
    %238 = vector.broadcast %237 : vector<1x64xf32> to vector<8x64xf32>
    %239 = arith.addf %236, %238 : vector<8x64xf32>
    %cst_126 = arith.constant 5.000000e-01 : f32
    %240 = vector.broadcast %cst_126 : f32 to vector<8x64xf32>
    %241 = arith.mulf %240, %239 : vector<8x64xf32>
    %cst_127 = arith.constant 0.707106769 : f32
    %242 = vector.broadcast %cst_127 : f32 to vector<8x64xf32>
    %243 = arith.mulf %239, %242 : vector<8x64xf32>
    %244 = math.erf %243 : vector<8x64xf32>
    %cst_128 = arith.constant 1.000000e+00 : f32
    %245 = vector.broadcast %cst_128 : f32 to vector<8x64xf32>
    %246 = arith.addf %245, %244 : vector<8x64xf32>
    %247 = arith.mulf %241, %246 : vector<8x64xf32>
    %248 = arith.truncf %247 : vector<8x64xf32> to vector<8x64xbf16>
    %c0_129 = arith.constant 0 : index
    %c0_130 = arith.constant 0 : index
    %249 = vector.load %arg21[%c0_129, %c0_130] : memref<64x32xbf16, #tpu.memory_space<vmem>>, vector<64x32xbf16>
    %cst_131 = arith.constant dense<0.000000e+00> : vector<8x32xf32>
    %250 = tpu.matmul %248, %249, %cst_131 {dimension_numbers = #tpu.dot_dimension_numbers<[1], [0], [0], [1], [0, 0, 1, 1], [], []>} : vector<8x64xbf16>, vector<64x32xbf16>, vector<8x32xf32> -> vector<8x32xf32>
    %251 = arith.addf %205, %250 : vector<8x32xf32>
    %c0_132 = arith.constant 0 : index
    %c0_133 = arith.constant 0 : index
    %252 = vector.load %arg22[%c0_132, %c0_133] : memref<1x32xf32, #tpu.memory_space<vmem>>, vector<1x32xf32>
    %253 = vector.broadcast %252 : vector<1x32xf32> to vector<8x32xf32>
    %254 = arith.addf %251, %253 : vector<8x32xf32>
    %c0_134 = arith.constant 0 : index
    %c0_135 = arith.constant 0 : index
    %c0_136 = arith.constant 0 : index
    %255 = vector.load %arg23[%c0_134, %c0_135, %c0_136] : memref<1x8x32xf32, #tpu.memory_space<vmem>>, vector<1x8x32xf32>
    %256 = vector.shape_cast %255 : vector<1x8x32xf32> to vector<8x32xf32>
    %257 = vector.shape_cast %254 : vector<8x32xf32> to vector<1x8x32xf32>
    tpu.vector_store %arg23[%c0_134, %c0_135, %c0_136], %257 {strides = array<i32>} : memref<1x8x32xf32, #tpu.memory_space<vmem>>, vector<1x8x32xf32>,
    return
  }
  func.func @transform_0(%arg0: i32, %arg1: i32) -> (i32, i32, i32) {
    %c0_i32 = arith.constant 0 : i32
    %c0_i32_0 = arith.constant 0 : i32
    %c0_i32_1 = arith.constant 0 : i32
    return %arg0, %c0_i32, %c0_i32_0 : i32, i32, i32
  }
  func.func @transform_1(%arg0: i32, %arg1: i32) -> (i32, i32, i32) {
    %c0_i32 = arith.constant 0 : i32
    %c0_i32_0 = arith.constant 0 : i32
    %c0_i32_1 = arith.constant 0 : i32
    return %arg0, %c0_i32, %c0_i32_0 : i32, i32, i32
  }
  func.func @transform_2(%arg0: i32, %arg1: i32) -> (i32, i32, i32) {
    %c0_i32 = arith.constant 0 : i32
    %c0_i32_0 = arith.constant 0 : i32
    %c0_i32_1 = arith.constant 0 : i32
    return %arg0, %c0_i32, %c0_i32_0 : i32, i32, i32
  }
  func.func @transform_3(%arg0: i32, %arg1: i32) -> (i32, i32) {
    %c0_i32 = arith.constant 0 : i32
    %c0_i32_0 = arith.constant 0 : i32
    %c0_i32_1 = arith.constant 0 : i32
    return %c0_i32, %c0_i32_0 : i32, i32
  }
  func.func @transform_4(%arg0: i32, %arg1: i32) -> (i32, i32, i32) {
    %c0_i32 = arith.constant 0 : i32
    %c0_i32_0 = arith.constant 0 : i32
    %c0_i32_1 = arith.constant 0 : i32
    return %arg0, %c0_i32, %c0_i32_0 : i32, i32, i32
  }
  func.func @transform_5(%arg0: i32, %arg1: i32) -> (i32, i32) {
    %c0_i32 = arith.constant 0 : i32
    %c0_i32_0 = arith.constant 0 : i32
    %c0_i32_1 = arith.constant 0 : i32
    return %c0_i32, %c0_i32_0 : i32, i32
  }
  func.func @transform_6(%arg0: i32, %arg1: i32) -> (i32, i32) {
    %c0_i32 = arith.constant 0 : i32
    %c0_i32_0 = arith.constant 0 : i32
    %c0_i32_1 = arith.constant 0 : i32
    return %c0_i32, %c0_i32_0 : i32, i32
  }
  func.func @transform_7(%arg0: i32, %arg1: i32) -> (i32, i32) {
    %c0_i32 = arith.constant 0 : i32
    %c0_i32_0 = arith.constant 0 : i32
    %c0_i32_1 = arith.constant 0 : i32
    return %c0_i32, %c0_i32_0 : i32, i32
  }
  func.func @transform_8(%arg0: i32, %arg1: i32) -> (i32, i32) {
    %c0_i32 = arith.constant 0 : i32
    %c0_i32_0 = arith.constant 0 : i32
    %c0_i32_1 = arith.constant 0 : i32
    return %c0_i32, %c0_i32_0 : i32, i32
  }
  func.func @transform_9(%arg0: i32, %arg1: i32) -> (i32, i32) {
    %c0_i32 = arith.constant 0 : i32
    %c0_i32_0 = arith.constant 0 : i32
    %c0_i32_1 = arith.constant 0 : i32
    return %c0_i32, %c0_i32_0 : i32, i32
  }
  func.func @transform_10(%arg0: i32, %arg1: i32) -> (i32, i32) {
    %c0_i32 = arith.constant 0 : i32
    %c0_i32_0 = arith.constant 0 : i32
    %c0_i32_1 = arith.constant 0 : i32
    return %c0_i32, %c0_i32_0 : i32, i32
  }
  func.func @transform_11(%arg0: i32, %arg1: i32) -> (i32, i32) {
    %c0_i32 = arith.constant 0 : i32
    %c0_i32_0 = arith.constant 0 : i32
    %c0_i32_1 = arith.constant 0 : i32
    return %c0_i32, %c0_i32_0 : i32, i32
  }
  func.func @transform_12(%arg0: i32, %arg1: i32) -> (i32, i32) {
    %c0_i32 = arith.constant 0 : i32
    %c0_i32_0 = arith.constant 0 : i32
    %c0_i32_1 = arith.constant 0 : i32
    return %c0_i32, %c0_i32_0 : i32, i32
  }
  func.func @transform_13(%arg0: i32, %arg1: i32) -> (i32, i32) {
    %c0_i32 = arith.constant 0 : i32
    %c0_i32_0 = arith.constant 0 : i32
    %c0_i32_1 = arith.constant 0 : i32
    return %c0_i32, %c0_i32_0 : i32, i32
  }
  func.func @transform_14(%arg0: i32, %arg1: i32) -> (i32, i32) {
    %c0_i32 = arith.constant 0 : i32
    %c0_i32_0 = arith.constant 0 : i32
    %c0_i32_1 = arith.constant 0 : i32
    return %c0_i32, %c0_i32_0 : i32, i32
  }
  func.func @transform_15(%arg0: i32, %arg1: i32) -> (i32, i32) {
    %c0_i32 = arith.constant 0 : i32
    %c0_i32_0 = arith.constant 0 : i32
    %c0_i32_1 = arith.constant 0 : i32
    return %c0_i32, %c0_i32_0 : i32, i32
  }
  func.func @transform_16(%arg0: i32, %arg1: i32) -> (i32, i32) {
    %c0_i32 = arith.constant 0 : i32
    %c0_i32_0 = arith.constant 0 : i32
    %c0_i32_1 = arith.constant 0 : i32
    return %c0_i32, %c0_i32_0 : i32, i32
  }
  func.func @transform_17(%arg0: i32, %arg1: i32) -> (i32, i32) {
    %c0_i32 = arith.constant 0 : i32
    %c0_i32_0 = arith.constant 0 : i32
    %c0_i32_1 = arith.constant 0 : i32
    return %c0_i32, %c0_i32_0 : i32, i32
  }
  func.func @transform_18(%arg0: i32, %arg1: i32) -> (i32, i32) {
    %c0_i32 = arith.constant 0 : i32
    %c0_i32_0 = arith.constant 0 : i32
    %c0_i32_1 = arith.constant 0 : i32
    return %c0_i32, %c0_i32_0 : i32, i32
  }
  func.func @transform_19(%arg0: i32, %arg1: i32) -> (i32, i32) {
    %c0_i32 = arith.constant 0 : i32
    %c0_i32_0 = arith.constant 0 : i32
    %c0_i32_1 = arith.constant 0 : i32
    return %c0_i32, %c0_i32_0 : i32, i32
  }
  func.func @transform_20(%arg0: i32, %arg1: i32) -> (i32, i32) {
    %c0_i32 = arith.constant 0 : i32
    %c0_i32_0 = arith.constant 0 : i32
    %c0_i32_1 = arith.constant 0 : i32
    return %c0_i32, %c0_i32_0 : i32, i32
  }
  func.func @transform_21(%arg0: i32, %arg1: i32) -> (i32, i32, i32) {
    %c0_i32 = arith.constant 0 : i32
    %c0_i32_0 = arith.constant 0 : i32
    return %arg0, %arg1, %c0_i32 : i32, i32, i32
  }
}

</mosaic_0001>

<bundles_post_ra>
// kernel: tpu_custom_call.1
= control target key start
LH: loop header
LB: loop body
LE: loop exit
PB: predicated region body
PF: predicated region fallthrough
CT: control target
= control target key end

     0   :  { %s4745_s0 = inlined_call_operand.vmem [shape: f32[2,8,32], index: 0, kind: input, shape index: {}]   ;;  %s4746_s1 = inlined_call_operand.vmem [shape: f32[2,8,32], index: 1, kind: input, shape index: {}]   ;;  %s4747_s2 = inlined_call_operand.hbm [shape: f32[2,1,8], index: 2, kind: input, shape index: {}]   ;;  %s4748_s3 = inlined_call_operand.hbm [shape: f32[8,8], index: 3, kind: input, shape index: {}]   ;;  %s4749_s4 = inlined_call_operand.hbm [shape: f32[2,1,8], index: 4, kind: input, shape index: {}]   ;;  %s4750_s5 = inlined_call_operand.hbm [shape: f32[3,32], index: 5, kind: input, shape index: {}]   ;;  %s4751_s6 = inlined_call_operand.hbm [shape: f32[3,32], index: 6, kind: input, shape index: {}]   ;;  %s4752_s7 = inlined_call_operand.vmem [shape: bf16[32,96], index: 7, kind: input, shape index: {}]   ;;  %s4753_s8 = inlined_call_operand.hbm [shape: f32[1,96], index: 8, kind: input, shape index: {}]   ;;  %s4754_s9 = inlined_call_operand.vmem [shape: bf16[32,32], index: 9, kind: input, shape index: {}]   ;;  %s4755_s10 = inlined_call_operand.hbm [shape: f32[1,32], index: 10, kind: input, shape index: {}]   ;;  %s4756_s11 = inlined_call_operand.hbm [shape: bf16[32,32], index: 11, kind: input, shape index: {}]   ;;  %s4757_s12 = inlined_call_operand.hbm [shape: f32[1,32], index: 12, kind: input, shape index: {}]   ;;  %s4758_s13 = inlined_call_operand.vmem [shape: bf16[32,64], index: 13, kind: input, shape index: {}]   ;;  %s4759_s14 = inlined_call_operand.hbm [shape: f32[1,64], index: 14, kind: input, shape index: {}]   ;;  %s4760_s15 = inlined_call_operand.hbm [shape: bf16[32,32], index: 15, kind: input, shape index: {}]   ;;  %s4761_s16 = inlined_call_operand.hbm [shape: f32[1,32], index: 16, kind: input, shape index: {}]   ;;  %s4762_s17 = inlined_call_operand.vmem [shape: bf16[32,64], index: 17, kind: input, shape index: {}]   ;;  %s4763_s18 = inlined_call_operand.vmem [shape: f32[1,64], index: 18, kind: input, shape index: {}]   ;;  %s4764_s19 = inlined_call_operand.vmem [shape: bf16[64,32], index: 19, kind: input, shape index: {}]   ;;  %s4765_s20 = inlined_call_operand.vmem [shape: f32[1,32], index: 20, kind: input, shape index: {}]   ;;  %s4766_s21 = inlined_call_operand.hbm [shape: f32[2,8,32], index: 21, kind: output, shape index: {}]  }
   0x1   :  { %4797 = sst [smem:[#allocation43_spill]] %s4745_s0 }
   0x2   :  { %4798 = sst [smem:[#allocation44_spill]] %s4746_s1 }
   0x3   :  { %4799 = sst [smem:[#allocation45_spill]] %s4747_s2 }
   0x4   :  { %4800 = sst [smem:[#allocation46_spill]] %s4748_s3 }
   0x5   :  { %4801 = sst [smem:[#allocation47_spill]] %s4749_s4 }
   0x6   :  { %4802 = sst [smem:[#allocation48_spill]] %s4750_s5 }
   0x7   :  { %4803 = sst [smem:[#allocation49_spill]] %s4751_s6 }
   0x8   :  { %4804 = sst [smem:[#allocation50_spill]] %s4752_s7 }
   0x9   :  { %4805 = sst [smem:[#allocation51_spill]] %s4754_s9 }
   0xa   :  { %4806 = sst [smem:[#allocation52_spill]] %s4755_s10 }
   0xb   :  { %4807 = sst [smem:[#allocation53_spill]] %s4757_s12 }
   0xc   :  { %4808 = sst [smem:[#allocation54_spill]] %s4758_s13 }
   0xd   :  { %4809 = sst [smem:[#allocation55_spill]] %s4760_s15 }
   0xe   :  { %4810 = sst [smem:[#allocation56_spill]] %s4762_s17 }
   0xf   :  { %4811 = sst [smem:[#allocation57_spill]] %s4763_s18 }
  0x10   :  { %4812 = sst [smem:[#allocation58_spill]] %s4764_s19 }
  0x11   :  { %4813 = sst [smem:[#allocation59_spill]] %s4765_s20 }
  0x12   :  { %4814 = sst [smem:[#allocation60_spill]] %s4766_s21 }
  0x13   :  { %26 = vsyncpa [#allocation9], 0 }
  0x14   :  { %28 = vsyncpa [#allocation9 + $0x1], 0 }
  0x15   :  { %29 = vsyncpa [#allocation12], 0 }
  0x16   :  { %30 = vsyncpa [#allocation16], 0 }
  0x17   :  { %31 = vsyncpa [#allocation19], 0 }
  0x18   :  { %32 = vsyncpa [#allocation22], 0 }
  0x19   :  { %33 = vsyncpa [#allocation25], 0 }
  0x1a   :  { %34 = vsyncpa [#allocation10], 0 }
  0x1b   :  { %36 = vsyncpa [#allocation10 + $0x1], 0  ;;  %s3977_s2 = smov 0   ;;  %s3979_s25 = smov 0  }
  0x1c   :  { %s3981_s26 = smov 0   ;;  %s3983_s27 = smov 0  }
  0x1d   :  { %s3985_s3 = smov 0   ;;  %s3987_s28 = smov 0  }
  0x1e LB: > { %4815 = sst [smem:[#allocation37_spill]] %s3818_s2  ;;  %s4008_s29 = sadd.s32 4294967295, %s3838_s28   ;;  %s3838_s28 = sphi %s3987_s28, %s42_s28   ;;  %s3834_s3 = sphi %s3985_s3, %s4880_s3   ;;  %s3830_s27 = sphi %s3983_s27, %s4879_s27   ;;  %s3826_s26 = sphi %s3981_s26, %s4883_s26   ;;  %s3822_s25 = sphi %s3979_s25, %s4882_s25   ;;  %s3818_s2 = sphi %s3977_s2, %s4881_s2  }
  0x1f   : > { %4816 = sst [smem:[#allocation38_spill]] %s3834_s3  ;;  %p2824_p0 = scmp.ge.s32.totalorder %s3838_s28, 1 }
  0x20   : > { %4817 = sst [smem:[#allocation39_spill]] %s3838_s28  ;;  %p4775_p1 = scmp.eq.s32.totalorder %s4008_s29, 0 }
  0x21   : > { %p548_p2 = scmp.lt.s32.totalorder %s3838_s28, 3  ;;  %s3840_s4 = smov [#allocation11]  }
  0x22   : > { %s561_s30 = sshll.u32 %s3840_s4, 4  ;;  %s3841_s5 = smov [#allocation15]   ;;  %s562_s30 = int_to_ptr.vmem [resolvable:$true] %s561_s30 }
  0x23   : > { %p4013_p3 = pnand %p2824_p0, %p548_p2  ;;  %s583_s22 = sshll.u32 %s3841_s5, 4  ;;  %s4026_s22 = int_to_ptr.vmem [resolvable:$true] %s583_s22 }
  0x24   : > { %s3842_s1 = smov [#allocation18]   ;;  %s4820_s20 = sld [smem:[#allocation46_spill]] }
  0x25   : > { %s4818_s0 = scalar_select %p4013_p3, 1, 0 }
  0x26   : > { %p3192_p5 = pneg %p4013_p3  ;;  %s611_s24 = sshll.u32 %s3842_s1, 4  ;;  %s4028_s24 = int_to_ptr.vmem [resolvable:$true] %s611_s24 }
  0x28   : > { %p4022_p6 = pnand %p3192_p5, %p4775_p1 }
  0x2a   : > { %s4819_s23 = scalar_select %p4022_p6, 1, 0 }
  0x2b   : > { %s3388_s18 = scalar_lea.hbm %s4820_s20, 128  ;;  %p4038_p8 = pneg %p4022_p6 }
  0x2c   : > { %p3389_p7 = scmp.ne.s32.totalorder %s4820_s20, %s3388_s18  ;;  %p3395_p11 = scmp.lt.u32.totalorder %s3388_s18, %s4820_s20 }
  0x2e   : > { %p3391_p9 = pnand %p4038_p8, %p3389_p7 }
  0x30   : > { %p3392_p10 = pneg %p3391_p9 }
  0x32   : > { %p3397_p12 = pnand %p3395_p11, %p3392_p10 }
  0x34   : > { %3400 = shalt.err (!%p3397_p12)
}
  0x35   : > { %s3401_s21 = scalar_lea.vmem %s562_s30, 128  ;;  %p3409_p5 = scmp.lt.s32.totalorder %s562_s30, %s562_s30 }
  0x36   : > { %p3402_p13 = scmp.ne.s32.totalorder %s562_s30, %s3401_s21  ;;  %p3410_p4 = scmp.lt.s32.totalorder %s3401_s21, %s3401_s21 }
  0x38   : > { %p3404_p0 = pnand %p3402_p13, %p4038_p8  ;;  %p3411_p1 = por %p3410_p4, %p3409_p5 }
  0x3a   : > { %p3405_p2 = pneg %p3404_p0 }
  0x3c   : > { %p3412_p3 = pnand %p3411_p1, %p3405_p2 }
  0x3e   : > { %3415 = shalt.err (!%p3412_p3)
}
  0x3f   : > { %3195 = dma.hbm_to_vmem [thread:$0]  (!%p4022_p6), %s4820_s20, 128, %s562_s30, [#allocation12]  }
  0x40   : > { %s4822_s6 = sld [smem:[#allocation49_spill]] }
  0x46   : > { %s3416_s4 = scalar_lea.hbm %s4822_s6, 64 }
  0x47   : > { %p3417_p7 = scmp.ne.s32.totalorder %s4822_s6, %s3416_s4  ;;  %p3423_p1 = scmp.lt.u32.totalorder %s3416_s4, %s4822_s6 }
  0x49   : > { %p3419_p9 = pnand %p3417_p7, %p4038_p8 }
  0x4b   : > { %p3420_p4 = pneg %p3419_p9 }
  0x4d   : > { %p3425_p3 = pnand %p3423_p1, %p3420_p4 }
  0x4f   : > { %3428 = shalt.err (!%p3425_p3)
}
  0x50   : > { %s3429_s30 = scalar_lea.vmem %s4026_s22, 64  ;;  %p3437_p13 = scmp.lt.s32.totalorder %s4026_s22, %s4026_s22 }
  0x51   : > { %p3430_p10 = scmp.ne.s32.totalorder %s4026_s22, %s3429_s30  ;;  %p3438_p0 = scmp.lt.s32.totalorder %s3429_s30, %s3429_s30 }
  0x53   : > { %p3432_p11 = pnand %p3430_p10, %p4038_p8  ;;  %p3439_p2 = por %p3438_p0, %p3437_p13 }
  0x55   : > { %p3433_p12 = pneg %p3432_p11 }
  0x57   : > { %p3440_p5 = pnand %p3439_p2, %p3433_p12 }
  0x59   : > { %3443 = shalt.err (!%p3440_p5)
}
  0x5a   : > { %3201 = dma.hbm_to_vmem [thread:$0]  (!%p4022_p6), %s4822_s6, 64, %s4026_s22, [#allocation16]  }
  0x5b   : > { %s4823_s10 = sld [smem:[#allocation52_spill]] }
  0x61   : > { %s3444_s9 = scalar_lea.hbm %s4823_s10, 16 }
  0x62   : > { %p3445_p7 = scmp.ne.s32.totalorder %s4823_s10, %s3444_s9  ;;  %p3451_p1 = scmp.lt.u32.totalorder %s3444_s9, %s4823_s10 }
  0x64   : > { %p3447_p9 = pnand %p3445_p7, %p4038_p8 }
  0x66   : > { %p3448_p4 = pneg %p3447_p9 }
  0x68   : > { %p3453_p3 = pnand %p3451_p1, %p3448_p4 }
  0x6a   : > { %3456 = shalt.err (!%p3453_p3)
}
  0x6b   : > { %s3457_s22 = scalar_lea.vmem %s4028_s24, 16  ;;  %s3464_s30 = scalar_lea.vmem %s4028_s24, 32 }
  0x6c   : > { %p3458_p10 = scmp.ne.s32.totalorder %s4028_s24, %s3457_s22  ;;  %p3465_p13 = scmp.lt.s32.totalorder %s4028_s24, %s4028_s24 }
  0x6d   : > { %p3466_p0 = scmp.lt.s32.totalorder %s3464_s30, %s3457_s22 }
  0x6e   : > { %p3460_p11 = pnand %p3458_p10, %p4038_p8 }
  0x6f   : > { %p3467_p2 = por %p3466_p0, %p3465_p13 }
  0x70   : > { %p3461_p12 = pneg %p3460_p11 }
  0x72   : > { %p3468_p5 = pnand %p3467_p2, %p3461_p12 }
  0x74   : > { %3471 = shalt.err (!%p3468_p5)
}
  0x75   : > { %3207 = dma.hbm_to_vmem [thread:$0]  (!%p4022_p6), %s4823_s10, 16, %s4028_s24, [#allocation19]  }
  0x76   : > { %s3843_s17 = smov [#allocation21]   ;;  %s4824_s12 = sld [smem:[#allocation53_spill]] }
  0x77   : > { %s635_s19 = sshll.u32 %s3843_s17, 4  ;;  %s636_s19 = int_to_ptr.vmem [resolvable:$true] %s635_s19 }
  0x7c   : > { %s3472_s4 = scalar_lea.hbm %s4824_s12, 16 }
  0x7d   : > { %p3473_p7 = scmp.ne.s32.totalorder %s4824_s12, %s3472_s4  ;;  %p3479_p1 = scmp.lt.u32.totalorder %s3472_s4, %s4824_s12 }
  0x7f   : > { %p3475_p9 = pnand %p3473_p7, %p4038_p8 }
  0x81   : > { %p3476_p4 = pneg %p3475_p9 }
  0x83   : > { %p3481_p3 = pnand %p3479_p1, %p3476_p4 }
  0x85   : > { %3484 = shalt.err (!%p3481_p3)
}
  0x86   : > { %s3485_s24 = scalar_lea.vmem %s636_s19, 16  ;;  %s3492_s7 = scalar_lea.vmem %s636_s19, 32 }
  0x87   : > { %p3486_p10 = scmp.ne.s32.totalorder %s636_s19, %s3485_s24  ;;  %p3493_p13 = scmp.lt.s32.totalorder %s636_s19, %s636_s19 }
  0x88   : > { %p3494_p0 = scmp.lt.s32.totalorder %s3492_s7, %s3485_s24 }
  0x89   : > { %p3488_p11 = pnand %p3486_p10, %p4038_p8 }
  0x8a   : > { %p3495_p2 = por %p3494_p0, %p3493_p13 }
  0x8b   : > { %p3489_p12 = pneg %p3488_p11 }
  0x8d   : > { %p3496_p5 = pnand %p3495_p2, %p3489_p12 }
  0x8f   : > { %3499 = shalt.err (!%p3496_p5)
}
  0x90   : > { %3213 = dma.hbm_to_vmem [thread:$0]  (!%p4022_p6), %s4824_s12, 16, %s636_s19, [#allocation22]  }
  0x91   : > { %s3844_s9 = smov [#allocation24]   ;;  %s4825_s15 = sld [smem:[#allocation55_spill]] }
  0x92   : > { %s659_s18 = sshll.u32 %s3844_s9, 4  ;;  %s660_s18 = int_to_ptr.vmem [resolvable:$true] %s659_s18 }
  0x97   : > { %s3500_s21 = scalar_lea.hbm %s4825_s15, 256 }
  0x98   : > { %p3501_p7 = scmp.ne.s32.totalorder %s4825_s15, %s3500_s21  ;;  %p3507_p1 = scmp.lt.u32.totalorder %s3500_s21, %s4825_s15 }
  0x9a   : > { %p3503_p9 = pnand %p3501_p7, %p4038_p8 }
  0x9c   : > { %p3504_p4 = pneg %p3503_p9 }
  0x9e   : > { %p3509_p3 = pnand %p3507_p1, %p3504_p4 }
  0xa0   : > { %3512 = shalt.err (!%p3509_p3)
}
  0xa1   : > { %s3513_s19 = scalar_lea.vmem %s660_s18, 256  ;;  %p3521_p13 = scmp.lt.s32.totalorder %s660_s18, %s660_s18 }
  0xa2   : > { %p3514_p10 = scmp.ne.s32.totalorder %s660_s18, %s3513_s19  ;;  %p3522_p0 = scmp.lt.s32.totalorder %s3513_s19, %s3513_s19 }
  0xa4   : > { %p3516_p11 = pnand %p3514_p10, %p4038_p8  ;;  %p3523_p2 = por %p3522_p0, %p3521_p13 }
  0xa6   : > { %p3517_p12 = pneg %p3516_p11 }
  0xa8   : > { %p3524_p5 = pnand %p3523_p2, %p3517_p12 }
  0xaa   : > { %3527 = shalt.err (!%p3524_p5)
}
  0xab   : > { %s4779_s13 = smov 64   ;;  %s4780_s17 = smov 4  }
  0xac   : > { %3219 = dma.hbm_to_vmem [thread:$0]  (!%p4022_p6), %s4825_s15, 256, %s660_s18, [#allocation25], %s4779_s13, %s4779_s13, %s4780_s17  }
  0xad   : > { %s2823_s1 = sadd.s32 4294967294, %s3838_s28   ;;  %s54_s21 = sadd.s32 1, %s3834_s3 }
  0xae   : > { %s113_s22 = sadd.s32 1, %s3826_s26  ;;  %p56_p7 = scmp.ge.s32.totalorder %s54_s21, 2 }
  0xaf   : > { %p120_p9 = scmp.ne.s32.totalorder %s3826_s26, %s3822_s25  ;;  %p121_p4 = scmp.eq.s32.totalorder %s3838_s28, 0 }
  0xb0   : > { %p126_p1 = scmp.ne.s32.totalorder %s3822_s25, %s3818_s2  ;;  %s4885_s21 = smov (%p56_p7, %s54_s21), 0 }
  0xb1   : > { %4826 = sst [smem:[#allocation40_spill]] %s4885_s21  ;;  %p4150_p3 = por %p121_p4, %p120_p9 }
  0xb2   : > { %p4828_p10 = scmp.eq.s32.totalorder %s4008_s29, 0  ;;  %s110_s24 = ssub.s32 %s3834_s3, %s4885_s21 }
  0xb3   : > { %p535_p12 = scmp.eq.s32.totalorder %s4008_s29, 1  ;;  %p111_p13 = scmp.eq.s32.totalorder %s110_s24, 0 }
  0xb4   : > { %p4156_p11 = por %p4828_p10, %p126_p1  ;;  %p541_p0 = scmp.eq.s32.totalorder %s2823_s1, 1 }
  0xb5   : > { %p4163_p2 = por %p535_p12, %p120_p9  ;;  %p3244_p5 = scmp.lt.s32.totalorder %s3838_s28, 2 }
  0xb6   : > { %s4829_s18 = scalar_select %p4156_p11, 1, 0 }
  0xb7   : > { %s4830_s7 = scalar_select %p4163_p2, 1, 0 }
  0xb8   : > { %s4169_s19 = scalar_select %p111_p13, %s3826_s26, %s113_s22  }
  0xb9   : > { %p4171_p7 = por %p541_p0, %p126_p1  ;;  %s710_s4 = sand.u32 1, %s3838_s28  }
  0xba   : > { %4831 = sst [smem:[#allocation41_spill]] %s4169_s19  ;;  %s4786_s13 = sand.u32 1, %s3826_s26  }
  0xbb   : > { %s4832_s9 = scalar_select %p4171_p7, 1, 0 }
  0xbc   : > { %s2836_s17 = sshll.u32 %s3834_s3, 4  ;;  %s4834_s12 = sld [smem:[#allocation45_spill]] }
  0xbd   : > { %4833 = sst [smem:[#allocation42_spill]] %s4832_s9  ;;  %s713_s1 = scalar_lea.vmem [#allocation8], %s4786_s13 }
  0xbe   : > { %s720_s22 = sshll.u32 %s713_s1, 4  ;;  %p4189_p9 = pnand %p3244_p5, %p4150_p3  ;;  %s4185_s22 = int_to_ptr.vmem [resolvable:$true] %s720_s22 }
  0xbf   : > { %s4836_s3 = sld [smem:[#allocation47_spill]]  ;;  %s4198_s10 = scalar_lea.sflag [#allocation9], %s710_s4 }
  0xc0   : > { %s4835_s24 = scalar_select %p4189_p9, 1, 0 }
  0xc1   : > { %p4794_p1 = pneg %p4189_p9 }
  0xc2   : > { %s4181_s15 = scalar_lea.hbm %s4834_s12, %s2836_s17  ;;  %s3533_s13 = scalar_lea.hbm %s4834_s12, 32 }
  0xc3   : > { %s3528_s28 = scalar_lea.hbm %s4181_s15, 16  ;;  %p3534_p12 = scmp.lt.u32.totalorder %s4181_s15, %s4834_s12 }
  0xc4   : > { %p3529_p4 = scmp.ne.s32.totalorder %s4181_s15, %s3528_s28  ;;  %p3535_p13 = scmp.lt.u32.totalorder %s3533_s13, %s3528_s28 }
  0xc5   : > { %s4837_s19 = smov %s4836_s3  ;;  %s4196_s6 = scalar_lea.hbm %s4836_s3, %s2836_s17 }
  0xc6   : > { %p3531_p10 = pnand %p4794_p1, %p3529_p4  ;;  %p3536_p0 = por %p3535_p13, %p3534_p12 }
  0xc7   : > { %p3537_p5 = scmp.lt.u32.totalorder %s3528_s28, %s4181_s15 }
  0xc8   : > { %p3532_p3 = pneg %p3531_p10 }
  0xc9   : > { %p3538_p7 = por %p3537_p5, %p3536_p0 }
  0xcb   : > { %p3539_p2 = pnand %p3538_p7, %p3532_p3 }
  0xcd   : > { %3542 = shalt.err (!%p3539_p2)
}
  0xce   : > { %s3543_s3 = scalar_lea.vmem %s4185_s22, 16  ;;  %s3847_s17 = smov [#allocation8]  }
  0xcf   : > { %p3544_p4 = scmp.ne.s32.totalorder %s4185_s22, %s3543_s3  ;;  %s3548_s21 = sshll.u32 %s3847_s17, 4  ;;  %s3549_s21 = int_to_ptr.vmem [resolvable:$false] %s3548_s21 }
  0xd0   : > { %s3550_s9 = scalar_lea.vmem %s3549_s21, 32  ;;  %p3551_p6 = scmp.lt.s32.totalorder %s4185_s22, %s3549_s21 }
  0xd1   : > { %p3546_p10 = pnand %p3544_p4, %p4794_p1  ;;  %p3552_p12 = scmp.lt.s32.totalorder %s3550_s9, %s3543_s3 }
  0xd3   : > { %p3547_p11 = pneg %p3546_p10  ;;  %p3553_p13 = por %p3552_p12, %p3551_p6 }
  0xd5   : > { %p3554_p0 = pnand %p3553_p13, %p3547_p11 }
  0xd7   : > { %3557 = shalt.err (!%p3554_p0)
}
  0xd8   : > { %3226 = dma.hbm_to_vmem [thread:$0]  (!%p4189_p9), %s4181_s15, 16, %s4185_s22, %s4198_s10  }
  0xd9   : > { %s3848_s28 = smov [#allocation14]   ;;  %s3849_s4 = smov [#allocation17]  }
  0xda   : > { %s572_s13 = sshll.u32 %s3848_s28, 4  ;;  %s597_s30 = sshll.u32 %s3849_s4, 4  ;;  %s573_s13 = int_to_ptr.vmem [resolvable:$true] %s572_s13  ;;  %s598_s30 = int_to_ptr.vmem [resolvable:$true] %s597_s30 }
  0xdb   : > { %s4838_s17 = sld [smem:[#allocation48_spill]] }
  0xe1   : > { %s3558_s21 = scalar_lea.hbm %s4838_s17, 64 }
  0xe2   : > { %p3559_p6 = scmp.ne.s32.totalorder %s4838_s17, %s3558_s21  ;;  %p3565_p7 = scmp.lt.u32.totalorder %s3558_s21, %s4838_s17 }
  0xe4   : > { %p3561_p11 = pnand %p3559_p6, %p4038_p8 }
  0xe6   : > { %p3562_p2 = pneg %p3561_p11 }
  0xe8   : > { %p3567_p3 = pnand %p3565_p7, %p3562_p2 }
  0xea   : > { %3570 = shalt.err (!%p3567_p3)
}
  0xeb   : > { %s3571_s15 = scalar_lea.vmem %s573_s13, 64  ;;  %p3579_p12 = scmp.lt.s32.totalorder %s573_s13, %s573_s13 }
  0xec   : > { %p3572_p5 = scmp.ne.s32.totalorder %s573_s13, %s3571_s15  ;;  %p3580_p13 = scmp.lt.s32.totalorder %s3571_s15, %s3571_s15 }
  0xee   : > { %p3574_p4 = pnand %p3572_p5, %p4038_p8  ;;  %p3581_p0 = por %p3580_p13, %p3579_p12 }
  0xf0   : > { %p3575_p10 = pneg %p3574_p4 }
  0xf2   : > { %p3582_p1 = pnand %p3581_p0, %p3575_p10 }
  0xf4   : > { %3585 = shalt.err (!%p3582_p1)
}
  0xf5   : > { %p4839_p6 = scmp.ne.s32.totalorder %s4819_s23, 0  ;;  %s3586_s4 = scalar_lea.hbm %s4753_s8, 16 }
  0xf6   : > { %p3587_p11 = scmp.ne.s32.totalorder %s4753_s8, %s3586_s4  ;;  %p3593_p1 = scmp.lt.u32.totalorder %s3586_s4, %s4753_s8 }
  0xf7   : > { %3198 = dma.hbm_to_vmem [thread:$0]  (!%p4839_p6), %s4838_s17, 64, %s573_s13, [#allocation12]  }
  0xf8   : > { %p3589_p2 = pnand %p3587_p11, %p4038_p8 }
  0xfa   : > { %p3590_p7 = pneg %p3589_p2 }
  0xfc   : > { %p3595_p3 = pnand %p3593_p1, %p3590_p7 }
  0xfe   : > { %3598 = shalt.err (!%p3595_p3)
}
  0xff   : > { %s3599_s9 = scalar_lea.vmem %s598_s30, 16  ;;  %s3606_s13 = scalar_lea.vmem %s598_s30, 32 }
 0x100   : > { %p3600_p5 = scmp.ne.s32.totalorder %s598_s30, %s3599_s9  ;;  %p3607_p12 = scmp.lt.s32.totalorder %s598_s30, %s598_s30 }
 0x101   : > { %p3608_p13 = scmp.lt.s32.totalorder %s3606_s13, %s3599_s9 }
 0x102   : > { %p3602_p4 = pnand %p3600_p5, %p4038_p8 }
 0x103   : > { %p3609_p0 = por %p3608_p13, %p3607_p12 }
 0x104   : > { %p3603_p10 = pneg %p3602_p4 }
 0x106   : > { %p3610_p9 = pnand %p3609_p0, %p3603_p10 }
 0x108   : > { %3613 = shalt.err (!%p3610_p9)
}
 0x109   : > { %3204 = dma.hbm_to_vmem [thread:$0]  (!%p4839_p6), %s4753_s8, 16, %s598_s30, [#allocation16]  }
 0x10a   : > { %s3850_s28 = smov [#allocation20]   ;;  %s3851_s2 = smov [#allocation23]  }
 0x10b   : > { %s621_s12 = sshll.u32 %s3850_s28, 4  ;;  %s649_s4 = sshll.u32 %s3851_s2, 4  ;;  %s622_s12 = int_to_ptr.vmem [resolvable:$true] %s621_s12  ;;  %s650_s4 = int_to_ptr.vmem [resolvable:$true] %s649_s4 }
 0x10c   : > { %s3614_s21 = scalar_lea.hbm %s4756_s11, 256 }
 0x10d   : > { %p3615_p9 = scmp.ne.s32.totalorder %s4756_s11, %s3614_s21  ;;  %p3621_p7 = scmp.lt.u32.totalorder %s3614_s21, %s4756_s11 }
 0x10f   : > { %p3617_p11 = pnand %p3615_p9, %p4038_p8 }
 0x111   : > { %p3618_p2 = pneg %p3617_p11 }
 0x113   : > { %p3623_p1 = pnand %p3621_p7, %p3618_p2 }
 0x115   : > { %3626 = shalt.err (!%p3623_p1)
}
 0x116   : > { %s3627_s30 = scalar_lea.vmem %s622_s12, 256  ;;  %p3635_p10 = scmp.lt.s32.totalorder %s622_s12, %s622_s12 }
 0x117   : > { %p3628_p3 = scmp.ne.s32.totalorder %s622_s12, %s3627_s30  ;;  %p3636_p12 = scmp.lt.s32.totalorder %s3627_s30, %s3627_s30 }
 0x119   : > { %p3630_p5 = pnand %p3628_p3, %p4038_p8  ;;  %p3637_p13 = por %p3636_p12, %p3635_p10 }
 0x11b   : > { %p3631_p4 = pneg %p3630_p5 }
 0x11d   : > { %p3638_p0 = pnand %p3637_p13, %p3631_p4 }
 0x11f   : > { %3641 = shalt.err (!%p3638_p0)
}
 0x120   : > { %s4840_s22 = smov 4   ;;  %s4841_s28 = smov 64  }
 0x121   : > { %3210 = dma.hbm_to_vmem [thread:$0]  (!%p4839_p6), %s4756_s11, 256, %s622_s12, [#allocation19], %s4841_s28, %s4841_s28, %s4840_s22  }
 0x122   : > { %s3642_s3 = scalar_lea.hbm %s4759_s14, 16 }
 0x123   : > { %p3643_p9 = scmp.ne.s32.totalorder %s4759_s14, %s3642_s3  ;;  %p3649_p7 = scmp.lt.u32.totalorder %s3642_s3, %s4759_s14 }
 0x125   : > { %p3645_p11 = pnand %p3643_p9, %p4038_p8 }
 0x127   : > { %p3646_p2 = pneg %p3645_p11 }
 0x129   : > { %p3651_p1 = pnand %p3649_p7, %p3646_p2 }
 0x12b   : > { %3654 = shalt.err (!%p3651_p1)
}
 0x12c   : > { %s3655_s2 = scalar_lea.vmem %s650_s4, 16  ;;  %s3662_s12 = scalar_lea.vmem %s650_s4, 32 }
 0x12d   : > { %p3656_p3 = scmp.ne.s32.totalorder %s650_s4, %s3655_s2  ;;  %p3663_p10 = scmp.lt.s32.totalorder %s650_s4, %s650_s4 }
 0x12e   : > { %p3664_p12 = scmp.lt.s32.totalorder %s3662_s12, %s3655_s2 }
 0x12f   : > { %p3658_p5 = pnand %p3656_p3, %p4038_p8 }
 0x130   : > { %p3665_p13 = por %p3664_p12, %p3663_p10 }
 0x131   : > { %p3659_p4 = pneg %p3658_p5 }
 0x133   : > { %p3666_p0 = pnand %p3665_p13, %p3659_p4 }
 0x135   : > { %3669 = shalt.err (!%p3666_p0)
}
 0x136   : > { %3216 = dma.hbm_to_vmem [thread:$0]  (!%p4839_p6), %s4759_s14, 16, %s650_s4, [#allocation22]  }
 0x137   : > { %s3852_s1 = smov [#allocation26]   ;;  %s4842_s21 = sand.u32 1, %s3826_s26  }
 0x138   : > { %s673_s20 = sshll.u32 %s3852_s1, 4  ;;  %s730_s3 = scalar_lea.vmem [#allocation13], %s4842_s21  ;;  %s674_s20 = int_to_ptr.vmem [resolvable:$true] %s673_s20 }
 0x139   : > { %s737_s9 = sshll.u32 %s730_s3, 4  ;;  %s3670_s30 = scalar_lea.hbm %s4761_s16, 16  ;;  %s4303_s9 = int_to_ptr.vmem [resolvable:$true] %s737_s9 }
 0x13a   : > { %p3671_p9 = scmp.ne.s32.totalorder %s4761_s16, %s3670_s30  ;;  %p3677_p7 = scmp.lt.u32.totalorder %s3670_s30, %s4761_s16 }
 0x13c   : > { %p3673_p11 = pnand %p3671_p9, %p4038_p8 }
 0x13e   : > { %p3674_p2 = pneg %p3673_p11 }
 0x140   : > { %p3679_p1 = pnand %p3677_p7, %p3674_p2 }
 0x142   : > { %3682 = shalt.err (!%p3679_p1)
}
 0x143   : > { %s3683_s28 = scalar_lea.vmem %s674_s20, 16  ;;  %s3690_s1 = scalar_lea.vmem %s674_s20, 32 }
 0x144   : > { %p3684_p3 = scmp.ne.s32.totalorder %s674_s20, %s3683_s28  ;;  %p3691_p10 = scmp.lt.s32.totalorder %s674_s20, %s674_s20 }
 0x145   : > { %p3692_p12 = scmp.lt.s32.totalorder %s3690_s1, %s3683_s28 }
 0x146   : > { %p3686_p5 = pnand %p3684_p3, %p4038_p8 }
 0x147   : > { %p3693_p13 = por %p3692_p12, %p3691_p10 }
 0x148   : > { %p3687_p4 = pneg %p3686_p5 }
 0x14a   : > { %p3694_p0 = pnand %p3693_p13, %p3687_p4 }
 0x14c   : > { %3697 = shalt.err (!%p3694_p0)
}
 0x14d   : > { %3222 = dma.hbm_to_vmem [thread:$0]  (!%p4839_p6), %s4761_s16, 16, %s674_s20, [#allocation25]  }
 0x14e   : > { %s3698_s5 = scalar_lea.hbm %s4196_s6, 16  ;;  %p4843_p9 = scmp.ne.s32.totalorder %s4835_s24, 0 }
 0x14f   : > { %p3699_p8 = scmp.ne.s32.totalorder %s4196_s6, %s3698_s5  ;;  %s3703_s30 = scalar_lea.hbm %s4837_s19, 32 }
 0x150   : > { %p4844_p11 = pneg %p4843_p9  ;;  %p3704_p1 = scmp.lt.u32.totalorder %s4196_s6, %s4837_s19 }
 0x151   : > { %p3705_p3 = scmp.lt.u32.totalorder %s3703_s30, %s3698_s5  ;;  %p3707_p4 = scmp.lt.u32.totalorder %s3698_s5, %s4196_s6 }
 0x152   : > { %p3701_p2 = pnand %p3699_p8, %p4844_p11 }
 0x153   : > { %p3706_p5 = por %p3705_p3, %p3704_p1 }
 0x154   : > { %p3702_p7 = pneg %p3701_p2 }
 0x155   : > { %p3708_p10 = por %p3707_p4, %p3706_p5 }
 0x157   : > { %p3709_p12 = pnand %p3708_p10, %p3702_p7 }
 0x159   : > { %3712 = shalt.err (!%p3709_p12)
}
 0x15a   : > { %s3713_s20 = scalar_lea.vmem %s4303_s9, 16  ;;  %p4845_p13 = pmov %p4844_p11 }
 0x15b   : > { %p3714_p6 = scmp.ne.s32.totalorder %s4303_s9, %s3713_s20  ;;  %s3853_s12 = smov [#allocation13]  }
 0x15c   : > { %s3718_s4 = sshll.u32 %s3853_s12, 4  ;;  %s3719_s4 = int_to_ptr.vmem [resolvable:$false] %s3718_s4 }
 0x15d   : > { %p3716_p0 = pnand %p3714_p6, %p4845_p13  ;;  %s3720_s22 = scalar_lea.vmem %s3719_s4, 32 }
 0x15e   : > { %p3721_p11 = scmp.lt.s32.totalorder %s4303_s9, %s3719_s4  ;;  %p3722_p2 = scmp.lt.s32.totalorder %s3720_s22, %s3713_s20 }
 0x15f   : > { %p3717_p8 = pneg %p3716_p0 }
 0x160   : > { %p3723_p1 = por %p3722_p2, %p3721_p11 }
 0x162   : > { %p3724_p3 = pnand %p3723_p1, %p3717_p8 }
 0x164   : > { %3727 = shalt.err (!%p3724_p3)
}
 0x165   : > { %3229 = dma.hbm_to_vmem [thread:$0]  (!%p4843_p9), %s4196_s6, 16, %s4303_s9, %s4198_s10  }
 0x166   : > { %p4846_p7 = scmp.ne.s32.totalorder %s4818_s0, 0 }
 0x167   : > { %s748_s28 = sand.u32 (!%p4846_p7), 1, %s4008_s29   ;;  %s4351_s1 = sand.u32 (!%p4846_p7), 1, %s3822_s25  }
 0x168   : > { %746 = sbr.rel (%p4846_p7) target bundleno = 4387 (0x1123), region = 104  ;;  %s749_s21 = scalar_lea.sflag (!%p4846_p7), [#allocation9], %s748_s28 }
 0x169   : > { %s751_s3 = scalar_lea.vmem (!%p4846_p7), [#allocation8], %s4351_s1  ;;  %p4847_p5 = scmp.ne.s32.totalorder (!%p4846_p7), %s4829_s18, 0 }
 0x16f   : > { %3781 = dma.done.wait (%p4847_p5), %s749_s21, 16  }
 0x170   : > { %3783 = vsyncadd (%p4847_p5), %s749_s21, 4294967280  ;;  %p4848_p4 = scmp.eq.s32.totalorder %s4008_s29, 0 }
 0x172   : > { %3785 = dma.done.wait (%p4848_p4), [#allocation12], 128   ;;  %p4849_p9 = pmov %p4848_p4 }
 0x173   : > { %s763_s0 = scalar_lea.vmem [#allocation13], %s4351_s1 }
 0x174   : > { %3787 = vsyncadd (%p4849_p9), [#allocation12], 4294967168 }
 0x175   : > { %3789 = dma.done.wait (%p4847_p5), %s749_s21, 16  }
 0x176   : > { %3791 = vsyncadd (%p4847_p5), %s749_s21, 4294967280  ;;  %p4850_p10 = pmov %p4848_p4 }
 0x177   : > { %p4851_p12 = pmov %p4848_p4 }
 0x178   : > { %3793 = dma.done.wait (%p4850_p10), [#allocation12], 64  }
 0x179   : > { %3795 = vsyncadd (%p4851_p12), [#allocation12], 4294967232  ;;  %p4852_p6 = pmov %p4848_p4 }
 0x17a   : > { %p4853_p13 = pmov %p4848_p4 }
 0x17b   : > { %3797 = dma.done.wait (%p4852_p6), [#allocation16], 80  }
 0x17c   : > { %3799 = vsyncadd (%p4853_p13), [#allocation16], 4294967216  ;;  %p4854_p0 = pmov %p4848_p4 }
 0x17e   : > { %3801 = dma.done.wait (%p4854_p0), [#allocation19], 272   ;;  %p4855_p8 = pmov %p4854_p0 }
 0x17f   : > { %p4856_p11 = pmov %p4854_p0 }
 0x180   : > { %3803 = vsyncadd (%p4855_p8), [#allocation19], 4294967024 }
 0x181   : > { %3805 = dma.done.wait (%p4856_p11), [#allocation22], 32   ;;  %p4857_p2 = pmov %p4854_p0 }
 0x182   : > { %p4858_p1 = pmov %p4854_p0 }
 0x183   : > { %3807 = vsyncadd (%p4857_p2), [#allocation22], 4294967264 }
 0x184   : > { %3809 = dma.done.wait (%p4858_p1), [#allocation25], 272   ;;  %p4859_p3 = pmov %p4854_p0 }
 0x185   : > { %p869_p7 = scmp.lt.s32.totalorder %s3830_s27, 1  ;;  %s4860_s9 = sld [smem:[#allocation43_spill]]  ;;  %vm886_vm0 = vcmask 261120   ;;  %v3855_v14 = vmov 0.0   ;;  %vm3856_vm1 = vmmov 0   ;;  %vm1053_vm2 = vcmask 60416  }
 0x186   : > { %3811 = vsyncadd (%p4859_p3), [#allocation25], 4294967024  ;;  %s4861_s15 = sld [smem:[#allocation50_spill]]  ;;  %s3854_s30 = smov 96   ;;  %2982 = vmatprep.subr.bf16.mxu0 %v3855_v14  ;;  %2990 = vmatprep.subr.bf16.mxu1 %v3855_v14  ;;  %v2854_v16 = vld [vmem:[#allocation17] ss:$0 sm:$0xff] }
 0x187   : > { %s4389_s18 = scalar_select %p869_p7, %s3830_s27, 1  ;;  %2986 = vmatprep.mubr.msk.bf16.mxu0 %vm3856_vm1, %v3855_v14  ;;  %2994 = vmatprep.mubr.msk.bf16.mxu1 %vm3856_vm1, %v3855_v14  ;;  %v2852_v25 = vld [vmem:[#allocation14] ss:$0 sm:$0xff]  ;;  %v2853_v27 = vld [vmem:[#allocation15] ss:$0 sm:$0xff]  ;;  %vm1271_vm3 = vcmask 64512  }
 0x188   : > { %s4862_s6 = sld [smem:[#allocation44_spill]]  ;;  %s4863_s29 = sld [smem:[#allocation54_spill]]  ;;  %v2858_v59 = vld [vmem:[#allocation23] ss:$0 sm:$0xff]  ;;  %vm1499_vm4 = vcmask 1043456   ;;  %vm1694_vm5 = vcmask 130112  }
 0x189   : > { %s2850_s24 = sshll.u32 %s4389_s18, 3  ;;  %s3857_s18 = smov 112   ;;  %vm1700_vm6 = vcmask 195712   ;;  %vm1706_vm7 = vcmask 261312   ;;  %vm2537_vm8 = vcmask 523264  }
 0x18a   : > { %s3859_s2 = smov 104   ;;  %s3860_s20 = smov 80  }
 0x18b   : > { %s872_s5 = scalar_lea.vmem %s4860_s9, %s2850_s24  ;;  %s3861_s12 = smov 72  }
 0x18c   : > { %v4397_v0 = vld [vmem:[%s872_s5] sm:$0xff]  ;;  %v3329_v13 = vld [vmem:[%s4861_s15 + $0x8] sm:$0xff]   ;;  %s4864_s28 = sld [smem:[#allocation51_spill]]  ;;  %s3863_s9 = smov 16  }
 0x18d   : > { %v887_v1 = vsel %vm886_vm0, %v4397_v0, 0.0  ;;  %v3328_v2 = vld [vmem:[%s4861_s15] sm:$0xff]   ;;  %v3331_v35 = vld [vmem:[%s4861_s15 + $0x8] sm:$0xff]   ;;  %s3864_s5 = smov 8   ;;  %s3865_s13 = smov 24  }
 0x18e   : > { %888 = vadd.xlane.f32.xlu0 %v887_v1  ;;  %v3330_v32 = vld [vmem:[%s4861_s15] sm:$0xff]   ;;  %s876_s10 = scalar_lea.vmem %s4862_s6, %s2850_s24  ;;  %v3333_v40 = vld [vmem:[%s4863_s29 + $0x8] sm:$0xff]   ;;  %s3858_s24 = smov 120  }
 0x18f   : > { %v3332_v38 = vld [vmem:[%s4863_s29] sm:$0xff]   ;;  %s4866_s23 = sld [smem:[#allocation56_spill]]  ;;  %p4872_p4 = scmp.ne.s32.totalorder %s4830_s7, 0 }
 0x190   : > { %v984_v39 = vld [vmem:[%s876_s10] sm:$0xff]  ;;  %2991 = vmatpush3.bf16.msra.mxu1 %v3332_v38 }
 0x191   : > { %2992 = vmatprep.subr.bf16.mxu1 %v3855_v14  ;;  %v990_v41 = vpack.c.bf16 %v984_v39, %v984_v39 }
 0x192   : > { %1137 = vadd.xlane.f32.xlu0 %v887_v1  ;;  %s4865_s21 = smov %s4864_s28 }
 0x194   : > { %2993 = vmatpush3.bf16.msra.mxu1 %v3333_v40 }
 0x195   : > { %3006 = vmatprep.subr.bf16.mxu1 %v3855_v14 }
 0x197   : > { %2995 = vmatmul.mubr.msk.bf16.vlgmr.msra.gmra.mrb[0].mxu1 %vm886_vm0, %v990_v41 }
 0x198   : > { %3008 = vmatprep.mubr.msk.bf16.mxu1 %vm3856_vm1, %v3855_v14 }
 0x1a8   : > { %932 = vrot.lane.b32.xlu0 %v3328_v2, %s3854_s30 }
 0x21b   : > { %v889_v3 = vpop.xlane.xlu0 %888 }
 0x21c   : > { %v891_v4 = vmul.f32 0.03125, %v889_v3 }
 0x21e   : > { %v892_v5 = vsub.f32 %v4397_v0, %v891_v4 }
 0x21f   : > { %v1138_v6 = vpop.xlane.xlu0 %1137 }
 0x220   : > { %v1140_v7 = vmul.f32 0.03125, %v1138_v6  ;;  %v893_v8 = vmul.f32 %v892_v5, %v892_v5 }
 0x222   : > { %v1141_v9 = vsub.f32 %v4397_v0, %v1140_v7  ;;  %v894_v10 = vsel %vm886_vm0, %v893_v8, 0.0 }
 0x223   : > { %895 = vadd.xlane.f32.xlu1 %v894_v10  ;;  %v933_v15 = vpop.permute.xlu0 %932 }
 0x224   : > { %v1142_v11 = vmul.f32 %v1141_v9, %v1141_v9  ;;  %2983 = vmatpush3.bf16.msra.mxu0 %v933_v15 }
 0x225   : > { %2984 = vmatprep.subr.bf16.mxu0 %v3855_v14 }
 0x226   : > { %v1143_v12 = vsel %vm886_vm0, %v1142_v11, 0.0 }
 0x227   : > { %1144 = vadd.xlane.f32.xlu1 %v1143_v12 }
 0x238   : > { %934 = vrot.lane.b32.xlu1 %v3329_v13, %s3854_s30 }
 0x23c   : > { %938 = vrot.lane.b32.xlu1 %v2854_v16, %s3854_s30 }
 0x26a   : > { %v1046_v60 = vpop.f32.mrb[0].mxu1 }
 0x26b   : > { %v1047_v61 = vadd.f32 %v2858_v59, %v1046_v60  ;;  %v2996_v62 = vpop.f32.mrb[1].mxu1 }
 0x26c   : > { %v1049_v63 = vpop.f32.mrb[2].mxu1 }
 0x26d   : > { %v4473_v1 = vpack.c.bf16 %v1047_v61, %v1047_v61  ;;  %v2997_v2 = vpop.f32.mrb[3].mxu1 }
 0x26f   : > { %1063 = vst.msk [vmem:[#allocation4] sm:$0xf] %vm1053_vm2, %v4473_v1 }
 0x2b0   : > { %v896_v17 = vpop.xlane.xlu1 %895 }
 0x2b1   : > { %v897_v18 = vmul.f32 0.03125, %v896_v17 }
 0x2b3   : > { %v898_v19 = vadd.f32 1e-05, %v897_v18 }
 0x2b4   : > { %v1145_v20 = vpop.xlane.xlu1 %1144 }
 0x2b5   : > { %3346 = vrsqrt.f32 %v898_v19  ;;  %v1146_v21 = vmul.f32 0.03125, %v1145_v20 }
 0x2b7   : > { %v1147_v22 = vadd.f32 1e-05, %v1146_v21 }
 0x2b8   : > { %v935_v23 = vpop.permute.xlu1 %934 }
 0x2b9   : > { %3348 = vrsqrt.f32 %v1147_v22  ;;  %2985 = vmatpush3.bf16.msra.mxu0 %v935_v23  ;;  %v2870_v22 = vld [vmem:[%s751_s3] ss:$0 sm:$0xff]  ;;  %s3862_s3 = smov 88  }
 0x2ba   : > { %2998 = vmatprep.subr.bf16.mxu0 %v3855_v14  ;;  %v1229_v23 = vld [vmem:[#allocation11] sm:$0xff] }
 0x2bc   : > { %v939_v42 = vpop.permute.xlu1 %938 }
 0x2bf   : > { %v3347_v24 = vpop.eup %3346 }
 0x2c0   : > { %v900_v26 = vmul.f32 %v3347_v24, %v892_v5  ;;  %v1236_v24 = vadd.f32 %v2870_v22, %v1229_v23 }
 0x2c2   : > { %v905_v28 = vmul.f32 %v2852_v25, %v900_v26 }
 0x2c3   : > { %v3349_v29 = vpop.eup %3348 }
 0x2c4   : > { %v1149_v30 = vmul.f32 %v3349_v29, %v1141_v9  ;;  %v910_v31 = vadd.f32 %v2853_v27, %v905_v28 }
 0x2c6   : > { %v916_v33 = vpack.c.bf16 %v910_v31, %v910_v31  ;;  %v1154_v34 = vmul.f32 %v2852_v25, %v1149_v30 }
 0x2c8   : > { %2987 = vmatmul.mubr.msk.bf16.vlgmr.msra.gmra.mrb[0].mxu0 %vm886_vm0, %v916_v33  ;;  %v1159_v36 = vadd.f32 %v2853_v27, %v1154_v34 }
 0x2c9   : > { %2999 = vmatpush3.bf16.msra.mxu0 %v3330_v32  ;;  %3002 = vmatprep.mubr.msk.bf16.mxu0 %vm3856_vm1, %v3855_v14 }
 0x2ca   : > { %3000 = vmatprep.subr.bf16.mxu0 %v3855_v14  ;;  %v1165_v37 = vpack.c.bf16 %v1159_v36, %v1159_v36 }
 0x2cd   : > { %3001 = vmatpush3.bf16.msra.mxu0 %v3331_v35 }
 0x2ce   : > { %3012 = vmatprep.subr.bf16.mxu0 %v3855_v14 }
 0x2d0   : > { %3003 = vmatmul.mubr.msk.bf16.vlgmr.msra.gmra.mrb[4].mxu0 %vm886_vm0, %v1165_v37 }
 0x2d1   : > { %3014 = vmatprep.mubr.msk.bf16.mxu0 %vm3856_vm1, %v3855_v14 }
 0x39b   : > { %v978_v43 = vpop.f32.mrb[0].mxu0 }
 0x39c   : > { %v979_v44 = vadd.f32 %v978_v43, %v939_v42  ;;  %v2988_v45 = vpop.f32.mrb[1].mxu0 }
 0x39d   : > { %v981_v46 = vpop.f32.mrb[2].mxu0 }
 0x39e   : > { %v4452_v47 = vpack.c.bf16 %v979_v44, %v979_v44  ;;  %v2989_v48 = vpop.f32.mrb[3].mxu0 }
 0x3a0   : > { %1054 = vst.msk [vmem:[#allocation2] sm:$0xf] %vm1053_vm2, %v4452_v47  ;;  %1091 = vrot.lane.b32.xlu0 %v4452_v47, %s3857_s18  ;;  %1071 = vrot.lane.b32.xlu1 %v4452_v47, %s3858_s24 }
 0x3a3   : > { %v1221_v49 = vpop.f32.mrb[4].mxu0 }
 0x3a4   : > { %v1222_v50 = vadd.f32 %v2854_v16, %v1221_v49  ;;  %1111 = vrot.lane.b32.xlu1 %v4452_v47, %s3859_s2  ;;  %v3004_v51 = vpop.f32.mrb[5].mxu0 }
 0x3a5   : > { %v1224_v52 = vpop.f32.mrb[6].mxu0 }
 0x3a6   : > { %v1245_v53 = vmul.f32 0.35355338, %v1222_v50  ;;  %v3005_v54 = vpop.f32.mrb[7].mxu0 }
 0x3a7   : > { %v1237_v55 = vld [vmem:[#allocation2] sm:$0xf] }
 0x3a8   : > { %v1246_v56 = vpack.c.bf16 %v1245_v53, %v1245_v53  ;;  %v1276_v57 = vsel %vm1271_vm3, %v1237_v55, 0 }
 0x3a9   : > { %3007 = vmatpush3.bf16.xpose.msra.mxu1 %v1276_v57 }
 0x3aa   : > { %1248 = vst.msk [vmem:[#allocation6] sm:$0xf] %vm1053_vm2, %v1246_v56  ;;  %1257 = vrot.lane.b32.xlu1 %v1246_v56, %s3857_s18  ;;  %1252 = vrot.lane.b32.xlu0 %v1246_v56, %s3858_s24 }
 0x3ab   : > { %3018 = vmatprep.subr.bf16.mxu1 %v3855_v14 }
 0x3ae   : > { %1058 = vrot.lane.b32.xlu1 %v4452_v47, %s3854_s30  ;;  %1262 = vrot.lane.b32.xlu0 %v1246_v56, %s3859_s2 }
 0x3b1   : > { %v1267_v58 = vld [vmem:[#allocation6] sm:$0xf] }
 0x3b2   : > { %3009 = vmatmul.mubr.msk.bf16.vlgmr.msra.gmra.mrb[4].mxu1 %vm1271_vm3, %v1267_v58 }
 0x3b3   : > { %3020 = vmatprep.mubr.msk.bf16.mxu1 %vm3856_vm1, %v3855_v14 }
 0x412   : > { %v1092_v3 = vpop.permute.xlu0 %1091  ;;  %v1072_v4 = vpop.permute.xlu1 %1071 }
 0x413   : > { %1095 = vst.msk [vmem:[#allocation2 + $0x8] sm:$0xf] %vm1053_vm2, %v1092_v3  ;;  %1075 = vst.msk [vmem:[#allocation2 + $0x4] sm:$0xf] %vm1053_vm2, %v1072_v4 }
 0x416   : > { %v1112_v5 = vpop.permute.xlu1 %1111 }
 0x417   : > { %1115 = vst.msk [vmem:[#allocation2 + $0xc] sm:$0xf] %vm1053_vm2, %v1112_v5 }
 0x41a   : > { %v1238_v6 = vld [vmem:[#allocation2 + $0x4] sm:$0xf]  ;;  %v1239_v7 = vld [vmem:[#allocation2 + $0x8] sm:$0xf] }
 0x41b   : > { %v1322_v8 = vsel %vm1271_vm3, %v1238_v6, 0  ;;  %v1368_v9 = vsel %vm1271_vm3, %v1239_v7, 0 }
 0x41c   : > { %3013 = vmatpush3.bf16.xpose.msra.mxu0 %v1322_v8  ;;  %v1258_v10 = vpop.permute.xlu1 %1257  ;;  %v1253_v11 = vpop.permute.xlu0 %1252  ;;  %3019 = vmatpush3.bf16.xpose.msra.mxu1 %v1368_v9 }
 0x41d   : > { %1261 = vst.msk [vmem:[#allocation6 + $0x8] sm:$0xf] %vm1053_vm2, %v1258_v10  ;;  %1256 = vst.msk [vmem:[#allocation6 + $0x4] sm:$0xf] %vm1053_vm2, %v1253_v11  ;;  %3024 = vmatprep.subr.bf16.mxu0 %v3855_v14  ;;  %3030 = vmatprep.subr.bf16.mxu1 %v3855_v14 }
 0x41e   : > { %v1240_v15 = vld [vmem:[#allocation2 + $0xc] sm:$0xf] }
 0x41f   : > { %v1414_v18 = vsel %vm1271_vm3, %v1240_v15, 0 }
 0x420   : > { %v1059_v12 = vpop.permute.xlu1 %1058  ;;  %v1263_v13 = vpop.permute.xlu0 %1262 }
 0x421   : > { %1061 = vst.msk [vmem:[#allocation3] sm:$0xf] %vm1053_vm2, %v1059_v12  ;;  %1266 = vst.msk [vmem:[#allocation6 + $0xc] sm:$0xf] %vm1053_vm2, %v1263_v13 }
 0x424   : > { %v1268_v16 = vld [vmem:[#allocation6 + $0x4] sm:$0xf]  ;;  %v1269_v17 = vld [vmem:[#allocation6 + $0x8] sm:$0xf] }
 0x425   : > { %3015 = vmatmul.mubr.msk.bf16.vlgmr.msra.gmra.mrb[8].mxu0 %vm1271_vm3, %v1268_v16  ;;  %3021 = vmatmul.mubr.msk.bf16.vlgmr.msra.gmra.mrb[8].mxu1 %vm1271_vm3, %v1269_v17 }
 0x426   : > { %3025 = vmatpush3.bf16.xpose.msra.mxu0 %v1414_v18  ;;  %3026 = vmatprep.mubr.msk.bf16.mxu0 %vm3856_vm1, %v3855_v14 }
 0x427   : > { %3032 = vmatprep.mubr.msk.bf16.mxu1 %vm3856_vm1, %v3855_v14  ;;  %3036 = vmatprep.subr.bf16.mxu0 %v3855_v14 }
 0x428   : > { %v1241_v19 = vld [vmem:[#allocation3] sm:$0xf]  ;;  %v1270_v21 = vld [vmem:[#allocation6 + $0xc] sm:$0xf] }
 0x429   : > { %v1501_v20 = vsel %vm1499_vm4, %v1241_v19, 0 }
 0x42a   : > { %3031 = vmatpush3.bf16.msra.mxu1 %v1501_v20 }
 0x42b   : > { %3042 = vmatprep.subr.bf16.mxu1 %v3855_v14 }
 0x42d   : > { %3027 = vmatmul.mubr.msk.bf16.vlgmr.msra.gmra.mrb[12].mxu0 %vm1271_vm3, %v1270_v21 }
 0x42e   : > { %3038 = vmatprep.mubr.msk.bf16.mxu0 %vm3856_vm1, %v3855_v14 }
 0x485   : > { %v1312_v25 = vpop.f32.mrb[4].mxu1 }
 0x486   : > { %v1313_v26 = vadd.f32 %v1312_v25, %v1236_v24  ;;  %v3010_v27 = vpop.f32.mrb[5].mxu1 }
 0x487   : > { %v1315_v28 = vpop.f32.mrb[6].mxu1 }
 0x488   : > { %v3011_v29 = vpop.f32.mrb[7].mxu1  ;;  %v1456_v30 = vsel %vm1271_vm3, %v1313_v26, -inf }
 0x489   : > { %1457 = vmax.xlane.f32.xlu1 %v1456_v30 }
 0x49a   : > { %1096 = vrot.lane.b32.xlu1 %v4452_v47, %s3860_s20 }
 0x49e   : > { %1116 = vrot.lane.b32.xlu1 %v4452_v47, %s3861_s12 }
 0x4f8   : > { %v1358_v31 = vpop.f32.mrb[8].mxu0  ;;  %v1404_v32 = vpop.f32.mrb[8].mxu1 }
 0x4f9   : > { %v1359_v33 = vadd.f32 %v1358_v31, %v1236_v24  ;;  %v3016_v34 = vpop.f32.mrb[9].mxu0  ;;  %v3022_v35 = vpop.f32.mrb[9].mxu1  ;;  %v1405_v38 = vadd.f32 %v1404_v32, %v1236_v24  ;;  %v3334_v31 = vld [vmem:[%s4864_s28] sm:$0xff]   ;;  %s4870_s28 = sld [smem:[#allocation60_spill]] }
 0x4fa   : > { %v1361_v36 = vpop.f32.mrb[10].mxu0  ;;  %v1407_v37 = vpop.f32.mrb[10].mxu1 }
 0x4fb   : > { %v3017_v39 = vpop.f32.mrb[11].mxu0  ;;  %v3023_v40 = vpop.f32.mrb[11].mxu1  ;;  %v1459_v41 = vsel %vm1271_vm3, %v1359_v33, -inf  ;;  %v1462_v42 = vsel %vm1271_vm3, %v1405_v38, -inf  ;;  %v3335_v36 = vld [vmem:[%s4865_s21 + $0x8] sm:$0xff]  }
 0x4fc   : > { %1460 = vmax.xlane.f32.xlu0 %v1459_v41 }
 0x4ff   : > { %s4871_s6 = smov %s4870_s28 }
 0x500   : > { %1463 = vmax.xlane.f32.xlu0 %v1462_v42  ;;  %v1450_v43 = vpop.f32.mrb[12].mxu0 }
 0x501   : > { %v1451_v44 = vadd.f32 %v1450_v43, %v1236_v24  ;;  %v3028_v45 = vpop.f32.mrb[13].mxu0 }
 0x502   : > { %v1453_v46 = vpop.f32.mrb[14].mxu0 }
 0x503   : > { %v3029_v48 = vpop.f32.mrb[15].mxu0  ;;  %v1465_v49 = vsel %vm1271_vm3, %v1451_v44, -inf }
 0x504   : > { %1466 = vmax.xlane.f32.xlu0 %v1465_v49 }
 0x516   : > { %v1458_v50 = vpop.xlane.xlu1 %1457 }
 0x517   : > { %v1468_v51 = vsub.f32 %v1313_v26, %v1458_v50 }
 0x519   : > { %v1472_v52 = vmul.f32 1.442695, %v1468_v51 }
 0x51a   : > { %v1097_v53 = vpop.permute.xlu1 %1096  ;;  %1076 = vrot.lane.b32.xlu0 %v4452_v47, %s3862_s3 }
 0x51b   : > { %3350 = vpow2.f32 %v1472_v52  ;;  %1100 = vst.msk [vmem:[#allocation3 + $0x8] sm:$0xf] %vm1053_vm2, %v1097_v53 }
 0x51e   : > { %v1117_v54 = vpop.permute.xlu1 %1116 }
 0x51f   : > { %1120 = vst.msk [vmem:[#allocation3 + $0xc] sm:$0xf] %vm1053_vm2, %v1117_v54 }
 0x522   : > { %v1243_v56 = vld [vmem:[#allocation3 + $0x8] sm:$0xf] }
 0x523   : > { %v1593_v58 = vsel %vm1499_vm4, %v1243_v56, 0  ;;  %v1870_v56 = vld [vmem:[#allocation4] sm:$0xf] }
 0x525   : > { %v3351_v55 = vpop.eup %3350 }
 0x526   : > { %v1492_v57 = vpack.c.bf16 %v3351_v55, %v3351_v55  ;;  %v1244_v13 = vld [vmem:[#allocation3 + $0xc] sm:$0xf]  ;;  %v1480_v19 = vsel %vm1271_vm3, %v3351_v55, 0.0 }
 0x527   : > { %v1639_v18 = vsel %vm1499_vm4, %v1244_v13, 0 }
 0x528   : > { %3033 = vmatmul.mubr.msk.bf16.vlgmr.msra.gmra.mrb[12].mxu1 %vm1271_vm3, %v1492_v57 }
 0x529   : > { %3043 = vmatpush3.bf16.msra.mxu1 %v1593_v58  ;;  %3044 = vmatprep.mubr.msk.bf16.mxu1 %vm3856_vm1, %v3855_v14  ;;  %v1910_v58 = vsel %vm1271_vm3, %v1870_v56, 0 }
 0x52a   : > { %3054 = vmatprep.subr.bf16.mxu1 %v3855_v14 }
 0x589   : > { %v1461_v47 = vpop.xlane.xlu0 %1460 }
 0x58a   : > { %v1469_v59 = vsub.f32 %v1359_v33, %v1461_v47  ;;  %v2880_v47 = vld [vmem:[#allocation18] ss:$0 sm:$0xff] }
 0x58c   : > { %v1474_v60 = vmul.f32 1.442695, %v1469_v59 }
 0x58d   : > { %v1464_v61 = vpop.xlane.xlu0 %1463 }
 0x58e   : > { %3352 = vpow2.f32 %v1474_v60  ;;  %v1470_v62 = vsub.f32 %v1405_v38, %v1464_v61 }
 0x590   : > { %v1476_v63 = vmul.f32 1.442695, %v1470_v62 }
 0x591   : > { %v1467_v2 = vpop.xlane.xlu0 %1466 }
 0x592   : > { %3354 = vpow2.f32 %v1476_v63  ;;  %v1471_v3 = vsub.f32 %v1451_v44, %v1467_v2 }
 0x594   : > { %v1478_v4 = vmul.f32 1.442695, %v1471_v3 }
 0x595   : > { %v1077_v5 = vpop.permute.xlu0 %1076 }
 0x596   : > { %3356 = vpow2.f32 %v1478_v4  ;;  %1080 = vst.msk [vmem:[#allocation3 + $0x4] sm:$0xf] %vm1053_vm2, %v1077_v5 }
 0x598   : > { %v3353_v6 = vpop.eup %3352 }
 0x599   : > { %v1483_v7 = vsel %vm1271_vm3, %v3353_v6, 0.0  ;;  %v1493_v16 = vpack.c.bf16 %v3353_v6, %v3353_v6 }
 0x59a   : > { %1484 = vadd.xlane.f32.xlu1 %v1483_v7 }
 0x59c   : > { %v3355_v8 = vpop.eup %3354 }
 0x59d   : > { %v1486_v9 = vsel %vm1271_vm3, %v3355_v8, 0.0  ;;  %v1242_v10 = vld [vmem:[#allocation3 + $0x4] sm:$0xf]  ;;  %v1494_v11 = vpack.c.bf16 %v3355_v8, %v3355_v8 }
 0x59e   : > { %1487 = vadd.xlane.f32.xlu0 %v1486_v9  ;;  %v1547_v12 = vsel %vm1499_vm4, %v1242_v10, 0  ;;  %v3336_v10 = vld [vmem:[#allocation20] sm:$0xff]  }
 0x59f   : > { %3037 = vmatpush3.bf16.msra.mxu0 %v1547_v12  ;;  %3045 = vmatmul.mubr.msk.bf16.vlgmr.msra.gmra.mrb[16].mxu1 %vm1271_vm3, %v1494_v11  ;;  %v3337_v11 = vld [vmem:[#allocation20 + $0x8] sm:$0xff]  }
 0x5a0   : > { %v3357_v15 = vpop.eup %3356  ;;  %3048 = vmatprep.subr.bf16.mxu0 %v3855_v14  ;;  %3058 = vmatprep.mubr.msk.bf16.mxu1 %vm3856_vm1, %v3855_v14 }
 0x5a1   : > { %v1489_v17 = vsel %vm1271_vm3, %v3357_v15, 0.0  ;;  %v1495_v20 = vpack.c.bf16 %v3357_v15, %v3357_v15  ;;  %3055 = vmatpush3.bf16.msra.mxu1 %v3334_v31 }
 0x5a2   : > { %1490 = vadd.xlane.f32.xlu0 %v1489_v17  ;;  %3039 = vmatmul.mubr.msk.bf16.vlgmr.msra.gmra.mrb[16].mxu0 %vm1271_vm3, %v1493_v16 }
 0x5a3   : > { %3049 = vmatpush3.bf16.msra.mxu0 %v1639_v18  ;;  %3050 = vmatprep.mubr.msk.bf16.mxu0 %vm3856_vm1, %v3855_v14  ;;  %v2884_v18 = vld [vmem:[#allocation14 + $0x1] ss:$0 sm:$0xff] }
 0x5a4   : > { %3062 = vmatprep.subr.bf16.mxu0 %v3855_v14  ;;  %3056 = vmatprep.subr.bf16.mxu1 %v3855_v14 }
 0x5a5   : > { %3057 = vmatpush3.bf16.msra.mxu1 %v3335_v36 }
 0x5a6   : > { %1481 = vadd.xlane.f32.xlu0 %v1480_v19  ;;  %3070 = vmatprep.subr.bf16.mxu1 %v3855_v14 }
 0x5aa   : > { %3051 = vmatmul.mubr.msk.bf16.vlgmr.msra.gmra.mrb[20].mxu0 %vm1271_vm3, %v1495_v20  ;;  %v2885_v20 = vld [vmem:[#allocation15 + $0x1] ss:$0 sm:$0xff] }
 0x5ab   : > { %3066 = vmatprep.mubr.msk.bf16.mxu0 %vm3856_vm1, %v3855_v14  ;;  %3063 = vmatpush3.bf16.msra.mxu0 %v3336_v10 }
 0x5ac   : > { %3064 = vmatprep.subr.bf16.mxu0 %v3855_v14 }
 0x5af   : > { %3065 = vmatpush3.bf16.msra.mxu0 %v3337_v11 }
 0x5b0   : > { %3076 = vmatprep.subr.bf16.mxu0 %v3855_v14 }
 0x5fb   : > { %v1537_v21 = vpop.f32.mrb[12].mxu1 }
 0x5fc   : > { %v3034_v22 = vpop.f32.mrb[13].mxu1 }
 0x5fd   : > { %v1540_v23 = vpop.f32.mrb[14].mxu1 }
 0x5fe   : > { %v3035_v24 = vpop.f32.mrb[15].mxu1 }
 0x627   : > { %v1485_v30 = vpop.xlane.xlu1 %1484 }
 0x62b   : > { %v1488_v25 = vpop.xlane.xlu0 %1487 }
 0x62f   : > { %v1491_v26 = vpop.xlane.xlu0 %1490 }
 0x633   : > { %v1482_v27 = vpop.xlane.xlu0 %1481 }
 0x634   : > { %3358 = vrcp.f32 %v1482_v27 }
 0x635   : > { %3360 = vrcp.f32 %v1488_v25 }
 0x636   : > { %3362 = vrcp.f32 %v1485_v30 }
 0x637   : > { %3364 = vrcp.f32 %v1491_v26  ;;  %v2886_v26 = vld [vmem:[#allocation21] ss:$0 sm:$0xff] }
 0x63e   : > { %v3359_v28 = vpop.eup %3358 }
 0x63f   : > { %v1685_v29 = vmul.f32 %v3359_v28, %v1537_v21  ;;  %v3361_v32 = vpop.eup %3360 }
 0x640   : > { %v3363_v38 = vpop.eup %3362 }
 0x641   : > { %1689 = vst.msk [vmem:[#allocation7] sm:$0xff] %vm1271_vm3, %v1685_v29  ;;  %v3365_v45 = vpop.eup %3364 }
 0x672   : > { %v1629_v33 = vpop.f32.mrb[16].mxu1 }
 0x673   : > { %v1687_v34 = vmul.f32 %v3361_v32, %v1629_v33  ;;  %v3046_v35 = vpop.f32.mrb[17].mxu1 }
 0x674   : > { %v1632_v37 = vpop.f32.mrb[18].mxu1 }
 0x675   : > { %v3047_v39 = vpop.f32.mrb[19].mxu1  ;;  %1697 = vrot.lane.b32.xlu0 %v1687_v34, %s3863_s9  ;;  %v1583_v40 = vpop.f32.mrb[16].mxu0 }
 0x676   : > { %v1686_v41 = vmul.f32 %v3363_v38, %v1583_v40  ;;  %v3040_v42 = vpop.f32.mrb[17].mxu0 }
 0x677   : > { %v1586_v43 = vpop.f32.mrb[18].mxu0 }
 0x678   : > { %1691 = vrot.lane.b32.xlu1 %v1686_v41, %s3864_s5  ;;  %v3041_v44 = vpop.f32.mrb[19].mxu0 }
 0x67d   : > { %v1675_v46 = vpop.f32.mrb[20].mxu0 }
 0x67e   : > { %v1688_v48 = vmul.f32 %v3365_v45, %v1675_v46  ;;  %v3052_v49 = vpop.f32.mrb[21].mxu0  ;;  %v2891_v45 = vld [vmem:[%s763_s0] ss:$0 sm:$0xff]  ;;  %s2849_s0 = sshll.u32 %s4351_s1, 3 }
 0x67f   : > { %v1678_v50 = vpop.f32.mrb[22].mxu0 }
 0x680   : > { %1703 = vrot.lane.b32.xlu1 %v1688_v48, %s3865_s13  ;;  %v3053_v51 = vpop.f32.mrb[23].mxu0 }
 0x6e7   : > { %v1698_v53 = vpop.permute.xlu0 %1697 }
 0x6ea   : > { %v1692_v52 = vpop.permute.xlu1 %1691 }
 0x6eb   : > { %1695 = vst.msk [vmem:[#allocation7] sm:$0xff] %vm1694_vm5, %v1692_v52 }
 0x6ec   : > { %1701 = vst.msk [vmem:[#allocation7] sm:$0xff] %vm1700_vm6, %v1698_v53 }
 0x6f2   : > { %v1704_v54 = vpop.permute.xlu1 %1703 }
 0x6f3   : > { %1707 = vst.msk [vmem:[#allocation7] sm:$0xff] %vm1706_vm7, %v1704_v54 }
 0x6fa   : > { %v1708_v55 = vld [vmem:[#allocation7] sm:$0xff] }
 0x6fb   : > { %v1714_v57 = vpack.c.bf16 %v1708_v55, %v1708_v55 }
 0x6fd   : > { %3059 = vmatmul.mubr.msk.bf16.vlgmr.msra.gmra.mrb[20].mxu1 %vm886_vm0, %v1714_v57 }
 0x6fe   : > { %3071 = vmatpush3.bf16.xpose.msra.mxu1 %v1910_v58  ;;  %3072 = vmatprep.mubr.msk.bf16.mxu1 %vm3856_vm1, %v3855_v14 }
 0x6ff   : > { %3082 = vmatprep.subr.bf16.mxu1 %v3855_v14 }
 0x7d0   : > { %v1770_v59 = vpop.f32.mrb[20].mxu1 }
 0x7d1   : > { %v1771_v60 = vadd.f32 %v2880_v47, %v1770_v59  ;;  %v3060_v61 = vpop.f32.mrb[21].mxu1 }
 0x7d2   : > { %v1773_v62 = vpop.f32.mrb[22].mxu1 }
 0x7d3   : > { %v4559_v63 = vadd.f32 %v1771_v60, %v4397_v0  ;;  %v3061_v2 = vpop.f32.mrb[23].mxu1 }
 0x7d5   : > { %v1779_v3 = vsel %vm886_vm0, %v4559_v63, 0.0 }
 0x7d6   : > { %1780 = vadd.xlane.f32.xlu1 %v1779_v3 }
 0x7e7   : > { %1101 = vrot.lane.b32.xlu1 %v4473_v1, %s3857_s18 }
 0x7eb   : > { %1121 = vrot.lane.b32.xlu1 %v4473_v1, %s3859_s2 }
 0x863   : > { %v1781_v4 = vpop.xlane.xlu1 %1780 }
 0x864   : > { %v1782_v5 = vmul.f32 0.03125, %v1781_v4 }
 0x866   : > { %v1783_v6 = vsub.f32 %v4559_v63, %v1782_v5 }
 0x867   : > { %v1102_v7 = vpop.permute.xlu1 %1101 }
 0x868   : > { %1105 = vst.msk [vmem:[#allocation4 + $0x8] sm:$0xf] %vm1053_vm2, %v1102_v7  ;;  %v1784_v0 = vmul.f32 %v1783_v6, %v1783_v6 }
 0x86a   : > { %v1785_v8 = vsel %vm886_vm0, %v1784_v0, 0.0 }
 0x86b   : > { %1786 = vadd.xlane.f32.xlu0 %v1785_v8  ;;  %v1122_v9 = vpop.permute.xlu1 %1121 }
 0x86c   : > { %1125 = vst.msk [vmem:[#allocation4 + $0xc] sm:$0xf] %vm1053_vm2, %v1122_v9 }
 0x86f   : > { %v1872_v34 = vld [vmem:[#allocation4 + $0x8] sm:$0xf] }
 0x870   : > { %v2002_v36 = vsel %vm1271_vm3, %v1872_v34, 0 }
 0x873   : > { %v1873_v40 = vld [vmem:[#allocation4 + $0xc] sm:$0xf] }
 0x874   : > { %v2048_v43 = vsel %vm1271_vm3, %v1873_v40, 0 }
 0x881   : > { %1081 = vrot.lane.b32.xlu0 %v4473_v1, %s3858_s24 }
 0x8f8   : > { %v1787_v12 = vpop.xlane.xlu0 %1786 }
 0x8f9   : > { %v1788_v13 = vmul.f32 0.03125, %v1787_v12 }
 0x8fb   : > { %v1789_v15 = vadd.f32 1e-05, %v1788_v13 }
 0x8fc   : > { %v1082_v16 = vpop.permute.xlu0 %1081 }
 0x8fd   : > { %3366 = vrsqrt.f32 %v1789_v15  ;;  %1085 = vst.msk [vmem:[#allocation4 + $0x4] sm:$0xf] %vm1053_vm2, %v1082_v16 }
 0x904   : > { %v1871_v23 = vld [vmem:[#allocation4 + $0x4] sm:$0xf] }
 0x905   : > { %v1956_v25 = vsel %vm1271_vm3, %v1871_v23, 0 }
 0x907   : > { %v3367_v17 = vpop.eup %3366 }
 0x908   : > { %v1791_v19 = vmul.f32 %v3367_v17, %v1783_v6 }
 0x90a   : > { %v1796_v21 = vmul.f32 %v2884_v18, %v1791_v19 }
 0x90c   : > { %v1801_v22 = vadd.f32 %v2885_v20, %v1796_v21 }
 0x90e   : > { %v1807_v24 = vpack.c.bf16 %v1801_v22, %v1801_v22 }
 0x910   : > { %3067 = vmatmul.mubr.msk.bf16.vlgmr.msra.gmra.mrb[24].mxu0 %vm886_vm0, %v1807_v24 }
 0x911   : > { %3077 = vmatpush3.bf16.xpose.msra.mxu0 %v1956_v25  ;;  %3078 = vmatprep.mubr.msk.bf16.mxu0 %vm3856_vm1, %v3855_v14 }
 0x912   : > { %3088 = vmatprep.subr.bf16.mxu0 %v3855_v14 }
 0x9e3   : > { %v1863_v27 = vpop.f32.mrb[24].mxu0 }
 0x9e4   : > { %v1864_v28 = vadd.f32 %v2886_v26, %v1863_v27  ;;  %v3068_v29 = vpop.f32.mrb[25].mxu0 }
 0x9e5   : > { %v1866_v30 = vpop.f32.mrb[26].mxu0 }
 0x9e6   : > { %v1878_v31 = vmul.f32 0.35355338, %v1864_v28  ;;  %v3069_v32 = vpop.f32.mrb[27].mxu0 }
 0x9e8   : > { %v1879_v33 = vpack.c.bf16 %v1878_v31, %v1878_v31 }
 0x9ea   : > { %1880 = vst.msk [vmem:[#allocation6] sm:$0xf] %vm1053_vm2, %v1879_v33  ;;  %1888 = vrot.lane.b32.xlu0 %v1879_v33, %s3857_s18  ;;  %1884 = vrot.lane.b32.xlu1 %v1879_v33, %s3858_s24  ;;  %s4869_s24 = sld [smem:[#allocation59_spill]] }
 0x9ee   : > { %1892 = vrot.lane.b32.xlu1 %v1879_v33, %s3859_s2  ;;  %s2917_s2 = sshll.u32 %s3830_s27, 7  ;;  %s2592_s27 = scalar_lea.sflag [#allocation10], %s4351_s1 }
 0x9ef   : > { %s4695_s10 = scalar_lea.hbm %s4870_s28, %s2917_s2 }
 0x9f1   : > { %v1896_v35 = vld [vmem:[#allocation6] sm:$0xf] }
 0x9f2   : > { %3073 = vmatmul.mubr.msk.bf16.vlgmr.msra.gmra.mrb[24].mxu1 %vm1271_vm3, %v1896_v35 }
 0x9f3   : > { %3083 = vmatpush3.bf16.xpose.msra.mxu1 %v2002_v36  ;;  %3084 = vmatprep.mubr.msk.bf16.mxu1 %vm3856_vm1, %v3855_v14 }
 0x9f4   : > { %3094 = vmatprep.subr.bf16.mxu1 %v3855_v14 }
 0xa5c   : > { %v1889_v37 = vpop.permute.xlu0 %1888  ;;  %v1885_v38 = vpop.permute.xlu1 %1884 }
 0xa5d   : > { %1891 = vst.msk [vmem:[#allocation6 + $0x8] sm:$0xf] %vm1053_vm2, %v1889_v37  ;;  %1887 = vst.msk [vmem:[#allocation6 + $0x4] sm:$0xf] %vm1053_vm2, %v1885_v38 }
 0xa60   : > { %v1893_v39 = vpop.permute.xlu1 %1892 }
 0xa61   : > { %1895 = vst.msk [vmem:[#allocation6 + $0xc] sm:$0xf] %vm1053_vm2, %v1893_v39 }
 0xa64   : > { %v1897_v41 = vld [vmem:[#allocation6 + $0x4] sm:$0xf]  ;;  %v1898_v42 = vld [vmem:[#allocation6 + $0x8] sm:$0xf] }
 0xa65   : > { %3079 = vmatmul.mubr.msk.bf16.vlgmr.msra.gmra.mrb[28].mxu0 %vm1271_vm3, %v1897_v41  ;;  %3085 = vmatmul.mubr.msk.bf16.vlgmr.msra.gmra.mrb[28].mxu1 %vm1271_vm3, %v1898_v42 }
 0xa66   : > { %3089 = vmatpush3.bf16.xpose.msra.mxu0 %v2048_v43  ;;  %3090 = vmatprep.mubr.msk.bf16.mxu0 %vm3856_vm1, %v3855_v14 }
 0xa67   : > { %3100 = vmatprep.subr.bf16.mxu0 %v3855_v14  ;;  %3096 = vmatprep.mubr.msk.bf16.mxu1 %vm3856_vm1, %v3855_v14 }
 0xa68   : > { %v1899_v44 = vld [vmem:[#allocation6 + $0xc] sm:$0xf] }
 0xa6d   : > { %3091 = vmatmul.mubr.msk.bf16.vlgmr.msra.gmra.mrb[32].mxu0 %vm1271_vm3, %v1899_v44 }
 0xa6e   : > { %3102 = vmatprep.mubr.msk.bf16.mxu0 %vm3856_vm1, %v3855_v14 }
 0xac5   : > { %v1946_v46 = vpop.f32.mrb[24].mxu1 }
 0xac6   : > { %v1947_v48 = vadd.f32 %v2891_v45, %v1946_v46  ;;  %v3074_v49 = vpop.f32.mrb[25].mxu1 }
 0xac7   : > { %v1949_v50 = vpop.f32.mrb[26].mxu1 }
 0xac8   : > { %v3075_v51 = vpop.f32.mrb[27].mxu1  ;;  %v2090_v52 = vsel %vm1271_vm3, %v1947_v48, -inf }
 0xac9   : > { %2091 = vmax.xlane.f32.xlu0 %v2090_v52 }
 0xb38   : > { %v1992_v53 = vpop.f32.mrb[28].mxu0  ;;  %v2038_v54 = vpop.f32.mrb[28].mxu1 }
 0xb39   : > { %v1993_v55 = vadd.f32 %v2891_v45, %v1992_v53  ;;  %v2039_v56 = vadd.f32 %v2891_v45, %v2038_v54  ;;  %v3080_v57 = vpop.f32.mrb[29].mxu0  ;;  %v3086_v58 = vpop.f32.mrb[29].mxu1 }
 0xb3a   : > { %v1995_v47 = vpop.f32.mrb[30].mxu0  ;;  %v2041_v59 = vpop.f32.mrb[30].mxu1 }
 0xb3b   : > { %v3081_v60 = vpop.f32.mrb[31].mxu0  ;;  %v3087_v61 = vpop.f32.mrb[31].mxu1  ;;  %v2096_v62 = vsel %vm1271_vm3, %v2039_v56, -inf  ;;  %v2093_v2 = vsel %vm1271_vm3, %v1993_v55, -inf }
 0xb3c   : > { %2097 = vmax.xlane.f32.xlu0 %v2096_v62  ;;  %2094 = vmax.xlane.f32.xlu1 %v2093_v2  ;;  %v3338_v60 = vld [vmem:[#allocation24] sm:$0xff]  }
 0xb40   : > { %v2084_v3 = vpop.f32.mrb[32].mxu0 }
 0xb41   : > { %v2085_v4 = vadd.f32 %v2891_v45, %v2084_v3  ;;  %v3092_v5 = vpop.f32.mrb[33].mxu0  ;;  %v3339_v3 = vld [vmem:[#allocation24 + $0x8] sm:$0xff]  }
 0xb42   : > { %v2087_v6 = vpop.f32.mrb[34].mxu0 }
 0xb43   : > { %v3093_v7 = vpop.f32.mrb[35].mxu0  ;;  %v2099_v0 = vsel %vm1271_vm3, %v2085_v4, -inf }
 0xb44   : > { %2100 = vmax.xlane.f32.xlu0 %v2099_v0 }
 0xb4d   : > { %1086 = vrot.lane.b32.xlu1 %v4473_v1, %s3862_s3 }
 0xb51   : > { %1106 = vrot.lane.b32.xlu1 %v4473_v1, %s3860_s20  ;;  %s868_s20 = scalar_lea.vmem [#allocation27], %s2849_s0 }
 0xb52   : > { %s2606_s3 = sshll.u32 %s868_s20, 4  ;;  %s4697_s3 = int_to_ptr.vmem [resolvable:$true] %s2606_s3 }
 0xb55   : > { %1126 = vrot.lane.b32.xlu1 %v4473_v1, %s3861_s12  ;;  %s4867_s12 = sld [smem:[#allocation58_spill]] }
 0xb56   : > { %v2092_v8 = vpop.xlane.xlu0 %2091 }
 0xb57   : > { %v2102_v13 = vsub.f32 %v1947_v48, %v2092_v8 }
 0xb59   : > { %v2106_v18 = vmul.f32 1.442695, %v2102_v13 }
 0xb5a   : > { %1067 = vrot.lane.b32.xlu0 %v4473_v1, %s3854_s30 }
 0xbc9   : > { %v2098_v9 = vpop.xlane.xlu0 %2097  ;;  %v2095_v10 = vpop.xlane.xlu1 %2094 }
 0xbca   : > { %v2104_v11 = vsub.f32 %v2039_v56, %v2098_v9  ;;  %v2103_v12 = vsub.f32 %v1993_v55, %v2095_v10 }
 0xbcc   : > { %v2110_v15 = vmul.f32 1.442695, %v2104_v11  ;;  %v2108_v16 = vmul.f32 1.442695, %v2103_v12 }
 0xbcd   : > { %v1087_v17 = vpop.permute.xlu1 %1086 }
 0xbce   : > { %3368 = vpow2.f32 %v2110_v15  ;;  %1090 = vst.msk [vmem:[#allocation5 + $0x4] sm:$0xf] %vm1053_vm2, %v1087_v17 }
 0xbcf   : > { %3370 = vpow2.f32 %v2108_v16 }
 0xbd0   : > { %3372 = vpow2.f32 %v2106_v18  ;;  %v2900_v18 = vld [vmem:[#allocation26] ss:$0 sm:$0xff] }
 0xbd1   : > { %v1107_v19 = vpop.permute.xlu1 %1106  ;;  %v2101_v20 = vpop.xlane.xlu0 %2100 }
 0xbd2   : > { %1110 = vst.msk [vmem:[#allocation5 + $0x8] sm:$0xf] %vm1053_vm2, %v1107_v19  ;;  %v2105_v21 = vsub.f32 %v2085_v4, %v2101_v20 }
 0xbd4   : > { %v2112_v1 = vmul.f32 1.442695, %v2105_v21 }
 0xbd5   : > { %v1127_v22 = vpop.permute.xlu1 %1126  ;;  %v1068_v23 = vpop.permute.xlu0 %1067  ;;  %v1875_v24 = vld [vmem:[#allocation5 + $0x4] sm:$0xf] }
 0xbd6   : > { %3374 = vpow2.f32 %v2112_v1  ;;  %1130 = vst.msk [vmem:[#allocation5 + $0xc] sm:$0xf] %vm1053_vm2, %v1127_v22  ;;  %1070 = vst.msk [vmem:[#allocation5] sm:$0xf] %vm1053_vm2, %v1068_v23  ;;  %v2180_v25 = vsel %vm1499_vm4, %v1875_v24, 0 }
 0xbd7   : > { %3101 = vmatpush3.bf16.msra.mxu0 %v2180_v25 }
 0xbd8   : > { %v3369_v26 = vpop.eup %3368  ;;  %3112 = vmatprep.subr.bf16.mxu0 %v3855_v14 }
 0xbd9   : > { %v3371_v27 = vpop.eup %3370  ;;  %v2120_v28 = vsel %vm1271_vm3, %v3369_v26, 0.0  ;;  %v1876_v36 = vld [vmem:[#allocation5 + $0x8] sm:$0xf]  ;;  %v2128_v43 = vpack.c.bf16 %v3369_v26, %v3369_v26 }
 0xbda   : > { %2121 = vadd.xlane.f32.xlu1 %v2120_v28  ;;  %v2117_v29 = vsel %vm1271_vm3, %v3371_v27, 0.0  ;;  %v2127_v30 = vpack.c.bf16 %v3371_v27, %v3371_v27  ;;  %v3373_v31 = vpop.eup %3372  ;;  %v2226_v41 = vsel %vm1499_vm4, %v1876_v36, 0 }
 0xbdb   : > { %2118 = vadd.xlane.f32.xlu0 %v2117_v29  ;;  %v2126_v38 = vpack.c.bf16 %v3373_v31, %v3373_v31  ;;  %v2114_v42 = vsel %vm1271_vm3, %v3373_v31, 0.0 }
 0xbdc   : > { %3103 = vmatmul.mubr.msk.bf16.vlgmr.msra.gmra.mrb[36].mxu0 %vm1271_vm3, %v2127_v30  ;;  %v3340_v30 = vld [vmem:[%s4866_s23] sm:$0xff]  }
 0xbdd   : > { %v1874_v32 = vld [vmem:[#allocation5] sm:$0xf]  ;;  %v1877_v33 = vld [vmem:[#allocation5 + $0xc] sm:$0xf]  ;;  %3114 = vmatprep.mubr.msk.bf16.mxu0 %vm3856_vm1, %v3855_v14 }
 0xbde   : > { %v2134_v34 = vsel %vm1499_vm4, %v1874_v32, 0  ;;  %v2272_v35 = vsel %vm1499_vm4, %v1877_v33, 0 }
 0xbdf   : > { %3095 = vmatpush3.bf16.msra.mxu1 %v2134_v34  ;;  %3113 = vmatpush3.bf16.msra.mxu0 %v2272_v35  ;;  %v2904_v35 = vld [vmem:[#allocation14 + $0x2] ss:$0 sm:$0xff] }
 0xbe0   : > { %v3375_v37 = vpop.eup %3374  ;;  %3106 = vmatprep.subr.bf16.mxu1 %v3855_v14  ;;  %3126 = vmatprep.subr.bf16.mxu0 %v3855_v14 }
 0xbe1   : > { %v2123_v39 = vsel %vm1271_vm3, %v3375_v37, 0.0  ;;  %v2129_v40 = vpack.c.bf16 %v3375_v37, %v3375_v37  ;;  %v2905_v37 = vld [vmem:[#allocation15 + $0x2] ss:$0 sm:$0xff] }
 0xbe2   : > { %2124 = vadd.xlane.f32.xlu0 %v2123_v39  ;;  %3097 = vmatmul.mubr.msk.bf16.vlgmr.msra.gmra.mrb[32].mxu1 %vm1271_vm3, %v2126_v38 }
 0xbe3   : > { %3107 = vmatpush3.bf16.msra.mxu1 %v2226_v41  ;;  %3108 = vmatprep.mubr.msk.bf16.mxu1 %vm3856_vm1, %v3855_v14  ;;  %v3342_v41 = vld [vmem:[%s4867_s12] sm:$0xff]  }
 0xbe4   : > { %3115 = vmatmul.mubr.msk.bf16.vlgmr.msra.gmra.mrb[40].mxu0 %vm1271_vm3, %v2129_v40  ;;  %3118 = vmatprep.subr.bf16.mxu1 %v3855_v14 }
 0xbe5   : > { %3130 = vmatprep.mubr.msk.bf16.mxu0 %vm3856_vm1, %v3855_v14  ;;  %3127 = vmatpush3.bf16.msra.mxu0 %v3340_v30 }
 0xbe6   : > { %2115 = vadd.xlane.f32.xlu0 %v2114_v42  ;;  %3128 = vmatprep.subr.bf16.mxu0 %v3855_v14  ;;  %v3343_v42 = vld [vmem:[%s4867_s12 + $0x8] sm:$0xff]  }
 0xbea   : > { %3109 = vmatmul.mubr.msk.bf16.vlgmr.msra.gmra.mrb[36].mxu1 %vm1271_vm3, %v2128_v43  ;;  %v3344_v43 = vld [vmem:[%s4867_s12 + $0x10] sm:$0xff]  }
 0xbeb   : > { %3122 = vmatprep.mubr.msk.bf16.mxu1 %vm3856_vm1, %v3855_v14  ;;  %3119 = vmatpush3.bf16.msra.mxu1 %v3338_v60 }
 0xbec   : > { %3120 = vmatprep.subr.bf16.mxu1 %v3855_v14 }
 0xbef   : > { %3121 = vmatpush3.bf16.msra.mxu1 %v3339_v3 }
 0xbf0   : > { %3134 = vmatprep.subr.bf16.mxu1 %v3855_v14 }
 0xc67   : > { %v2122_v50 = vpop.xlane.xlu1 %2121 }
 0xc68   : > { %v2119_v44 = vpop.xlane.xlu0 %2118 }
 0xc69   : > { %3376 = vrcp.f32 %v2119_v44  ;;  %v3345_v44 = vld [vmem:[%s4867_s12 + $0x18] sm:$0xff]  }
 0xc6f   : > { %v2125_v45 = vpop.xlane.xlu0 %2124 }
 0xc73   : > { %v2116_v46 = vpop.xlane.xlu0 %2115  ;;  %v3377_v48 = vpop.eup %3376 }
 0xc74   : > { %3378 = vrcp.f32 %v2116_v46 }
 0xc75   : > { %3380 = vrcp.f32 %v2122_v50 }
 0xc76   : > { %3382 = vrcp.f32 %v2125_v45 }
 0xc7e   : > { %v3379_v55 = vpop.eup %3378 }
 0xc7f   : > { %v3381_v5 = vpop.eup %3380 }
 0xc80   : > { %v3383_v10 = vpop.eup %3382 }
 0xcaf   : > { %v2216_v49 = vpop.f32.mrb[36].mxu0 }
 0xcb0   : > { %v2319_v51 = vmul.f32 %v3377_v48, %v2216_v49  ;;  %v3104_v52 = vpop.f32.mrb[37].mxu0 }
 0xcb1   : > { %v2219_v53 = vpop.f32.mrb[38].mxu0 }
 0xcb2   : > { %2324 = vrot.lane.b32.xlu0 %v2319_v51, %s3864_s5  ;;  %v3105_v54 = vpop.f32.mrb[39].mxu0  ;;  %s3866_s5 = smov [#allocation27]  }
 0xcb5   : > { %v2170_v56 = vpop.f32.mrb[32].mxu1 }
 0xcb6   : > { %v2318_v57 = vmul.f32 %v3379_v55, %v2170_v56  ;;  %v3098_v58 = vpop.f32.mrb[33].mxu1 }
 0xcb7   : > { %v2308_v47 = vpop.f32.mrb[40].mxu0  ;;  %v2173_v59 = vpop.f32.mrb[34].mxu1  ;;  %v2915_v58 = vld [vmem:[%s4869_s24] ss:$0 sm:$0xff] }
 0xcb8   : > { %2322 = vst.msk [vmem:[#allocation7] sm:$0xff] %vm1271_vm3, %v2318_v57  ;;  %v3116_v61 = vpop.f32.mrb[41].mxu0  ;;  %v3099_v62 = vpop.f32.mrb[35].mxu1  ;;  %v2321_v11 = vmul.f32 %v3383_v10, %v2308_v47 }
 0xcb9   : > { %v2311_v2 = vpop.f32.mrb[42].mxu0 }
 0xcba   : > { %v3117_v4 = vpop.f32.mrb[43].mxu0 }
 0xcbd   : > { %v2262_v6 = vpop.f32.mrb[36].mxu1 }
 0xcbe   : > { %v2320_v7 = vmul.f32 %v3381_v5, %v2262_v6  ;;  %v3110_v0 = vpop.f32.mrb[37].mxu1 }
 0xcbf   : > { %v2265_v8 = vpop.f32.mrb[38].mxu1 }
 0xcc0   : > { %2329 = vrot.lane.b32.xlu1 %v2320_v7, %s3863_s9  ;;  %v3111_v9 = vpop.f32.mrb[39].mxu1  ;;  %s3728_s9 = scalar_lea.vmem %s4697_s3, 128 }
 0xcc1   : > { %p3729_p5 = scmp.ne.s32.totalorder %s4697_s3, %s3728_s9 }
 0xcc3   : > { %p3730_p9 = pnand %p3729_p5, %p4872_p4 }
 0xcc4   : > { %2334 = vrot.lane.b32.xlu1 %v2321_v11, %s3865_s13  ;;  %s4868_s13 = sld [smem:[#allocation57_spill]] }
 0xcc5   : > { %p3731_p10 = pneg %p3730_p9 }
 0xcca   : > { %v2906_v45 = vld [vmem:[%s4868_s13] ss:$0 sm:$0xff]  ;;  %s3732_s13 = sshll.u32 %s3866_s5, 4  ;;  %s3733_s13 = int_to_ptr.vmem [resolvable:$false] %s3732_s13 }
 0xccb   : > { %s3734_s0 = scalar_lea.vmem %s3733_s13, 256  ;;  %p3735_p12 = scmp.lt.s32.totalorder %s4697_s3, %s3733_s13 }
 0xccc   : > { %p3736_p6 = scmp.lt.s32.totalorder %s3734_s0, %s3728_s9 }
 0xcce   : > { %p3737_p13 = por %p3736_p6, %p3735_p12 }
 0xcd0   : > { %p3738_p0 = pnand %p3737_p13, %p3731_p10 }
 0xd24   : > { %v2325_v12 = vpop.permute.xlu0 %2324 }
 0xd25   : > { %2327 = vst.msk [vmem:[#allocation7] sm:$0xff] %vm1694_vm5, %v2325_v12 }
 0xd32   : > { %v2330_v13 = vpop.permute.xlu1 %2329 }
 0xd33   : > { %2332 = vst.msk [vmem:[#allocation7] sm:$0xff] %vm1700_vm6, %v2330_v13 }
 0xd36   : > { %v2335_v15 = vpop.permute.xlu1 %2334 }
 0xd37   : > { %2337 = vst.msk [vmem:[#allocation7] sm:$0xff] %vm1706_vm7, %v2335_v15 }
 0xd3e   : > { %v2338_v16 = vld [vmem:[#allocation7] sm:$0xff] }
 0xd3f   : > { %v2344_v17 = vpack.c.bf16 %v2338_v16, %v2338_v16 }
 0xd41   : > { %3123 = vmatmul.mubr.msk.bf16.vlgmr.msra.gmra.mrb[40].mxu1 %vm886_vm0, %v2344_v17 }
 0xd42   : > { %3142 = vmatprep.mubr.msk.bf16.mxu1 %vm3856_vm1, %v3855_v14  ;;  %3135 = vmatpush3.bf16.msra.mxu1 %v3342_v41 }
 0xd43   : > { %3136 = vmatprep.subr.bf16.mxu1 %v3855_v14 }
 0xd46   : > { %3137 = vmatpush3.bf16.msra.mxu1 %v3343_v42 }
 0xd47   : > { %3138 = vmatprep.subr.bf16.mxu1 %v3855_v14 }
 0xd4a   : > { %3139 = vmatpush3.bf16.msra.mxu1 %v3344_v43 }
 0xd4b   : > { %3140 = vmatprep.subr.bf16.mxu1 %v3855_v14 }
 0xd4e   : > { %3141 = vmatpush3.bf16.msra.mxu1 %v3345_v44 }
 0xe14   : > { %v2400_v19 = vpop.f32.mrb[40].mxu1 }
 0xe15   : > { %v2401_v20 = vadd.f32 %v2900_v18, %v2400_v19  ;;  %v3124_v21 = vpop.f32.mrb[41].mxu1 }
 0xe16   : > { %v2403_v1 = vpop.f32.mrb[42].mxu1 }
 0xe17   : > { %v2406_v22 = vadd.f32 %v2401_v20, %v4559_v63  ;;  %v3125_v23 = vpop.f32.mrb[43].mxu1  ;;  %v3341_v63 = vld [vmem:[%s4866_s23 + $0x8] sm:$0xff]  }
 0xe18   : > { %3129 = vmatpush3.bf16.msra.mxu0 %v3341_v63 }
 0xe19   : > { %v2409_v24 = vsel %vm886_vm0, %v2406_v22, 0.0 }
 0xe1a   : > { %2410 = vadd.xlane.f32.xlu1 %v2409_v24 }
 0xea7   : > { %v2411_v25 = vpop.xlane.xlu1 %2410 }
 0xea8   : > { %v2412_v26 = vmul.f32 0.03125, %v2411_v25 }
 0xeaa   : > { %v2413_v27 = vsub.f32 %v2406_v22, %v2412_v26 }
 0xeac   : > { %v2414_v28 = vmul.f32 %v2413_v27, %v2413_v27 }
 0xeae   : > { %v2415_v29 = vsel %vm886_vm0, %v2414_v28, 0.0 }
 0xeaf   : > { %2416 = vadd.xlane.f32.xlu0 %v2415_v29 }
 0xf3c   : > { %v2417_v31 = vpop.xlane.xlu0 %2416 }
 0xf3d   : > { %v2418_v32 = vmul.f32 0.03125, %v2417_v31 }
 0xf3f   : > { %v2419_v33 = vadd.f32 1e-05, %v2418_v32 }
 0xf41   : > { %3384 = vrsqrt.f32 %v2419_v33 }
 0xf4b   : > { %v3385_v34 = vpop.eup %3384 }
 0xf4c   : > { %v2421_v36 = vmul.f32 %v3385_v34, %v2413_v27 }
 0xf4e   : > { %v2426_v38 = vmul.f32 %v2904_v35, %v2421_v36 }
 0xf50   : > { %v2431_v39 = vadd.f32 %v2905_v37, %v2426_v38 }
 0xf52   : > { %v2432_v40 = vpack.c.bf16 %v2431_v39, %v2431_v39 }
 0xf54   : > { %3131 = vmatmul.mubr.msk.bf16.vlgmr.msra.gmra.mrb[44].mxu0 %vm886_vm0, %v2432_v40 }
0x1027   : > { %v2493_v46 = vpop.f32.mrb[44].mxu0 }
0x1028   : > { %v2494_v48 = vadd.f32 %v2906_v45, %v2493_v46  ;;  %v3132_v49 = vpop.f32.mrb[45].mxu0 }
0x1029   : > { %v2496_v50 = vpop.f32.mrb[46].mxu0 }
0x102a   : > { %v2500_v51 = vmul.f32 0.70710677, %v2494_v48  ;;  %v3133_v52 = vpop.f32.mrb[47].mxu0  ;;  %v2499_v14 = vmul.f32 0.5, %v2494_v48 }
0x102c   : > { %3386 = verf.f32 %v2500_v51 }
0x1036   : > { %v3387_v53 = vpop.eup %3386 }
0x1037   : > { %v2502_v54 = vadd.f32 1.0, %v3387_v53 }
0x1039   : > { %v2503_v55 = vmul.f32 %v2502_v54, %v2499_v14 }
0x103b   : > { %v2504_v56 = vpack.c.bf16 %v2503_v55, %v2503_v55 }
0x103d   : > { %3143 = vmatmul.mubr.msk.bf16.vlgmr.msra.gmra.mrb[44].mxu1 %vm2537_vm8, %v2504_v56 }
0x1110   : > { %v2575_v57 = vpop.f32.mrb[44].mxu1 }
0x1111   : > { %v2581_v47 = vadd.f32 %v2575_v57, %v2406_v22  ;;  %v3144_v59 = vpop.f32.mrb[45].mxu1 }
0x1112   : > { %v2578_v60 = vpop.f32.mrb[46].mxu1 }
0x1113   : > { %v2589_v61 = vadd.f32 %v2915_v58, %v2581_v47  ;;  %v3145_v62 = vpop.f32.mrb[47].mxu1 }
0x1115   : > { %2590 = vst.msk [vmem:[%s868_s20] sm:$0xff] %vm886_vm0, %v2589_v61 }
0x1116   : > { %3741 = shalt.err (!%p3738_p0)
}
0x1117   : > { %s3742_s1 = scalar_lea.hbm %s4695_s10, 128  ;;  %s3746_s24 = scalar_lea.hbm %s4871_s6, 256 }
0x1118   : > { %p3743_p8 = scmp.ne.s32.totalorder %s4695_s10, %s3742_s1  ;;  %p3747_p1 = scmp.lt.u32.totalorder %s4695_s10, %s4871_s6 }
0x1119   : > { %p3748_p3 = scmp.lt.u32.totalorder %s3746_s24, %s3742_s1  ;;  %p3750_p5 = scmp.lt.u32.totalorder %s3742_s1, %s4695_s10 }
0x111a   : > { %p3744_p11 = pnand %p3743_p8, %p4872_p4 }
0x111b   : > { %p3749_p7 = por %p3748_p3, %p3747_p1 }
0x111c   : > { %p3745_p2 = pneg %p3744_p11 }
0x111d   : > { %p3751_p9 = por %p3750_p5, %p3749_p7 }
0x111f   : > { %p3752_p10 = pnand %p3751_p9, %p3745_p2 }
0x1121   : > { %3755 = shalt.err (!%p3752_p10)
}
0x1122   : > { %3190 = dma.vmem_to_hbm [thread:$0]  (%p4872_p4), %s4697_s3, 128, %s4695_s10, %s2592_s27  }
0x1123 PF: > { %s4873_s4 = sld [smem:[#allocation37_spill]]  ;;  %s4874_s22 = sld [smem:[#allocation42_spill]] }
0x1124   : > { %s4875_s28 = sld [smem:[#allocation39_spill]] }
0x1129   : > { %s2618_s9 = sand.u32 1, %s4873_s4   ;;  %p4876_p12 = scmp.ne.s32.totalorder %s4874_s22, 0 }
0x112a   : > { %p4877_p6 = scmp.ge.s32.totalorder %s4875_s28, 2  ;;  %s2619_s5 = scalar_lea.sflag [#allocation10], %s2618_s9 }
0x112c   : > { %p3231_p13 = pnand %p4877_p6, %p4876_p12 }
0x112e   : > { %3813 = dma.done.wait (!%p3231_p13), %s2619_s5, 128  }
0x112f   : > { %3815 = vsyncadd (!%p3231_p13), %s2619_s5, 4294967168  ;;  %s42_s28 = sadd.s32 1, %s4875_s28   ;;  %s4878_s7 = sld [smem:[#allocation41_spill]] }
0x1130   : > { %p39_p0 = scmp.ge.s32.totalorder %s42_s28, 4   ;;  %s4879_s27 = sld [smem:[#allocation38_spill]] }
0x1131   : > { %s4880_s3 = sld [smem:[#allocation40_spill]]  ;;  %s4881_s2 = smov %s3822_s25 }
0x1132   : > { %s4882_s25 = smov %s3826_s26  ;;  %41 = sbr.rel (!%p39_p0) target bundleno = 30 (0x1e), region = 227 }
0x1135   : > { %s4883_s26 = smov %s4878_s7 }
0x1139   :  { %2624 = vsyncpa [#allocation9], 1 }
0x113a   :  { %2626 = vsyncpa [#allocation9 + $0x1], 1 }
0x113b   :  { %2627 = vsyncpa [#allocation12], 1 }
0x113c   :  { %2628 = vsyncpa [#allocation16], 1 }
0x113d   :  { %2629 = vsyncpa [#allocation19], 1 }
0x113e   :  { %2630 = vsyncpa [#allocation22], 1 }
0x113f   :  { %2631 = vsyncpa [#allocation25], 1 }
0x1140   :  { %2632 = vsyncpa [#allocation10], 1 }
0x1141   :  { %2634 = vsyncpa [#allocation10 + $0x1], 1 }

// kernel: tpu_custom_call.1
= control target key start
LH: loop header
LB: loop body
LE: loop exit
PB: predicated region body
PF: predicated region fallthrough
CT: control target
= control target key end

     0   :  { %s4745_s0 = inlined_call_operand.vmem [shape: f32[2,8,32], index: 0, kind: input, shape index: {}]   ;;  %s4746_s1 = inlined_call_operand.vmem [shape: f32[2,8,32], index: 1, kind: input, shape index: {}]   ;;  %s4747_s2 = inlined_call_operand.hbm [shape: f32[2,1,8], index: 2, kind: input, shape index: {}]   ;;  %s4748_s3 = inlined_call_operand.hbm [shape: f32[8,8], index: 3, kind: input, shape index: {}]   ;;  %s4749_s4 = inlined_call_operand.hbm [shape: f32[2,1,8], index: 4, kind: input, shape index: {}]   ;;  %s4750_s5 = inlined_call_operand.hbm [shape: f32[3,32], index: 5, kind: input, shape index: {}]   ;;  %s4751_s6 = inlined_call_operand.hbm [shape: f32[3,32], index: 6, kind: input, shape index: {}]   ;;  %s4752_s7 = inlined_call_operand.vmem [shape: bf16[32,96], index: 7, kind: input, shape index: {}]   ;;  %s4753_s8 = inlined_call_operand.hbm [shape: f32[1,96], index: 8, kind: input, shape index: {}]   ;;  %s4754_s9 = inlined_call_operand.vmem [shape: bf16[32,32], index: 9, kind: input, shape index: {}]   ;;  %s4755_s10 = inlined_call_operand.hbm [shape: f32[1,32], index: 10, kind: input, shape index: {}]   ;;  %s4756_s11 = inlined_call_operand.hbm [shape: bf16[32,32], index: 11, kind: input, shape index: {}]   ;;  %s4757_s12 = inlined_call_operand.hbm [shape: f32[1,32], index: 12, kind: input, shape index: {}]   ;;  %s4758_s13 = inlined_call_operand.vmem [shape: bf16[32,64], index: 13, kind: input, shape index: {}]   ;;  %s4759_s14 = inlined_call_operand.hbm [shape: f32[1,64], index: 14, kind: input, shape index: {}]   ;;  %s4760_s15 = inlined_call_operand.hbm [shape: bf16[32,32], index: 15, kind: input, shape index: {}]   ;;  %s4761_s16 = inlined_call_operand.hbm [shape: f32[1,32], index: 16, kind: input, shape index: {}]   ;;  %s4762_s17 = inlined_call_operand.vmem [shape: bf16[32,64], index: 17, kind: input, shape index: {}]   ;;  %s4763_s18 = inlined_call_operand.vmem [shape: f32[1,64], index: 18, kind: input, shape index: {}]   ;;  %s4764_s19 = inlined_call_operand.vmem [shape: bf16[64,32], index: 19, kind: input, shape index: {}]   ;;  %s4765_s20 = inlined_call_operand.vmem [shape: f32[1,32], index: 20, kind: input, shape index: {}]   ;;  %s4766_s21 = inlined_call_operand.hbm [shape: f32[2,8,32], index: 21, kind: output, shape index: {}]  }
   0x1   :  { %4797 = sst [smem:[#allocation43_spill]] %s4745_s0 }
   0x2   :  { %4798 = sst [smem:[#allocation44_spill]] %s4746_s1 }
   0x3   :  { %4799 = sst [smem:[#allocation45_spill]] %s4747_s2 }
   0x4   :  { %4800 = sst [smem:[#allocation46_spill]] %s4748_s3 }
   0x5   :  { %4801 = sst [smem:[#allocation47_spill]] %s4749_s4 }
   0x6   :  { %4802 = sst [smem:[#allocation48_spill]] %s4750_s5 }
   0x7   :  { %4803 = sst [smem:[#allocation49_spill]] %s4751_s6 }
   0x8   :  { %4804 = sst [smem:[#allocation50_spill]] %s4752_s7 }
   0x9   :  { %4805 = sst [smem:[#allocation51_spill]] %s4754_s9 }
   0xa   :  { %4806 = sst [smem:[#allocation52_spill]] %s4755_s10 }
   0xb   :  { %4807 = sst [smem:[#allocation53_spill]] %s4757_s12 }
   0xc   :  { %4808 = sst [smem:[#allocation54_spill]] %s4758_s13 }
   0xd   :  { %4809 = sst [smem:[#allocation55_spill]] %s4760_s15 }
   0xe   :  { %4810 = sst [smem:[#allocation56_spill]] %s4762_s17 }
   0xf   :  { %4811 = sst [smem:[#allocation57_spill]] %s4763_s18 }
  0x10   :  { %4812 = sst [smem:[#allocation58_spill]] %s4764_s19 }
  0x11   :  { %4813 = sst [smem:[#allocation59_spill]] %s4765_s20 }
  0x12   :  { %4814 = sst [smem:[#allocation60_spill]] %s4766_s21 }
  0x13   :  { %26 = vsyncpa [#allocation9], 0 }
  0x14   :  { %28 = vsyncpa [#allocation9 + $0x1], 0 }
  0x15   :  { %29 = vsyncpa [#allocation12], 0 }
  0x16   :  { %30 = vsyncpa [#allocation16], 0 }
  0x17   :  { %31 = vsyncpa [#allocation19], 0 }
  0x18   :  { %32 = vsyncpa [#allocation22], 0 }
  0x19   :  { %33 = vsyncpa [#allocation25], 0 }
  0x1a   :  { %34 = vsyncpa [#allocation10], 0 }
  0x1b   :  { %36 = vsyncpa [#allocation10 + $0x1], 0  ;;  %s3977_s2 = smov 0   ;;  %s3979_s25 = smov 0  }
  0x1c   :  { %s3981_s26 = smov 0   ;;  %s3983_s27 = smov 0  }
  0x1d   :  { %s3985_s3 = smov 0   ;;  %s3987_s28 = smov 0  }
  0x1e LB: > { %4815 = sst [smem:[#allocation37_spill]] %s3818_s2  ;;  %s4008_s29 = sadd.s32 4294967295, %s3838_s28   ;;  %s3838_s28 = sphi %s3987_s28, %s42_s28   ;;  %s3834_s3 = sphi %s3985_s3, %s4880_s3   ;;  %s3830_s27 = sphi %s3983_s27, %s4879_s27   ;;  %s3826_s26 = sphi %s3981_s26, %s4883_s26   ;;  %s3822_s25 = sphi %s3979_s25, %s4882_s25   ;;  %s3818_s2 = sphi %s3977_s2, %s4881_s2  }
  0x1f   : > { %4816 = sst [smem:[#allocation38_spill]] %s3834_s3  ;;  %p2824_p0 = scmp.ge.s32.totalorder %s3838_s28, 1 }
  0x20   : > { %4817 = sst [smem:[#allocation39_spill]] %s3838_s28  ;;  %p4775_p1 = scmp.eq.s32.totalorder %s4008_s29, 0 }
  0x21   : > { %p548_p2 = scmp.lt.s32.totalorder %s3838_s28, 3  ;;  %s3840_s4 = smov [#allocation11]  }
  0x22   : > { %s561_s30 = sshll.u32 %s3840_s4, 4  ;;  %s3841_s5 = smov [#allocation15]   ;;  %s562_s30 = int_to_ptr.vmem [resolvable:$true] %s561_s30 }
  0x23   : > { %p4013_p3 = pnand %p2824_p0, %p548_p2  ;;  %s583_s22 = sshll.u32 %s3841_s5, 4  ;;  %s4026_s22 = int_to_ptr.vmem [resolvable:$true] %s583_s22 }
  0x24   : > { %s3842_s1 = smov [#allocation18]   ;;  %s4820_s20 = sld [smem:[#allocation46_spill]] }
  0x25   : > { %s4818_s0 = scalar_select %p4013_p3, 1, 0 }
  0x26   : > { %p3192_p5 = pneg %p4013_p3  ;;  %s611_s24 = sshll.u32 %s3842_s1, 4  ;;  %s4028_s24 = int_to_ptr.vmem [resolvable:$true] %s611_s24 }
  0x28   : > { %p4022_p6 = pnand %p3192_p5, %p4775_p1 }
  0x2a   : > { %s4819_s23 = scalar_select %p4022_p6, 1, 0 }
  0x2b   : > { %s3388_s18 = scalar_lea.hbm %s4820_s20, 128  ;;  %p4038_p8 = pneg %p4022_p6 }
  0x2c   : > { %p3389_p7 = scmp.ne.s32.totalorder %s4820_s20, %s3388_s18  ;;  %p3395_p11 = scmp.lt.u32.totalorder %s3388_s18, %s4820_s20 }
  0x2e   : > { %p3391_p9 = pnand %p4038_p8, %p3389_p7 }
  0x30   : > { %p3392_p10 = pneg %p3391_p9 }
  0x32   : > { %p3397_p12 = pnand %p3395_p11, %p3392_p10 }
  0x34   : > { %3400 = shalt.err (!%p3397_p12)
}
  0x35   : > { %s3401_s21 = scalar_lea.vmem %s562_s30, 128  ;;  %p3409_p5 = scmp.lt.s32.totalorder %s562_s30, %s562_s30 }
  0x36   : > { %p3402_p13 = scmp.ne.s32.totalorder %s562_s30, %s3401_s21  ;;  %p3410_p4 = scmp.lt.s32.totalorder %s3401_s21, %s3401_s21 }
  0x38   : > { %p3404_p0 = pnand %p3402_p13, %p4038_p8  ;;  %p3411_p1 = por %p3410_p4, %p3409_p5 }
  0x3a   : > { %p3405_p2 = pneg %p3404_p0 }
  0x3c   : > { %p3412_p3 = pnand %p3411_p1, %p3405_p2 }
  0x3e   : > { %3415 = shalt.err (!%p3412_p3)
}
  0x3f   : > { %3195 = dma.hbm_to_vmem [thread:$0]  (!%p4022_p6), %s4820_s20, 128, %s562_s30, [#allocation12]  }
  0x40   : > { %s4822_s6 = sld [smem:[#allocation49_spill]] }
  0x46   : > { %s3416_s4 = scalar_lea.hbm %s4822_s6, 64 }
  0x47   : > { %p3417_p7 = scmp.ne.s32.totalorder %s4822_s6, %s3416_s4  ;;  %p3423_p1 = scmp.lt.u32.totalorder %s3416_s4, %s4822_s6 }
  0x49   : > { %p3419_p9 = pnand %p3417_p7, %p4038_p8 }
  0x4b   : > { %p3420_p4 = pneg %p3419_p9 }
  0x4d   : > { %p3425_p3 = pnand %p3423_p1, %p3420_p4 }
  0x4f   : > { %3428 = shalt.err (!%p3425_p3)
}
  0x50   : > { %s3429_s30 = scalar_lea.vmem %s4026_s22, 64  ;;  %p3437_p13 = scmp.lt.s32.totalorder %s4026_s22, %s4026_s22 }
  0x51   : > { %p3430_p10 = scmp.ne.s32.totalorder %s4026_s22, %s3429_s30  ;;  %p3438_p0 = scmp.lt.s32.totalorder %s3429_s30, %s3429_s30 }
  0x53   : > { %p3432_p11 = pnand %p3430_p10, %p4038_p8  ;;  %p3439_p2 = por %p3438_p0, %p3437_p13 }
  0x55   : > { %p3433_p12 = pneg %p3432_p11 }
  0x57   : > { %p3440_p5 = pnand %p3439_p2, %p3433_p12 }
  0x59   : > { %3443 = shalt.err (!%p3440_p5)
}
  0x5a   : > { %3201 = dma.hbm_to_vmem [thread:$0]  (!%p4022_p6), %s4822_s6, 64, %s4026_s22, [#allocation16]  }
  0x5b   : > { %s4823_s10 = sld [smem:[#allocation52_spill]] }
  0x61   : > { %s3444_s9 = scalar_lea.hbm %s4823_s10, 16 }
  0x62   : > { %p3445_p7 = scmp.ne.s32.totalorder %s4823_s10, %s3444_s9  ;;  %p3451_p1 = scmp.lt.u32.totalorder %s3444_s9, %s4823_s10 }
  0x64   : > { %p3447_p9 = pnand %p3445_p7, %p4038_p8 }
  0x66   : > { %p3448_p4 = pneg %p3447_p9 }
  0x68   : > { %p3453_p3 = pnand %p3451_p1, %p3448_p4 }
  0x6a   : > { %3456 = shalt.err (!%p3453_p3)
}
  0x6b   : > { %s3457_s22 = scalar_lea.vmem %s4028_s24, 16  ;;  %s3464_s30 = scalar_lea.vmem %s4028_s24, 32 }
  0x6c   : > { %p3458_p10 = scmp.ne.s32.totalorder %s4028_s24, %s3457_s22  ;;  %p3465_p13 = scmp.lt.s32.totalorder %s4028_s24, %s4028_s24 }
  0x6d   : > { %p3466_p0 = scmp.lt.s32.totalorder %s3464_s30, %s3457_s22 }
  0x6e   : > { %p3460_p11 = pnand %p3458_p10, %p4038_p8 }
  0x6f   : > { %p3467_p2 = por %p3466_p0, %p3465_p13 }
  0x70   : > { %p3461_p12 = pneg %p3460_p11 }
  0x72   : > { %p3468_p5 = pnand %p3467_p2, %p3461_p12 }
  0x74   : > { %3471 = shalt.err (!%p3468_p5)
}
  0x75   : > { %3207 = dma.hbm_to_vmem [thread:$0]  (!%p4022_p6), %s4823_s10, 16, %s4028_s24, [#allocation19]  }
  0x76   : > { %s3843_s17 = smov [#allocation21]   ;;  %s4824_s12 = sld [smem:[#allocation53_spill]] }
  0x77   : > { %s635_s19 = sshll.u32 %s3843_s17, 4  ;;  %s636_s19 = int_to_ptr.vmem [resolvable:$true] %s635_s19 }
  0x7c   : > { %s3472_s4 = scalar_lea.hbm %s4824_s12, 16 }
  0x7d   : > { %p3473_p7 = scmp.ne.s32.totalorder %s4824_s12, %s3472_s4  ;;  %p3479_p1 = scmp.lt.u32.totalorder %s3472_s4, %s4824_s12 }
  0x7f   : > { %p3475_p9 = pnand %p3473_p7, %p4038_p8 }
  0x81   : > { %p3476_p4 = pneg %p3475_p9 }
  0x83   : > { %p3481_p3 = pnand %p3479_p1, %p3476_p4 }
  0x85   : > { %3484 = shalt.err (!%p3481_p3)
}
  0x86   : > { %s3485_s24 = scalar_lea.vmem %s636_s19, 16  ;;  %s3492_s7 = scalar_lea.vmem %s636_s19, 32 }
  0x87   : > { %p3486_p10 = scmp.ne.s32.totalorder %s636_s19, %s3485_s24  ;;  %p3493_p13 = scmp.lt.s32.totalorder %s636_s19, %s636_s19 }
  0x88   : > { %p3494_p0 = scmp.lt.s32.totalorder %s3492_s7, %s3485_s24 }
  0x89   : > { %p3488_p11 = pnand %p3486_p10, %p4038_p8 }
  0x8a   : > { %p3495_p2 = por %p3494_p0, %p3493_p13 }
  0x8b   : > { %p3489_p12 = pneg %p3488_p11 }
  0x8d   : > { %p3496_p5 = pnand %p3495_p2, %p3489_p12 }
  0x8f   : > { %3499 = shalt.err (!%p3496_p5)
}
  0x90   : > { %3213 = dma.hbm_to_vmem [thread:$0]  (!%p4022_p6), %s4824_s12, 16, %s636_s19, [#allocation22]  }
  0x91   : > { %s3844_s9 = smov [#allocation24]   ;;  %s4825_s15 = sld [smem:[#allocation55_spill]] }
  0x92   : > { %s659_s18 = sshll.u32 %s3844_s9, 4  ;;  %s660_s18 = int_to_ptr.vmem [resolvable:$true] %s659_s18 }
  0x97   : > { %s3500_s21 = scalar_lea.hbm %s4825_s15, 256 }
  0x98   : > { %p3501_p7 = scmp.ne.s32.totalorder %s4825_s15, %s3500_s21  ;;  %p3507_p1 = scmp.lt.u32.totalorder %s3500_s21, %s4825_s15 }
  0x9a   : > { %p3503_p9 = pnand %p3501_p7, %p4038_p8 }
  0x9c   : > { %p3504_p4 = pneg %p3503_p9 }
  0x9e   : > { %p3509_p3 = pnand %p3507_p1, %p3504_p4 }
  0xa0   : > { %3512 = shalt.err (!%p3509_p3)
}
  0xa1   : > { %s3513_s19 = scalar_lea.vmem %s660_s18, 256  ;;  %p3521_p13 = scmp.lt.s32.totalorder %s660_s18, %s660_s18 }
  0xa2   : > { %p3514_p10 = scmp.ne.s32.totalorder %s660_s18, %s3513_s19  ;;  %p3522_p0 = scmp.lt.s32.totalorder %s3513_s19, %s3513_s19 }
  0xa4   : > { %p3516_p11 = pnand %p3514_p10, %p4038_p8  ;;  %p3523_p2 = por %p3522_p0, %p3521_p13 }
  0xa6   : > { %p3517_p12 = pneg %p3516_p11 }
  0xa8   : > { %p3524_p5 = pnand %p3523_p2, %p3517_p12 }
  0xaa   : > { %3527 = shalt.err (!%p3524_p5)
}
  0xab   : > { %s4779_s13 = smov 64   ;;  %s4780_s17 = smov 4  }
  0xac   : > { %3219 = dma.hbm_to_vmem [thread:$0]  (!%p4022_p6), %s4825_s15, 256, %s660_s18, [#allocation25], %s4779_s13, %s4779_s13, %s4780_s17  }
  0xad   : > { %s2823_s1 = sadd.s32 4294967294, %s3838_s28   ;;  %s54_s21 = sadd.s32 1, %s3834_s3 }
  0xae   : > { %s113_s22 = sadd.s32 1, %s3826_s26  ;;  %p56_p7 = scmp.ge.s32.totalorder %s54_s21, 2 }
  0xaf   : > { %p120_p9 = scmp.ne.s32.totalorder %s3826_s26, %s3822_s25  ;;  %p121_p4 = scmp.eq.s32.totalorder %s3838_s28, 0 }
  0xb0   : > { %p126_p1 = scmp.ne.s32.totalorder %s3822_s25, %s3818_s2  ;;  %s4885_s21 = smov (%p56_p7, %s54_s21), 0 }
  0xb1   : > { %4826 = sst [smem:[#allocation40_spill]] %s4885_s21  ;;  %p4150_p3 = por %p121_p4, %p120_p9 }
  0xb2   : > { %p4828_p10 = scmp.eq.s32.totalorder %s4008_s29, 0  ;;  %s110_s24 = ssub.s32 %s3834_s3, %s4885_s21 }
  0xb3   : > { %p535_p12 = scmp.eq.s32.totalorder %s4008_s29, 1  ;;  %p111_p13 = scmp.eq.s32.totalorder %s110_s24, 0 }
  0xb4   : > { %p4156_p11 = por %p4828_p10, %p126_p1  ;;  %p541_p0 = scmp.eq.s32.totalorder %s2823_s1, 1 }
  0xb5   : > { %p4163_p2 = por %p535_p12, %p120_p9  ;;  %p3244_p5 = scmp.lt.s32.totalorder %s3838_s28, 2 }
  0xb6   : > { %s4829_s18 = scalar_select %p4156_p11, 1, 0 }
  0xb7   : > { %s4830_s7 = scalar_select %p4163_p2, 1, 0 }
  0xb8   : > { %s4169_s19 = scalar_select %p111_p13, %s3826_s26, %s113_s22  }
  0xb9   : > { %p4171_p7 = por %p541_p0, %p126_p1  ;;  %s710_s4 = sand.u32 1, %s3838_s28  }
  0xba   : > { %4831 = sst [smem:[#allocation41_spill]] %s4169_s19  ;;  %s4786_s13 = sand.u32 1, %s3826_s26  }
  0xbb   : > { %s4832_s9 = scalar_select %p4171_p7, 1, 0 }
  0xbc   : > { %s2836_s17 = sshll.u32 %s3834_s3, 4  ;;  %s4834_s12 = sld [smem:[#allocation45_spill]] }
  0xbd   : > { %4833 = sst [smem:[#allocation42_spill]] %s4832_s9  ;;  %s713_s1 = scalar_lea.vmem [#allocation8], %s4786_s13 }
  0xbe   : > { %s720_s22 = sshll.u32 %s713_s1, 4  ;;  %p4189_p9 = pnand %p3244_p5, %p4150_p3  ;;  %s4185_s22 = int_to_ptr.vmem [resolvable:$true] %s720_s22 }
  0xbf   : > { %s4836_s3 = sld [smem:[#allocation47_spill]]  ;;  %s4198_s10 = scalar_lea.sflag [#allocation9], %s710_s4 }
  0xc0   : > { %s4835_s24 = scalar_select %p4189_p9, 1, 0 }
  0xc1   : > { %p4794_p1 = pneg %p4189_p9 }
  0xc2   : > { %s4181_s15 = scalar_lea.hbm %s4834_s12, %s2836_s17  ;;  %s3533_s13 = scalar_lea.hbm %s4834_s12, 32 }
  0xc3   : > { %s3528_s28 = scalar_lea.hbm %s4181_s15, 16  ;;  %p3534_p12 = scmp.lt.u32.totalorder %s4181_s15, %s4834_s12 }
  0xc4   : > { %p3529_p4 = scmp.ne.s32.totalorder %s4181_s15, %s3528_s28  ;;  %p3535_p13 = scmp.lt.u32.totalorder %s3533_s13, %s3528_s28 }
  0xc5   : > { %s4837_s19 = smov %s4836_s3  ;;  %s4196_s6 = scalar_lea.hbm %s4836_s3, %s2836_s17 }
  0xc6   : > { %p3531_p10 = pnand %p4794_p1, %p3529_p4  ;;  %p3536_p0 = por %p3535_p13, %p3534_p12 }
  0xc7   : > { %p3537_p5 = scmp.lt.u32.totalorder %s3528_s28, %s4181_s15 }
  0xc8   : > { %p3532_p3 = pneg %p3531_p10 }
  0xc9   : > { %p3538_p7 = por %p3537_p5, %p3536_p0 }
  0xcb   : > { %p3539_p2 = pnand %p3538_p7, %p3532_p3 }
  0xcd   : > { %3542 = shalt.err (!%p3539_p2)
}
  0xce   : > { %s3543_s3 = scalar_lea.vmem %s4185_s22, 16  ;;  %s3847_s17 = smov [#allocation8]  }
  0xcf   : > { %p3544_p4 = scmp.ne.s32.totalorder %s4185_s22, %s3543_s3  ;;  %s3548_s21 = sshll.u32 %s3847_s17, 4  ;;  %s3549_s21 = int_to_ptr.vmem [resolvable:$false] %s3548_s21 }
  0xd0   : > { %s3550_s9 = scalar_lea.vmem %s3549_s21, 32  ;;  %p3551_p6 = scmp.lt.s32.totalorder %s4185_s22, %s3549_s21 }
  0xd1   : > { %p3546_p10 = pnand %p3544_p4, %p4794_p1  ;;  %p3552_p12 = scmp.lt.s32.totalorder %s3550_s9, %s3543_s3 }
  0xd3   : > { %p3547_p11 = pneg %p3546_p10  ;;  %p3553_p13 = por %p3552_p12, %p3551_p6 }
  0xd5   : > { %p3554_p0 = pnand %p3553_p13, %p3547_p11 }
  0xd7   : > { %3557 = shalt.err (!%p3554_p0)
}
  0xd8   : > { %3226 = dma.hbm_to_vmem [thread:$0]  (!%p4189_p9), %s4181_s15, 16, %s4185_s22, %s4198_s10  }
  0xd9   : > { %s3848_s28 = smov [#allocation14]   ;;  %s3849_s4 = smov [#allocation17]  }
  0xda   : > { %s572_s13 = sshll.u32 %s3848_s28, 4  ;;  %s597_s30 = sshll.u32 %s3849_s4, 4  ;;  %s573_s13 = int_to_ptr.vmem [resolvable:$true] %s572_s13  ;;  %s598_s30 = int_to_ptr.vmem [resolvable:$true] %s597_s30 }
  0xdb   : > { %s4838_s17 = sld [smem:[#allocation48_spill]] }
  0xe1   : > { %s3558_s21 = scalar_lea.hbm %s4838_s17, 64 }
  0xe2   : > { %p3559_p6 = scmp.ne.s32.totalorder %s4838_s17, %s3558_s21  ;;  %p3565_p7 = scmp.lt.u32.totalorder %s3558_s21, %s4838_s17 }
  0xe4   : > { %p3561_p11 = pnand %p3559_p6, %p4038_p8 }
  0xe6   : > { %p3562_p2 = pneg %p3561_p11 }
  0xe8   : > { %p3567_p3 = pnand %p3565_p7, %p3562_p2 }
  0xea   : > { %3570 = shalt.err (!%p3567_p3)
}
  0xeb   : > { %s3571_s15 = scalar_lea.vmem %s573_s13, 64  ;;  %p3579_p12 = scmp.lt.s32.totalorder %s573_s13, %s573_s13 }
  0xec   : > { %p3572_p5 = scmp.ne.s32.totalorder %s573_s13, %s3571_s15  ;;  %p3580_p13 = scmp.lt.s32.totalorder %s3571_s15, %s3571_s15 }
  0xee   : > { %p3574_p4 = pnand %p3572_p5, %p4038_p8  ;;  %p3581_p0 = por %p3580_p13, %p3579_p12 }
  0xf0   : > { %p3575_p10 = pneg %p3574_p4 }
  0xf2   : > { %p3582_p1 = pnand %p3581_p0, %p3575_p10 }
  0xf4   : > { %3585 = shalt.err (!%p3582_p1)
}
  0xf5   : > { %p4839_p6 = scmp.ne.s32.totalorder %s4819_s23, 0  ;;  %s3586_s4 = scalar_lea.hbm %s4753_s8, 16 }
  0xf6   : > { %p3587_p11 = scmp.ne.s32.totalorder %s4753_s8, %s3586_s4  ;;  %p3593_p1 = scmp.lt.u32.totalorder %s3586_s4, %s4753_s8 }
  0xf7   : > { %3198 = dma.hbm_to_vmem [thread:$0]  (!%p4839_p6), %s4838_s17, 64, %s573_s13, [#allocation12]  }
  0xf8   : > { %p3589_p2 = pnand %p3587_p11, %p4038_p8 }
  0xfa   : > { %p3590_p7 = pneg %p3589_p2 }
  0xfc   : > { %p3595_p3 = pnand %p3593_p1, %p3590_p7 }
  0xfe   : > { %3598 = shalt.err (!%p3595_p3)
}
  0xff   : > { %s3599_s9 = scalar_lea.vmem %s598_s30, 16  ;;  %s3606_s13 = scalar_lea.vmem %s598_s30, 32 }
 0x100   : > { %p3600_p5 = scmp.ne.s32.totalorder %s598_s30, %s3599_s9  ;;  %p3607_p12 = scmp.lt.s32.totalorder %s598_s30, %s598_s30 }
 0x101   : > { %p3608_p13 = scmp.lt.s32.totalorder %s3606_s13, %s3599_s9 }
 0x102   : > { %p3602_p4 = pnand %p3600_p5, %p4038_p8 }
 0x103   : > { %p3609_p0 = por %p3608_p13, %p3607_p12 }
 0x104   : > { %p3603_p10 = pneg %p3602_p4 }
 0x106   : > { %p3610_p9 = pnand %p3609_p0, %p3603_p10 }
 0x108   : > { %3613 = shalt.err (!%p3610_p9)
}
 0x109   : > { %3204 = dma.hbm_to_vmem [thread:$0]  (!%p4839_p6), %s4753_s8, 16, %s598_s30, [#allocation16]  }
 0x10a   : > { %s3850_s28 = smov [#allocation20]   ;;  %s3851_s2 = smov [#allocation23]  }
 0x10b   : > { %s621_s12 = sshll.u32 %s3850_s28, 4  ;;  %s649_s4 = sshll.u32 %s3851_s2, 4  ;;  %s622_s12 = int_to_ptr.vmem [resolvable:$true] %s621_s12  ;;  %s650_s4 = int_to_ptr.vmem [resolvable:$true] %s649_s4 }
 0x10c   : > { %s3614_s21 = scalar_lea.hbm %s4756_s11, 256 }
 0x10d   : > { %p3615_p9 = scmp.ne.s32.totalorder %s4756_s11, %s3614_s21  ;;  %p3621_p7 = scmp.lt.u32.totalorder %s3614_s21, %s4756_s11 }
 0x10f   : > { %p3617_p11 = pnand %p3615_p9, %p4038_p8 }
 0x111   : > { %p3618_p2 = pneg %p3617_p11 }
 0x113   : > { %p3623_p1 = pnand %p3621_p7, %p3618_p2 }
 0x115   : > { %3626 = shalt.err (!%p3623_p1)
}
 0x116   : > { %s3627_s30 = scalar_lea.vmem %s622_s12, 256  ;;  %p3635_p10 = scmp.lt.s32.totalorder %s622_s12, %s622_s12 }
 0x117   : > { %p3628_p3 = scmp.ne.s32.totalorder %s622_s12, %s3627_s30  ;;  %p3636_p12 = scmp.lt.s32.totalorder %s3627_s30, %s3627_s30 }
 0x119   : > { %p3630_p5 = pnand %p3628_p3, %p4038_p8  ;;  %p3637_p13 = por %p3636_p12, %p3635_p10 }
 0x11b   : > { %p3631_p4 = pneg %p3630_p5 }
 0x11d   : > { %p3638_p0 = pnand %p3637_p13, %p3631_p4 }
 0x11f   : > { %3641 = shalt.err (!%p3638_p0)
}
 0x120   : > { %s4840_s22 = smov 4   ;;  %s4841_s28 = smov 64  }
 0x121   : > { %3210 = dma.hbm_to_vmem [thread:$0]  (!%p4839_p6), %s4756_s11, 256, %s622_s12, [#allocation19], %s4841_s28, %s4841_s28, %s4840_s22  }
 0x122   : > { %s3642_s3 = scalar_lea.hbm %s4759_s14, 16 }
 0x123   : > { %p3643_p9 = scmp.ne.s32.totalorder %s4759_s14, %s3642_s3  ;;  %p3649_p7 = scmp.lt.u32.totalorder %s3642_s3, %s4759_s14 }
 0x125   : > { %p3645_p11 = pnand %p3643_p9, %p4038_p8 }
 0x127   : > { %p3646_p2 = pneg %p3645_p11 }
 0x129   : > { %p3651_p1 = pnand %p3649_p7, %p3646_p2 }
 0x12b   : > { %3654 = shalt.err (!%p3651_p1)
}
 0x12c   : > { %s3655_s2 = scalar_lea.vmem %s650_s4, 16  ;;  %s3662_s12 = scalar_lea.vmem %s650_s4, 32 }
 0x12d   : > { %p3656_p3 = scmp.ne.s32.totalorder %s650_s4, %s3655_s2  ;;  %p3663_p10 = scmp.lt.s32.totalorder %s650_s4, %s650_s4 }
 0x12e   : > { %p3664_p12 = scmp.lt.s32.totalorder %s3662_s12, %s3655_s2 }
 0x12f   : > { %p3658_p5 = pnand %p3656_p3, %p4038_p8 }
 0x130   : > { %p3665_p13 = por %p3664_p12, %p3663_p10 }
 0x131   : > { %p3659_p4 = pneg %p3658_p5 }
 0x133   : > { %p3666_p0 = pnand %p3665_p13, %p3659_p4 }
 0x135   : > { %3669 = shalt.err (!%p3666_p0)
}
 0x136   : > { %3216 = dma.hbm_to_vmem [thread:$0]  (!%p4839_p6), %s4759_s14, 16, %s650_s4, [#allocation22]  }
 0x137   : > { %s3852_s1 = smov [#allocation26]   ;;  %s4842_s21 = sand.u32 1, %s3826_s26  }
 0x138   : > { %s673_s20 = sshll.u32 %s3852_s1, 4  ;;  %s730_s3 = scalar_lea.vmem [#allocation13], %s4842_s21  ;;  %s674_s20 = int_to_ptr.vmem [resolvable:$true] %s673_s20 }
 0x139   : > { %s737_s9 = sshll.u32 %s730_s3, 4  ;;  %s3670_s30 = scalar_lea.hbm %s4761_s16, 16  ;;  %s4303_s9 = int_to_ptr.vmem [resolvable:$true] %s737_s9 }
 0x13a   : > { %p3671_p9 = scmp.ne.s32.totalorder %s4761_s16, %s3670_s30  ;;  %p3677_p7 = scmp.lt.u32.totalorder %s3670_s30, %s4761_s16 }
 0x13c   : > { %p3673_p11 = pnand %p3671_p9, %p4038_p8 }
 0x13e   : > { %p3674_p2 = pneg %p3673_p11 }
 0x140   : > { %p3679_p1 = pnand %p3677_p7, %p3674_p2 }
 0x142   : > { %3682 = shalt.err (!%p3679_p1)
}
 0x143   : > { %s3683_s28 = scalar_lea.vmem %s674_s20, 16  ;;  %s3690_s1 = scalar_lea.vmem %s674_s20, 32 }
 0x144   : > { %p3684_p3 = scmp.ne.s32.totalorder %s674_s20, %s3683_s28  ;;  %p3691_p10 = scmp.lt.s32.totalorder %s674_s20, %s674_s20 }
 0x145   : > { %p3692_p12 = scmp.lt.s32.totalorder %s3690_s1, %s3683_s28 }
 0x146   : > { %p3686_p5 = pnand %p3684_p3, %p4038_p8 }
 0x147   : > { %p3693_p13 = por %p3692_p12, %p3691_p10 }
 0x148   : > { %p3687_p4 = pneg %p3686_p5 }
 0x14a   : > { %p3694_p0 = pnand %p3693_p13, %p3687_p4 }
 0x14c   : > { %3697 = shalt.err (!%p3694_p0)
}
 0x14d   : > { %3222 = dma.hbm_to_vmem [thread:$0]  (!%p4839_p6), %s4761_s16, 16, %s674_s20, [#allocation25]  }
 0x14e   : > { %s3698_s5 = scalar_lea.hbm %s4196_s6, 16  ;;  %p4843_p9 = scmp.ne.s32.totalorder %s4835_s24, 0 }
 0x14f   : > { %p3699_p8 = scmp.ne.s32.totalorder %s4196_s6, %s3698_s5  ;;  %s3703_s30 = scalar_lea.hbm %s4837_s19, 32 }
 0x150   : > { %p4844_p11 = pneg %p4843_p9  ;;  %p3704_p1 = scmp.lt.u32.totalorder %s4196_s6, %s4837_s19 }
 0x151   : > { %p3705_p3 = scmp.lt.u32.totalorder %s3703_s30, %s3698_s5  ;;  %p3707_p4 = scmp.lt.u32.totalorder %s3698_s5, %s4196_s6 }
 0x152   : > { %p3701_p2 = pnand %p3699_p8, %p4844_p11 }
 0x153   : > { %p3706_p5 = por %p3705_p3, %p3704_p1 }
 0x154   : > { %p3702_p7 = pneg %p3701_p2 }
 0x155   : > { %p3708_p10 = por %p3707_p4, %p3706_p5 }
 0x157   : > { %p3709_p12 = pnand %p3708_p10, %p3702_p7 }
 0x159   : > { %3712 = shalt.err (!%p3709_p12)
}
 0x15a   : > { %s3713_s20 = scalar_lea.vmem %s4303_s9, 16  ;;  %p4845_p13 = pmov %p4844_p11 }
 0x15b   : > { %p3714_p6 = scmp.ne.s32.totalorder %s4303_s9, %s3713_s20  ;;  %s3853_s12 = smov [#allocation13]  }
 0x15c   : > { %s3718_s4 = sshll.u32 %s3853_s12, 4  ;;  %s3719_s4 = int_to_ptr.vmem [resolvable:$false] %s3718_s4 }
 0x15d   : > { %p3716_p0 = pnand %p3714_p6, %p4845_p13  ;;  %s3720_s22 = scalar_lea.vmem %s3719_s4, 32 }
 0x15e   : > { %p3721_p11 = scmp.lt.s32.totalorder %s4303_s9, %s3719_s4  ;;  %p3722_p2 = scmp.lt.s32.totalorder %s3720_s22, %s3713_s20 }
 0x15f   : > { %p3717_p8 = pneg %p3716_p0 }
 0x160   : > { %p3723_p1 = por %p3722_p2, %p3721_p11 }
 0x162   : > { %p3724_p3 = pnand %p3723_p1, %p3717_p8 }
 0x164   : > { %3727 = shalt.err (!%p3724_p3)
}
 0x165   : > { %3229 = dma.hbm_to_vmem [thread:$0]  (!%p4843_p9), %s4196_s6, 16, %s4303_s9, %s4198_s10  }
 0x166   : > { %p4846_p7 = scmp.ne.s32.totalorder %s4818_s0, 0 }
 0x167   : > { %s748_s28 = sand.u32 (!%p4846_p7), 1, %s4008_s29   ;;  %s4351_s1 = sand.u32 (!%p4846_p7), 1, %s3822_s25  }
 0x168   : > { %746 = sbr.rel (%p4846_p7) target bundleno = 4387 (0x1123), region = 104  ;;  %s749_s21 = scalar_lea.sflag (!%p4846_p7), [#allocation9], %s748_s28 }
 0x169   : > { %s751_s3 = scalar_lea.vmem (!%p4846_p7), [#allocation8], %s4351_s1  ;;  %p4847_p5 = scmp.ne.s32.totalorder (!%p4846_p7), %s4829_s18, 0 }
 0x16f   : > { %3781 = dma.done.wait (%p4847_p5), %s749_s21, 16  }
 0x170   : > { %3783 = vsyncadd (%p4847_p5), %s749_s21, 4294967280  ;;  %p4848_p4 = scmp.eq.s32.totalorder %s4008_s29, 0 }
 0x172   : > { %3785 = dma.done.wait (%p4848_p4), [#allocation12], 128   ;;  %p4849_p9 = pmov %p4848_p4 }
 0x173   : > { %s763_s0 = scalar_lea.vmem [#allocation13], %s4351_s1 }
 0x174   : > { %3787 = vsyncadd (%p4849_p9), [#allocation12], 4294967168 }
 0x175   : > { %3789 = dma.done.wait (%p4847_p5), %s749_s21, 16  }
 0x176   : > { %3791 = vsyncadd (%p4847_p5), %s749_s21, 4294967280  ;;  %p4850_p10 = pmov %p4848_p4 }
 0x177   : > { %p4851_p12 = pmov %p4848_p4 }
 0x178   : > { %3793 = dma.done.wait (%p4850_p10), [#allocation12], 64  }
 0x179   : > { %3795 = vsyncadd (%p4851_p12), [#allocation12], 4294967232  ;;  %p4852_p6 = pmov %p4848_p4 }
 0x17a   : > { %p4853_p13 = pmov %p4848_p4 }
 0x17b   : > { %3797 = dma.done.wait (%p4852_p6), [#allocation16], 80  }
 0x17c   : > { %3799 = vsyncadd (%p4853_p13), [#allocation16], 4294967216  ;;  %p4854_p0 = pmov %p4848_p4 }
 0x17e   : > { %3801 = dma.done.wait (%p4854_p0), [#allocation19], 272   ;;  %p4855_p8 = pmov %p4854_p0 }
 0x17f   : > { %p4856_p11 = pmov %p4854_p0 }
 0x180   : > { %3803 = vsyncadd (%p4855_p8), [#allocation19], 4294967024 }
 0x181   : > { %3805 = dma.done.wait (%p4856_p11), [#allocation22], 32   ;;  %p4857_p2 = pmov %p4854_p0 }
 0x182   : > { %p4858_p1 = pmov %p4854_p0 }
 0x183   : > { %3807 = vsyncadd (%p4857_p2), [#allocation22], 4294967264 }
 0x184   : > { %3809 = dma.done.wait (%p4858_p1), [#allocation25], 272   ;;  %p4859_p3 = pmov %p4854_p0 }
 0x185   : > { %p869_p7 = scmp.lt.s32.totalorder %s3830_s27, 1  ;;  %s4860_s9 = sld [smem:[#allocation43_spill]]  ;;  %vm886_vm0 = vcmask 261120   ;;  %v3855_v14 = vmov 0.0   ;;  %vm3856_vm1 = vmmov 0   ;;  %vm1053_vm2 = vcmask 60416  }
 0x186   : > { %3811 = vsyncadd (%p4859_p3), [#allocation25], 4294967024  ;;  %s4861_s15 = sld [smem:[#allocation50_spill]]  ;;  %s3854_s30 = smov 96   ;;  %2982 = vmatprep.subr.bf16.mxu0 %v3855_v14  ;;  %2990 = vmatprep.subr.bf16.mxu1 %v3855_v14  ;;  %v2854_v16 = vld [vmem:[#allocation17] ss:$0 sm:$0xff] }
 0x187   : > { %s4389_s18 = scalar_select %p869_p7, %s3830_s27, 1  ;;  %2986 = vmatprep.mubr.msk.bf16.mxu0 %vm3856_vm1, %v3855_v14  ;;  %2994 = vmatprep.mubr.msk.bf16.mxu1 %vm3856_vm1, %v3855_v14  ;;  %v2852_v25 = vld [vmem:[#allocation14] ss:$0 sm:$0xff]  ;;  %v2853_v27 = vld [vmem:[#allocation15] ss:$0 sm:$0xff]  ;;  %vm1271_vm3 = vcmask 64512  }
 0x188   : > { %s4862_s6 = sld [smem:[#allocation44_spill]]  ;;  %s4863_s29 = sld [smem:[#allocation54_spill]]  ;;  %v2858_v59 = vld [vmem:[#allocation23] ss:$0 sm:$0xff]  ;;  %vm1499_vm4 = vcmask 1043456   ;;  %vm1694_vm5 = vcmask 130112  }
 0x189   : > { %s2850_s24 = sshll.u32 %s4389_s18, 3  ;;  %s3857_s18 = smov 112   ;;  %vm1700_vm6 = vcmask 195712   ;;  %vm1706_vm7 = vcmask 261312   ;;  %vm2537_vm8 = vcmask 523264  }
 0x18a   : > { %s3859_s2 = smov 104   ;;  %s3860_s20 = smov 80  }
 0x18b   : > { %s872_s5 = scalar_lea.vmem %s4860_s9, %s2850_s24  ;;  %s3861_s12 = smov 72  }
 0x18c   : > { %v4397_v0 = vld [vmem:[%s872_s5] sm:$0xff]  ;;  %v3329_v13 = vld [vmem:[%s4861_s15 + $0x8] sm:$0xff]   ;;  %s4864_s28 = sld [smem:[#allocation51_spill]]  ;;  %s3863_s9 = smov 16  }
 0x18d   : > { %v887_v1 = vsel %vm886_vm0, %v4397_v0, 0.0  ;;  %v3328_v2 = vld [vmem:[%s4861_s15] sm:$0xff]   ;;  %v3331_v35 = vld [vmem:[%s4861_s15 + $0x8] sm:$0xff]   ;;  %s3864_s5 = smov 8   ;;  %s3865_s13 = smov 24  }
 0x18e   : > { %888 = vadd.xlane.f32.xlu0 %v887_v1  ;;  %v3330_v32 = vld [vmem:[%s4861_s15] sm:$0xff]   ;;  %s876_s10 = scalar_lea.vmem %s4862_s6, %s2850_s24  ;;  %v3333_v40 = vld [vmem:[%s4863_s29 + $0x8] sm:$0xff]   ;;  %s3858_s24 = smov 120  }
 0x18f   : > { %v3332_v38 = vld [vmem:[%s4863_s29] sm:$0xff]   ;;  %s4866_s23 = sld [smem:[#allocation56_spill]]  ;;  %p4872_p4 = scmp.ne.s32.totalorder %s4830_s7, 0 }
 0x190   : > { %v984_v39 = vld [vmem:[%s876_s10] sm:$0xff]  ;;  %2991 = vmatpush3.bf16.msra.mxu1 %v3332_v38 }
 0x191   : > { %2992 = vmatprep.subr.bf16.mxu1 %v3855_v14  ;;  %v990_v41 = vpack.c.bf16 %v984_v39, %v984_v39 }
 0x192   : > { %1137 = vadd.xlane.f32.xlu0 %v887_v1  ;;  %s4865_s21 = smov %s4864_s28 }
 0x194   : > { %2993 = vmatpush3.bf16.msra.mxu1 %v3333_v40 }
 0x195   : > { %3006 = vmatprep.subr.bf16.mxu1 %v3855_v14 }
 0x197   : > { %2995 = vmatmul.mubr.msk.bf16.vlgmr.msra.gmra.mrb[0].mxu1 %vm886_vm0, %v990_v41 }
 0x198   : > { %3008 = vmatprep.mubr.msk.bf16.mxu1 %vm3856_vm1, %v3855_v14 }
 0x1a8   : > { %932 = vrot.lane.b32.xlu0 %v3328_v2, %s3854_s30 }
 0x21b   : > { %v889_v3 = vpop.xlane.xlu0 %888 }
 0x21c   : > { %v891_v4 = vmul.f32 0.03125, %v889_v3 }
 0x21e   : > { %v892_v5 = vsub.f32 %v4397_v0, %v891_v4 }
 0x21f   : > { %v1138_v6 = vpop.xlane.xlu0 %1137 }
 0x220   : > { %v1140_v7 = vmul.f32 0.03125, %v1138_v6  ;;  %v893_v8 = vmul.f32 %v892_v5, %v892_v5 }
 0x222   : > { %v1141_v9 = vsub.f32 %v4397_v0, %v1140_v7  ;;  %v894_v10 = vsel %vm886_vm0, %v893_v8, 0.0 }
 0x223   : > { %895 = vadd.xlane.f32.xlu1 %v894_v10  ;;  %v933_v15 = vpop.permute.xlu0 %932 }
 0x224   : > { %v1142_v11 = vmul.f32 %v1141_v9, %v1141_v9  ;;  %2983 = vmatpush3.bf16.msra.mxu0 %v933_v15 }
 0x225   : > { %2984 = vmatprep.subr.bf16.mxu0 %v3855_v14 }
 0x226   : > { %v1143_v12 = vsel %vm886_vm0, %v1142_v11, 0.0 }
 0x227   : > { %1144 = vadd.xlane.f32.xlu1 %v1143_v12 }
 0x238   : > { %934 = vrot.lane.b32.xlu1 %v3329_v13, %s3854_s30 }
 0x23c   : > { %938 = vrot.lane.b32.xlu1 %v2854_v16, %s3854_s30 }
 0x26a   : > { %v1046_v60 = vpop.f32.mrb[0].mxu1 }
 0x26b   : > { %v1047_v61 = vadd.f32 %v2858_v59, %v1046_v60  ;;  %v2996_v62 = vpop.f32.mrb[1].mxu1 }
 0x26c   : > { %v1049_v63 = vpop.f32.mrb[2].mxu1 }
 0x26d   : > { %v4473_v1 = vpack.c.bf16 %v1047_v61, %v1047_v61  ;;  %v2997_v2 = vpop.f32.mrb[3].mxu1 }
 0x26f   : > { %1063 = vst.msk [vmem:[#allocation4] sm:$0xf] %vm1053_vm2, %v4473_v1 }
 0x2b0   : > { %v896_v17 = vpop.xlane.xlu1 %895 }
 0x2b1   : > { %v897_v18 = vmul.f32 0.03125, %v896_v17 }
 0x2b3   : > { %v898_v19 = vadd.f32 1e-05, %v897_v18 }
 0x2b4   : > { %v1145_v20 = vpop.xlane.xlu1 %1144 }
 0x2b5   : > { %3346 = vrsqrt.f32 %v898_v19  ;;  %v1146_v21 = vmul.f32 0.03125, %v1145_v20 }
 0x2b7   : > { %v1147_v22 = vadd.f32 1e-05, %v1146_v21 }
 0x2b8   : > { %v935_v23 = vpop.permute.xlu1 %934 }
 0x2b9   : > { %3348 = vrsqrt.f32 %v1147_v22  ;;  %2985 = vmatpush3.bf16.msra.mxu0 %v935_v23  ;;  %v2870_v22 = vld [vmem:[%s751_s3] ss:$0 sm:$0xff]  ;;  %s3862_s3 = smov 88  }
 0x2ba   : > { %2998 = vmatprep.subr.bf16.mxu0 %v3855_v14  ;;  %v1229_v23 = vld [vmem:[#allocation11] sm:$0xff] }
 0x2bc   : > { %v939_v42 = vpop.permute.xlu1 %938 }
 0x2bf   : > { %v3347_v24 = vpop.eup %3346 }
 0x2c0   : > { %v900_v26 = vmul.f32 %v3347_v24, %v892_v5  ;;  %v1236_v24 = vadd.f32 %v2870_v22, %v1229_v23 }
 0x2c2   : > { %v905_v28 = vmul.f32 %v2852_v25, %v900_v26 }
 0x2c3   : > { %v3349_v29 = vpop.eup %3348 }
 0x2c4   : > { %v1149_v30 = vmul.f32 %v3349_v29, %v1141_v9  ;;  %v910_v31 = vadd.f32 %v2853_v27, %v905_v28 }
 0x2c6   : > { %v916_v33 = vpack.c.bf16 %v910_v31, %v910_v31  ;;  %v1154_v34 = vmul.f32 %v2852_v25, %v1149_v30 }
 0x2c8   : > { %2987 = vmatmul.mubr.msk.bf16.vlgmr.msra.gmra.mrb[0].mxu0 %vm886_vm0, %v916_v33  ;;  %v1159_v36 = vadd.f32 %v2853_v27, %v1154_v34 }
 0x2c9   : > { %2999 = vmatpush3.bf16.msra.mxu0 %v3330_v32  ;;  %3002 = vmatprep.mubr.msk.bf16.mxu0 %vm3856_vm1, %v3855_v14 }
 0x2ca   : > { %3000 = vmatprep.subr.bf16.mxu0 %v3855_v14  ;;  %v1165_v37 = vpack.c.bf16 %v1159_v36, %v1159_v36 }
 0x2cd   : > { %3001 = vmatpush3.bf16.msra.mxu0 %v3331_v35 }
 0x2ce   : > { %3012 = vmatprep.subr.bf16.mxu0 %v3855_v14 }
 0x2d0   : > { %3003 = vmatmul.mubr.msk.bf16.vlgmr.msra.gmra.mrb[4].mxu0 %vm886_vm0, %v1165_v37 }
 0x2d1   : > { %3014 = vmatprep.mubr.msk.bf16.mxu0 %vm3856_vm1, %v3855_v14 }
 0x39b   : > { %v978_v43 = vpop.f32.mrb[0].mxu0 }
 0x39c   : > { %v979_v44 = vadd.f32 %v978_v43, %v939_v42  ;;  %v2988_v45 = vpop.f32.mrb[1].mxu0 }
 0x39d   : > { %v981_v46 = vpop.f32.mrb[2].mxu0 }
 0x39e   : > { %v4452_v47 = vpack.c.bf16 %v979_v44, %v979_v44  ;;  %v2989_v48 = vpop.f32.mrb[3].mxu0 }
 0x3a0   : > { %1054 = vst.msk [vmem:[#allocation2] sm:$0xf] %vm1053_vm2, %v4452_v47  ;;  %1091 = vrot.lane.b32.xlu0 %v4452_v47, %s3857_s18  ;;  %1071 = vrot.lane.b32.xlu1 %v4452_v47, %s3858_s24 }
 0x3a3   : > { %v1221_v49 = vpop.f32.mrb[4].mxu0 }
 0x3a4   : > { %v1222_v50 = vadd.f32 %v2854_v16, %v1221_v49  ;;  %1111 = vrot.lane.b32.xlu1 %v4452_v47, %s3859_s2  ;;  %v3004_v51 = vpop.f32.mrb[5].mxu0 }
 0x3a5   : > { %v1224_v52 = vpop.f32.mrb[6].mxu0 }
 0x3a6   : > { %v1245_v53 = vmul.f32 0.35355338, %v1222_v50  ;;  %v3005_v54 = vpop.f32.mrb[7].mxu0 }
 0x3a7   : > { %v1237_v55 = vld [vmem:[#allocation2] sm:$0xf] }
 0x3a8   : > { %v1246_v56 = vpack.c.bf16 %v1245_v53, %v1245_v53  ;;  %v1276_v57 = vsel %vm1271_vm3, %v1237_v55, 0 }
 0x3a9   : > { %3007 = vmatpush3.bf16.xpose.msra.mxu1 %v1276_v57 }
 0x3aa   : > { %1248 = vst.msk [vmem:[#allocation6] sm:$0xf] %vm1053_vm2, %v1246_v56  ;;  %1257 = vrot.lane.b32.xlu1 %v1246_v56, %s3857_s18  ;;  %1252 = vrot.lane.b32.xlu0 %v1246_v56, %s3858_s24 }
 0x3ab   : > { %3018 = vmatprep.subr.bf16.mxu1 %v3855_v14 }
 0x3ae   : > { %1058 = vrot.lane.b32.xlu1 %v4452_v47, %s3854_s30  ;;  %1262 = vrot.lane.b32.xlu0 %v1246_v56, %s3859_s2 }
 0x3b1   : > { %v1267_v58 = vld [vmem:[#allocation6] sm:$0xf] }
 0x3b2   : > { %3009 = vmatmul.mubr.msk.bf16.vlgmr.msra.gmra.mrb[4].mxu1 %vm1271_vm3, %v1267_v58 }
 0x3b3   : > { %3020 = vmatprep.mubr.msk.bf16.mxu1 %vm3856_vm1, %v3855_v14 }
 0x412   : > { %v1092_v3 = vpop.permute.xlu0 %1091  ;;  %v1072_v4 = vpop.permute.xlu1 %1071 }
 0x413   : > { %1095 = vst.msk [vmem:[#allocation2 + $0x8] sm:$0xf] %vm1053_vm2, %v1092_v3  ;;  %1075 = vst.msk [vmem:[#allocation2 + $0x4] sm:$0xf] %vm1053_vm2, %v1072_v4 }
 0x416   : > { %v1112_v5 = vpop.permute.xlu1 %1111 }
 0x417   : > { %1115 = vst.msk [vmem:[#allocation2 + $0xc] sm:$0xf] %vm1053_vm2, %v1112_v5 }
 0x41a   : > { %v1238_v6 = vld [vmem:[#allocation2 + $0x4] sm:$0xf]  ;;  %v1239_v7 = vld [vmem:[#allocation2 + $0x8] sm:$0xf] }
 0x41b   : > { %v1322_v8 = vsel %vm1271_vm3, %v1238_v6, 0  ;;  %v1368_v9 = vsel %vm1271_vm3, %v1239_v7, 0 }
 0x41c   : > { %3013 = vmatpush3.bf16.xpose.msra.mxu0 %v1322_v8  ;;  %v1258_v10 = vpop.permute.xlu1 %1257  ;;  %v1253_v11 = vpop.permute.xlu0 %1252  ;;  %3019 = vmatpush3.bf16.xpose.msra.mxu1 %v1368_v9 }
 0x41d   : > { %1261 = vst.msk [vmem:[#allocation6 + $0x8] sm:$0xf] %vm1053_vm2, %v1258_v10  ;;  %1256 = vst.msk [vmem:[#allocation6 + $0x4] sm:$0xf] %vm1053_vm2, %v1253_v11  ;;  %3024 = vmatprep.subr.bf16.mxu0 %v3855_v14  ;;  %3030 = vmatprep.subr.bf16.mxu1 %v3855_v14 }
 0x41e   : > { %v1240_v15 = vld [vmem:[#allocation2 + $0xc] sm:$0xf] }
 0x41f   : > { %v1414_v18 = vsel %vm1271_vm3, %v1240_v15, 0 }
 0x420   : > { %v1059_v12 = vpop.permute.xlu1 %1058  ;;  %v1263_v13 = vpop.permute.xlu0 %1262 }
 0x421   : > { %1061 = vst.msk [vmem:[#allocation3] sm:$0xf] %vm1053_vm2, %v1059_v12  ;;  %1266 = vst.msk [vmem:[#allocation6 + $0xc] sm:$0xf] %vm1053_vm2, %v1263_v13 }
 0x424   : > { %v1268_v16 = vld [vmem:[#allocation6 + $0x4] sm:$0xf]  ;;  %v1269_v17 = vld [vmem:[#allocation6 + $0x8] sm:$0xf] }
 0x425   : > { %3015 = vmatmul.mubr.msk.bf16.vlgmr.msra.gmra.mrb[8].mxu0 %vm1271_vm3, %v1268_v16  ;;  %3021 = vmatmul.mubr.msk.bf16.vlgmr.msra.gmra.mrb[8].mxu1 %vm1271_vm3, %v1269_v17 }
 0x426   : > { %3025 = vmatpush3.bf16.xpose.msra.mxu0 %v1414_v18  ;;  %3026 = vmatprep.mubr.msk.bf16.mxu0 %vm3856_vm1, %v3855_v14 }
 0x427   : > { %3032 = vmatprep.mubr.msk.bf16.mxu1 %vm3856_vm1, %v3855_v14  ;;  %3036 = vmatprep.subr.bf16.mxu0 %v3855_v14 }
 0x428   : > { %v1241_v19 = vld [vmem:[#allocation3] sm:$0xf]  ;;  %v1270_v21 = vld [vmem:[#allocation6 + $0xc] sm:$0xf] }
 0x429   : > { %v1501_v20 = vsel %vm1499_vm4, %v1241_v19, 0 }
 0x42a   : > { %3031 = vmatpush3.bf16.msra.mxu1 %v1501_v20 }
 0x42b   : > { %3042 = vmatprep.subr.bf16.mxu1 %v3855_v14 }
 0x42d   : > { %3027 = vmatmul.mubr.msk.bf16.vlgmr.msra.gmra.mrb[12].mxu0 %vm1271_vm3, %v1270_v21 }
 0x42e   : > { %3038 = vmatprep.mubr.msk.bf16.mxu0 %vm3856_vm1, %v3855_v14 }
 0x485   : > { %v1312_v25 = vpop.f32.mrb[4].mxu1 }
 0x486   : > { %v1313_v26 = vadd.f32 %v1312_v25, %v1236_v24  ;;  %v3010_v27 = vpop.f32.mrb[5].mxu1 }
 0x487   : > { %v1315_v28 = vpop.f32.mrb[6].mxu1 }
 0x488   : > { %v3011_v29 = vpop.f32.mrb[7].mxu1  ;;  %v1456_v30 = vsel %vm1271_vm3, %v1313_v26, -inf }
 0x489   : > { %1457 = vmax.xlane.f32.xlu1 %v1456_v30 }
 0x49a   : > { %1096 = vrot.lane.b32.xlu1 %v4452_v47, %s3860_s20 }
 0x49e   : > { %1116 = vrot.lane.b32.xlu1 %v4452_v47, %s3861_s12 }
 0x4f8   : > { %v1358_v31 = vpop.f32.mrb[8].mxu0  ;;  %v1404_v32 = vpop.f32.mrb[8].mxu1 }
 0x4f9   : > { %v1359_v33 = vadd.f32 %v1358_v31, %v1236_v24  ;;  %v3016_v34 = vpop.f32.mrb[9].mxu0  ;;  %v3022_v35 = vpop.f32.mrb[9].mxu1  ;;  %v1405_v38 = vadd.f32 %v1404_v32, %v1236_v24  ;;  %v3334_v31 = vld [vmem:[%s4864_s28] sm:$0xff]   ;;  %s4870_s28 = sld [smem:[#allocation60_spill]] }
 0x4fa   : > { %v1361_v36 = vpop.f32.mrb[10].mxu0  ;;  %v1407_v37 = vpop.f32.mrb[10].mxu1 }
 0x4fb   : > { %v3017_v39 = vpop.f32.mrb[11].mxu0  ;;  %v3023_v40 = vpop.f32.mrb[11].mxu1  ;;  %v1459_v41 = vsel %vm1271_vm3, %v1359_v33, -inf  ;;  %v1462_v42 = vsel %vm1271_vm3, %v1405_v38, -inf  ;;  %v3335_v36 = vld [vmem:[%s4865_s21 + $0x8] sm:$0xff]  }
 0x4fc   : > { %1460 = vmax.xlane.f32.xlu0 %v1459_v41 }
 0x4ff   : > { %s4871_s6 = smov %s4870_s28 }
 0x500   : > { %1463 = vmax.xlane.f32.xlu0 %v1462_v42  ;;  %v1450_v43 = vpop.f32.mrb[12].mxu0 }
 0x501   : > { %v1451_v44 = vadd.f32 %v1450_v43, %v1236_v24  ;;  %v3028_v45 = vpop.f32.mrb[13].mxu0 }
 0x502   : > { %v1453_v46 = vpop.f32.mrb[14].mxu0 }
 0x503   : > { %v3029_v48 = vpop.f32.mrb[15].mxu0  ;;  %v1465_v49 = vsel %vm1271_vm3, %v1451_v44, -inf }
 0x504   : > { %1466 = vmax.xlane.f32.xlu0 %v1465_v49 }
 0x516   : > { %v1458_v50 = vpop.xlane.xlu1 %1457 }
 0x517   : > { %v1468_v51 = vsub.f32 %v1313_v26, %v1458_v50 }
 0x519   : > { %v1472_v52 = vmul.f32 1.442695, %v1468_v51 }
 0x51a   : > { %v1097_v53 = vpop.permute.xlu1 %1096  ;;  %1076 = vrot.lane.b32.xlu0 %v4452_v47, %s3862_s3 }
 0x51b   : > { %3350 = vpow2.f32 %v1472_v52  ;;  %1100 = vst.msk [vmem:[#allocation3 + $0x8] sm:$0xf] %vm1053_vm2, %v1097_v53 }
 0x51e   : > { %v1117_v54 = vpop.permute.xlu1 %1116 }
 0x51f   : > { %1120 = vst.msk [vmem:[#allocation3 + $0xc] sm:$0xf] %vm1053_vm2, %v1117_v54 }
 0x522   : > { %v1243_v56 = vld [vmem:[#allocation3 + $0x8] sm:$0xf] }
 0x523   : > { %v1593_v58 = vsel %vm1499_vm4, %v1243_v56, 0  ;;  %v1870_v56 = vld [vmem:[#allocation4] sm:$0xf] }
 0x525   : > { %v3351_v55 = vpop.eup %3350 }
 0x526   : > { %v1492_v57 = vpack.c.bf16 %v3351_v55, %v3351_v55  ;;  %v1244_v13 = vld [vmem:[#allocation3 + $0xc] sm:$0xf]  ;;  %v1480_v19 = vsel %vm1271_vm3, %v3351_v55, 0.0 }
 0x527   : > { %v1639_v18 = vsel %vm1499_vm4, %v1244_v13, 0 }
 0x528   : > { %3033 = vmatmul.mubr.msk.bf16.vlgmr.msra.gmra.mrb[12].mxu1 %vm1271_vm3, %v1492_v57 }
 0x529   : > { %3043 = vmatpush3.bf16.msra.mxu1 %v1593_v58  ;;  %3044 = vmatprep.mubr.msk.bf16.mxu1 %vm3856_vm1, %v3855_v14  ;;  %v1910_v58 = vsel %vm1271_vm3, %v1870_v56, 0 }
 0x52a   : > { %3054 = vmatprep.subr.bf16.mxu1 %v3855_v14 }
 0x589   : > { %v1461_v47 = vpop.xlane.xlu0 %1460 }
 0x58a   : > { %v1469_v59 = vsub.f32 %v1359_v33, %v1461_v47  ;;  %v2880_v47 = vld [vmem:[#allocation18] ss:$0 sm:$0xff] }
 0x58c   : > { %v1474_v60 = vmul.f32 1.442695, %v1469_v59 }
 0x58d   : > { %v1464_v61 = vpop.xlane.xlu0 %1463 }
 0x58e   : > { %3352 = vpow2.f32 %v1474_v60  ;;  %v1470_v62 = vsub.f32 %v1405_v38, %v1464_v61 }
 0x590   : > { %v1476_v63 = vmul.f32 1.442695, %v1470_v62 }
 0x591   : > { %v1467_v2 = vpop.xlane.xlu0 %1466 }
 0x592   : > { %3354 = vpow2.f32 %v1476_v63  ;;  %v1471_v3 = vsub.f32 %v1451_v44, %v1467_v2 }
 0x594   : > { %v1478_v4 = vmul.f32 1.442695, %v1471_v3 }
 0x595   : > { %v1077_v5 = vpop.permute.xlu0 %1076 }
 0x596   : > { %3356 = vpow2.f32 %v1478_v4  ;;  %1080 = vst.msk [vmem:[#allocation3 + $0x4] sm:$0xf] %vm1053_vm2, %v1077_v5 }
 0x598   : > { %v3353_v6 = vpop.eup %3352 }
 0x599   : > { %v1483_v7 = vsel %vm1271_vm3, %v3353_v6, 0.0  ;;  %v1493_v16 = vpack.c.bf16 %v3353_v6, %v3353_v6 }
 0x59a   : > { %1484 = vadd.xlane.f32.xlu1 %v1483_v7 }
 0x59c   : > { %v3355_v8 = vpop.eup %3354 }
 0x59d   : > { %v1486_v9 = vsel %vm1271_vm3, %v3355_v8, 0.0  ;;  %v1242_v10 = vld [vmem:[#allocation3 + $0x4] sm:$0xf]  ;;  %v1494_v11 = vpack.c.bf16 %v3355_v8, %v3355_v8 }
 0x59e   : > { %1487 = vadd.xlane.f32.xlu0 %v1486_v9  ;;  %v1547_v12 = vsel %vm1499_vm4, %v1242_v10, 0  ;;  %v3336_v10 = vld [vmem:[#allocation20] sm:$0xff]  }
 0x59f   : > { %3037 = vmatpush3.bf16.msra.mxu0 %v1547_v12  ;;  %3045 = vmatmul.mubr.msk.bf16.vlgmr.msra.gmra.mrb[16].mxu1 %vm1271_vm3, %v1494_v11  ;;  %v3337_v11 = vld [vmem:[#allocation20 + $0x8] sm:$0xff]  }
 0x5a0   : > { %v3357_v15 = vpop.eup %3356  ;;  %3048 = vmatprep.subr.bf16.mxu0 %v3855_v14  ;;  %3058 = vmatprep.mubr.msk.bf16.mxu1 %vm3856_vm1, %v3855_v14 }
 0x5a1   : > { %v1489_v17 = vsel %vm1271_vm3, %v3357_v15, 0.0  ;;  %v1495_v20 = vpack.c.bf16 %v3357_v15, %v3357_v15  ;;  %3055 = vmatpush3.bf16.msra.mxu1 %v3334_v31 }
 0x5a2   : > { %1490 = vadd.xlane.f32.xlu0 %v1489_v17  ;;  %3039 = vmatmul.mubr.msk.bf16.vlgmr.msra.gmra.mrb[16].mxu0 %vm1271_vm3, %v1493_v16 }
 0x5a3   : > { %3049 = vmatpush3.bf16.msra.mxu0 %v1639_v18  ;;  %3050 = vmatprep.mubr.msk.bf16.mxu0 %vm3856_vm1, %v3855_v14  ;;  %v2884_v18 = vld [vmem:[#allocation14 + $0x1] ss:$0 sm:$0xff] }
 0x5a4   : > { %3062 = vmatprep.subr.bf16.mxu0 %v3855_v14  ;;  %3056 = vmatprep.subr.bf16.mxu1 %v3855_v14 }
 0x5a5   : > { %3057 = vmatpush3.bf16.msra.mxu1 %v3335_v36 }
 0x5a6   : > { %1481 = vadd.xlane.f32.xlu0 %v1480_v19  ;;  %3070 = vmatprep.subr.bf16.mxu1 %v3855_v14 }
 0x5aa   : > { %3051 = vmatmul.mubr.msk.bf16.vlgmr.msra.gmra.mrb[20].mxu0 %vm1271_vm3, %v1495_v20  ;;  %v2885_v20 = vld [vmem:[#allocation15 + $0x1] ss:$0 sm:$0xff] }
 0x5ab   : > { %3066 = vmatprep.mubr.msk.bf16.mxu0 %vm3856_vm1, %v3855_v14  ;;  %3063 = vmatpush3.bf16.msra.mxu0 %v3336_v10 }
 0x5ac   : > { %3064 = vmatprep.subr.bf16.mxu0 %v3855_v14 }
 0x5af   : > { %3065 = vmatpush3.bf16.msra.mxu0 %v3337_v11 }
 0x5b0   : > { %3076 = vmatprep.subr.bf16.mxu0 %v3855_v14 }
 0x5fb   : > { %v1537_v21 = vpop.f32.mrb[12].mxu1 }
 0x5fc   : > { %v3034_v22 = vpop.f32.mrb[13].mxu1 }
 0x5fd   : > { %v1540_v23 = vpop.f32.mrb[14].mxu1 }
 0x5fe   : > { %v3035_v24 = vpop.f32.mrb[15].mxu1 }
 0x627   : > { %v1485_v30 = vpop.xlane.xlu1 %1484 }
 0x62b   : > { %v1488_v25 = vpop.xlane.xlu0 %1487 }
 0x62f   : > { %v1491_v26 = vpop.xlane.xlu0 %1490 }
 0x633   : > { %v1482_v27 = vpop.xlane.xlu0 %1481 }
 0x634   : > { %3358 = vrcp.f32 %v1482_v27 }
 0x635   : > { %3360 = vrcp.f32 %v1488_v25 }
 0x636   : > { %3362 = vrcp.f32 %v1485_v30 }
 0x637   : > { %3364 = vrcp.f32 %v1491_v26  ;;  %v2886_v26 = vld [vmem:[#allocation21] ss:$0 sm:$0xff] }
 0x63e   : > { %v3359_v28 = vpop.eup %3358 }
 0x63f   : > { %v1685_v29 = vmul.f32 %v3359_v28, %v1537_v21  ;;  %v3361_v32 = vpop.eup %3360 }
 0x640   : > { %v3363_v38 = vpop.eup %3362 }
 0x641   : > { %1689 = vst.msk [vmem:[#allocation7] sm:$0xff] %vm1271_vm3, %v1685_v29  ;;  %v3365_v45 = vpop.eup %3364 }
 0x672   : > { %v1629_v33 = vpop.f32.mrb[16].mxu1 }
 0x673   : > { %v1687_v34 = vmul.f32 %v3361_v32, %v1629_v33  ;;  %v3046_v35 = vpop.f32.mrb[17].mxu1 }
 0x674   : > { %v1632_v37 = vpop.f32.mrb[18].mxu1 }
 0x675   : > { %v3047_v39 = vpop.f32.mrb[19].mxu1  ;;  %1697 = vrot.lane.b32.xlu0 %v1687_v34, %s3863_s9  ;;  %v1583_v40 = vpop.f32.mrb[16].mxu0 }
 0x676   : > { %v1686_v41 = vmul.f32 %v3363_v38, %v1583_v40  ;;  %v3040_v42 = vpop.f32.mrb[17].mxu0 }
 0x677   : > { %v1586_v43 = vpop.f32.mrb[18].mxu0 }
 0x678   : > { %1691 = vrot.lane.b32.xlu1 %v1686_v41, %s3864_s5  ;;  %v3041_v44 = vpop.f32.mrb[19].mxu0 }
 0x67d   : > { %v1675_v46 = vpop.f32.mrb[20].mxu0 }
 0x67e   : > { %v1688_v48 = vmul.f32 %v3365_v45, %v1675_v46  ;;  %v3052_v49 = vpop.f32.mrb[21].mxu0  ;;  %v2891_v45 = vld [vmem:[%s763_s0] ss:$0 sm:$0xff]  ;;  %s2849_s0 = sshll.u32 %s4351_s1, 3 }
 0x67f   : > { %v1678_v50 = vpop.f32.mrb[22].mxu0 }
 0x680   : > { %1703 = vrot.lane.b32.xlu1 %v1688_v48, %s3865_s13  ;;  %v3053_v51 = vpop.f32.mrb[23].mxu0 }
 0x6e7   : > { %v1698_v53 = vpop.permute.xlu0 %1697 }
 0x6ea   : > { %v1692_v52 = vpop.permute.xlu1 %1691 }
 0x6eb   : > { %1695 = vst.msk [vmem:[#allocation7] sm:$0xff] %vm1694_vm5, %v1692_v52 }
 0x6ec   : > { %1701 = vst.msk [vmem:[#allocation7] sm:$0xff] %vm1700_vm6, %v1698_v53 }
 0x6f2   : > { %v1704_v54 = vpop.permute.xlu1 %1703 }
 0x6f3   : > { %1707 = vst.msk [vmem:[#allocation7] sm:$0xff] %vm1706_vm7, %v1704_v54 }
 0x6fa   : > { %v1708_v55 = vld [vmem:[#allocation7] sm:$0xff] }
 0x6fb   : > { %v1714_v57 = vpack.c.bf16 %v1708_v55, %v1708_v55 }
 0x6fd   : > { %3059 = vmatmul.mubr.msk.bf16.vlgmr.msra.gmra.mrb[20].mxu1 %vm886_vm0, %v1714_v57 }
 0x6fe   : > { %3071 = vmatpush3.bf16.xpose.msra.mxu1 %v1910_v58  ;;  %3072 = vmatprep.mubr.msk.bf16.mxu1 %vm3856_vm1, %v3855_v14 }
 0x6ff   : > { %3082 = vmatprep.subr.bf16.mxu1 %v3855_v14 }
 0x7d0   : > { %v1770_v59 = vpop.f32.mrb[20].mxu1 }
 0x7d1   : > { %v1771_v60 = vadd.f32 %v2880_v47, %v1770_v59  ;;  %v3060_v61 = vpop.f32.mrb[21].mxu1 }
 0x7d2   : > { %v1773_v62 = vpop.f32.mrb[22].mxu1 }
 0x7d3   : > { %v4559_v63 = vadd.f32 %v1771_v60, %v4397_v0  ;;  %v3061_v2 = vpop.f32.mrb[23].mxu1 }
 0x7d5   : > { %v1779_v3 = vsel %vm886_vm0, %v4559_v63, 0.0 }
 0x7d6   : > { %1780 = vadd.xlane.f32.xlu1 %v1779_v3 }
 0x7e7   : > { %1101 = vrot.lane.b32.xlu1 %v4473_v1, %s3857_s18 }
 0x7eb   : > { %1121 = vrot.lane.b32.xlu1 %v4473_v1, %s3859_s2 }
 0x863   : > { %v1781_v4 = vpop.xlane.xlu1 %1780 }
 0x864   : > { %v1782_v5 = vmul.f32 0.03125, %v1781_v4 }
 0x866   : > { %v1783_v6 = vsub.f32 %v4559_v63, %v1782_v5 }
 0x867   : > { %v1102_v7 = vpop.permute.xlu1 %1101 }
 0x868   : > { %1105 = vst.msk [vmem:[#allocation4 + $0x8] sm:$0xf] %vm1053_vm2, %v1102_v7  ;;  %v1784_v0 = vmul.f32 %v1783_v6, %v1783_v6 }
 0x86a   : > { %v1785_v8 = vsel %vm886_vm0, %v1784_v0, 0.0 }
 0x86b   : > { %1786 = vadd.xlane.f32.xlu0 %v1785_v8  ;;  %v1122_v9 = vpop.permute.xlu1 %1121 }
 0x86c   : > { %1125 = vst.msk [vmem:[#allocation4 + $0xc] sm:$0xf] %vm1053_vm2, %v1122_v9 }
 0x86f   : > { %v1872_v34 = vld [vmem:[#allocation4 + $0x8] sm:$0xf] }
 0x870   : > { %v2002_v36 = vsel %vm1271_vm3, %v1872_v34, 0 }
 0x873   : > { %v1873_v40 = vld [vmem:[#allocation4 + $0xc] sm:$0xf] }
 0x874   : > { %v2048_v43 = vsel %vm1271_vm3, %v1873_v40, 0 }
 0x881   : > { %1081 = vrot.lane.b32.xlu0 %v4473_v1, %s3858_s24 }
 0x8f8   : > { %v1787_v12 = vpop.xlane.xlu0 %1786 }
 0x8f9   : > { %v1788_v13 = vmul.f32 0.03125, %v1787_v12 }
 0x8fb   : > { %v1789_v15 = vadd.f32 1e-05, %v1788_v13 }
 0x8fc   : > { %v1082_v16 = vpop.permute.xlu0 %1081 }
 0x8fd   : > { %3366 = vrsqrt.f32 %v1789_v15  ;;  %1085 = vst.msk [vmem:[#allocation4 + $0x4] sm:$0xf] %vm1053_vm2, %v1082_v16 }
 0x904   : > { %v1871_v23 = vld [vmem:[#allocation4 + $0x4] sm:$0xf] }
 0x905   : > { %v1956_v25 = vsel %vm1271_vm3, %v1871_v23, 0 }
 0x907   : > { %v3367_v17 = vpop.eup %3366 }
 0x908   : > { %v1791_v19 = vmul.f32 %v3367_v17, %v1783_v6 }
 0x90a   : > { %v1796_v21 = vmul.f32 %v2884_v18, %v1791_v19 }
 0x90c   : > { %v1801_v22 = vadd.f32 %v2885_v20, %v1796_v21 }
 0x90e   : > { %v1807_v24 = vpack.c.bf16 %v1801_v22, %v1801_v22 }
 0x910   : > { %3067 = vmatmul.mubr.msk.bf16.vlgmr.msra.gmra.mrb[24].mxu0 %vm886_vm0, %v1807_v24 }
 0x911   : > { %3077 = vmatpush3.bf16.xpose.msra.mxu0 %v1956_v25  ;;  %3078 = vmatprep.mubr.msk.bf16.mxu0 %vm3856_vm1, %v3855_v14 }
 0x912   : > { %3088 = vmatprep.subr.bf16.mxu0 %v3855_v14 }
 0x9e3   : > { %v1863_v27 = vpop.f32.mrb[24].mxu0 }
 0x9e4   : > { %v1864_v28 = vadd.f32 %v2886_v26, %v1863_v27  ;;  %v3068_v29 = vpop.f32.mrb[25].mxu0 }
 0x9e5   : > { %v1866_v30 = vpop.f32.mrb[26].mxu0 }
 0x9e6   : > { %v1878_v31 = vmul.f32 0.35355338, %v1864_v28  ;;  %v3069_v32 = vpop.f32.mrb[27].mxu0 }
 0x9e8   : > { %v1879_v33 = vpack.c.bf16 %v1878_v31, %v1878_v31 }
 0x9ea   : > { %1880 = vst.msk [vmem:[#allocation6] sm:$0xf] %vm1053_vm2, %v1879_v33  ;;  %1888 = vrot.lane.b32.xlu0 %v1879_v33, %s3857_s18  ;;  %1884 = vrot.lane.b32.xlu1 %v1879_v33, %s3858_s24  ;;  %s4869_s24 = sld [smem:[#allocation59_spill]] }
 0x9ee   : > { %1892 = vrot.lane.b32.xlu1 %v1879_v33, %s3859_s2  ;;  %s2917_s2 = sshll.u32 %s3830_s27, 7  ;;  %s2592_s27 = scalar_lea.sflag [#allocation10], %s4351_s1 }
 0x9ef   : > { %s4695_s10 = scalar_lea.hbm %s4870_s28, %s2917_s2 }
 0x9f1   : > { %v1896_v35 = vld [vmem:[#allocation6] sm:$0xf] }
 0x9f2   : > { %3073 = vmatmul.mubr.msk.bf16.vlgmr.msra.gmra.mrb[24].mxu1 %vm1271_vm3, %v1896_v35 }
 0x9f3   : > { %3083 = vmatpush3.bf16.xpose.msra.mxu1 %v2002_v36  ;;  %3084 = vmatprep.mubr.msk.bf16.mxu1 %vm3856_vm1, %v3855_v14 }
 0x9f4   : > { %3094 = vmatprep.subr.bf16.mxu1 %v3855_v14 }
 0xa5c   : > { %v1889_v37 = vpop.permute.xlu0 %1888  ;;  %v1885_v38 = vpop.permute.xlu1 %1884 }
 0xa5d   : > { %1891 = vst.msk [vmem:[#allocation6 + $0x8] sm:$0xf] %vm1053_vm2, %v1889_v37  ;;  %1887 = vst.msk [vmem:[#allocation6 + $0x4] sm:$0xf] %vm1053_vm2, %v1885_v38 }
 0xa60   : > { %v1893_v39 = vpop.permute.xlu1 %1892 }
 0xa61   : > { %1895 = vst.msk [vmem:[#allocation6 + $0xc] sm:$0xf] %vm1053_vm2, %v1893_v39 }
 0xa64   : > { %v1897_v41 = vld [vmem:[#allocation6 + $0x4] sm:$0xf]  ;;  %v1898_v42 = vld [vmem:[#allocation6 + $0x8] sm:$0xf] }
 0xa65   : > { %3079 = vmatmul.mubr.msk.bf16.vlgmr.msra.gmra.mrb[28].mxu0 %vm1271_vm3, %v1897_v41  ;;  %3085 = vmatmul.mubr.msk.bf16.vlgmr.msra.gmra.mrb[28].mxu1 %vm1271_vm3, %v1898_v42 }
 0xa66   : > { %3089 = vmatpush3.bf16.xpose.msra.mxu0 %v2048_v43  ;;  %3090 = vmatprep.mubr.msk.bf16.mxu0 %vm3856_vm1, %v3855_v14 }
 0xa67   : > { %3100 = vmatprep.subr.bf16.mxu0 %v3855_v14  ;;  %3096 = vmatprep.mubr.msk.bf16.mxu1 %vm3856_vm1, %v3855_v14 }
 0xa68   : > { %v1899_v44 = vld [vmem:[#allocation6 + $0xc] sm:$0xf] }
 0xa6d   : > { %3091 = vmatmul.mubr.msk.bf16.vlgmr.msra.gmra.mrb[32].mxu0 %vm1271_vm3, %v1899_v44 }
 0xa6e   : > { %3102 = vmatprep.mubr.msk.bf16.mxu0 %vm3856_vm1, %v3855_v14 }
 0xac5   : > { %v1946_v46 = vpop.f32.mrb[24].mxu1 }
 0xac6   : > { %v1947_v48 = vadd.f32 %v2891_v45, %v1946_v46  ;;  %v3074_v49 = vpop.f32.mrb[25].mxu1 }
 0xac7   : > { %v1949_v50 = vpop.f32.mrb[26].mxu1 }
 0xac8   : > { %v3075_v51 = vpop.f32.mrb[27].mxu1  ;;  %v2090_v52 = vsel %vm1271_vm3, %v1947_v48, -inf }
 0xac9   : > { %2091 = vmax.xlane.f32.xlu0 %v2090_v52 }
 0xb38   : > { %v1992_v53 = vpop.f32.mrb[28].mxu0  ;;  %v2038_v54 = vpop.f32.mrb[28].mxu1 }
 0xb39   : > { %v1993_v55 = vadd.f32 %v2891_v45, %v1992_v53  ;;  %v2039_v56 = vadd.f32 %v2891_v45, %v2038_v54  ;;  %v3080_v57 = vpop.f32.mrb[29].mxu0  ;;  %v3086_v58 = vpop.f32.mrb[29].mxu1 }
 0xb3a   : > { %v1995_v47 = vpop.f32.mrb[30].mxu0  ;;  %v2041_v59 = vpop.f32.mrb[30].mxu1 }
 0xb3b   : > { %v3081_v60 = vpop.f32.mrb[31].mxu0  ;;  %v3087_v61 = vpop.f32.mrb[31].mxu1  ;;  %v2096_v62 = vsel %vm1271_vm3, %v2039_v56, -inf  ;;  %v2093_v2 = vsel %vm1271_vm3, %v1993_v55, -inf }
 0xb3c   : > { %2097 = vmax.xlane.f32.xlu0 %v2096_v62  ;;  %2094 = vmax.xlane.f32.xlu1 %v2093_v2  ;;  %v3338_v60 = vld [vmem:[#allocation24] sm:$0xff]  }
 0xb40   : > { %v2084_v3 = vpop.f32.mrb[32].mxu0 }
 0xb41   : > { %v2085_v4 = vadd.f32 %v2891_v45, %v2084_v3  ;;  %v3092_v5 = vpop.f32.mrb[33].mxu0  ;;  %v3339_v3 = vld [vmem:[#allocation24 + $0x8] sm:$0xff]  }
 0xb42   : > { %v2087_v6 = vpop.f32.mrb[34].mxu0 }
 0xb43   : > { %v3093_v7 = vpop.f32.mrb[35].mxu0  ;;  %v2099_v0 = vsel %vm1271_vm3, %v2085_v4, -inf }
 0xb44   : > { %2100 = vmax.xlane.f32.xlu0 %v2099_v0 }
 0xb4d   : > { %1086 = vrot.lane.b32.xlu1 %v4473_v1, %s3862_s3 }
 0xb51   : > { %1106 = vrot.lane.b32.xlu1 %v4473_v1, %s3860_s20  ;;  %s868_s20 = scalar_lea.vmem [#allocation27], %s2849_s0 }
 0xb52   : > { %s2606_s3 = sshll.u32 %s868_s20, 4  ;;  %s4697_s3 = int_to_ptr.vmem [resolvable:$true] %s2606_s3 }
 0xb55   : > { %1126 = vrot.lane.b32.xlu1 %v4473_v1, %s3861_s12  ;;  %s4867_s12 = sld [smem:[#allocation58_spill]] }
 0xb56   : > { %v2092_v8 = vpop.xlane.xlu0 %2091 }
 0xb57   : > { %v2102_v13 = vsub.f32 %v1947_v48, %v2092_v8 }
 0xb59   : > { %v2106_v18 = vmul.f32 1.442695, %v2102_v13 }
 0xb5a   : > { %1067 = vrot.lane.b32.xlu0 %v4473_v1, %s3854_s30 }
 0xbc9   : > { %v2098_v9 = vpop.xlane.xlu0 %2097  ;;  %v2095_v10 = vpop.xlane.xlu1 %2094 }
 0xbca   : > { %v2104_v11 = vsub.f32 %v2039_v56, %v2098_v9  ;;  %v2103_v12 = vsub.f32 %v1993_v55, %v2095_v10 }
 0xbcc   : > { %v2110_v15 = vmul.f32 1.442695, %v2104_v11  ;;  %v2108_v16 = vmul.f32 1.442695, %v2103_v12 }
 0xbcd   : > { %v1087_v17 = vpop.permute.xlu1 %1086 }
 0xbce   : > { %3368 = vpow2.f32 %v2110_v15  ;;  %1090 = vst.msk [vmem:[#allocation5 + $0x4] sm:$0xf] %vm1053_vm2, %v1087_v17 }
 0xbcf   : > { %3370 = vpow2.f32 %v2108_v16 }
 0xbd0   : > { %3372 = vpow2.f32 %v2106_v18  ;;  %v2900_v18 = vld [vmem:[#allocation26] ss:$0 sm:$0xff] }
 0xbd1   : > { %v1107_v19 = vpop.permute.xlu1 %1106  ;;  %v2101_v20 = vpop.xlane.xlu0 %2100 }
 0xbd2   : > { %1110 = vst.msk [vmem:[#allocation5 + $0x8] sm:$0xf] %vm1053_vm2, %v1107_v19  ;;  %v2105_v21 = vsub.f32 %v2085_v4, %v2101_v20 }
 0xbd4   : > { %v2112_v1 = vmul.f32 1.442695, %v2105_v21 }
 0xbd5   : > { %v1127_v22 = vpop.permute.xlu1 %1126  ;;  %v1068_v23 = vpop.permute.xlu0 %1067  ;;  %v1875_v24 = vld [vmem:[#allocation5 + $0x4] sm:$0xf] }
 0xbd6   : > { %3374 = vpow2.f32 %v2112_v1  ;;  %1130 = vst.msk [vmem:[#allocation5 + $0xc] sm:$0xf] %vm1053_vm2, %v1127_v22  ;;  %1070 = vst.msk [vmem:[#allocation5] sm:$0xf] %vm1053_vm2, %v1068_v23  ;;  %v2180_v25 = vsel %vm1499_vm4, %v1875_v24, 0 }
 0xbd7   : > { %3101 = vmatpush3.bf16.msra.mxu0 %v2180_v25 }
 0xbd8   : > { %v3369_v26 = vpop.eup %3368  ;;  %3112 = vmatprep.subr.bf16.mxu0 %v3855_v14 }
 0xbd9   : > { %v3371_v27 = vpop.eup %3370  ;;  %v2120_v28 = vsel %vm1271_vm3, %v3369_v26, 0.0  ;;  %v1876_v36 = vld [vmem:[#allocation5 + $0x8] sm:$0xf]  ;;  %v2128_v43 = vpack.c.bf16 %v3369_v26, %v3369_v26 }
 0xbda   : > { %2121 = vadd.xlane.f32.xlu1 %v2120_v28  ;;  %v2117_v29 = vsel %vm1271_vm3, %v3371_v27, 0.0  ;;  %v2127_v30 = vpack.c.bf16 %v3371_v27, %v3371_v27  ;;  %v3373_v31 = vpop.eup %3372  ;;  %v2226_v41 = vsel %vm1499_vm4, %v1876_v36, 0 }
 0xbdb   : > { %2118 = vadd.xlane.f32.xlu0 %v2117_v29  ;;  %v2126_v38 = vpack.c.bf16 %v3373_v31, %v3373_v31  ;;  %v2114_v42 = vsel %vm1271_vm3, %v3373_v31, 0.0 }
 0xbdc   : > { %3103 = vmatmul.mubr.msk.bf16.vlgmr.msra.gmra.mrb[36].mxu0 %vm1271_vm3, %v2127_v30  ;;  %v3340_v30 = vld [vmem:[%s4866_s23] sm:$0xff]  }
 0xbdd   : > { %v1874_v32 = vld [vmem:[#allocation5] sm:$0xf]  ;;  %v1877_v33 = vld [vmem:[#allocation5 + $0xc] sm:$0xf]  ;;  %3114 = vmatprep.mubr.msk.bf16.mxu0 %vm3856_vm1, %v3855_v14 }
 0xbde   : > { %v2134_v34 = vsel %vm1499_vm4, %v1874_v32, 0  ;;  %v2272_v35 = vsel %vm1499_vm4, %v1877_v33, 0 }
 0xbdf   : > { %3095 = vmatpush3.bf16.msra.mxu1 %v2134_v34  ;;  %3113 = vmatpush3.bf16.msra.mxu0 %v2272_v35  ;;  %v2904_v35 = vld [vmem:[#allocation14 + $0x2] ss:$0 sm:$0xff] }
 0xbe0   : > { %v3375_v37 = vpop.eup %3374  ;;  %3106 = vmatprep.subr.bf16.mxu1 %v3855_v14  ;;  %3126 = vmatprep.subr.bf16.mxu0 %v3855_v14 }
 0xbe1   : > { %v2123_v39 = vsel %vm1271_vm3, %v3375_v37, 0.0  ;;  %v2129_v40 = vpack.c.bf16 %v3375_v37, %v3375_v37  ;;  %v2905_v37 = vld [vmem:[#allocation15 + $0x2] ss:$0 sm:$0xff] }
 0xbe2   : > { %2124 = vadd.xlane.f32.xlu0 %v2123_v39  ;;  %3097 = vmatmul.mubr.msk.bf16.vlgmr.msra.gmra.mrb[32].mxu1 %vm1271_vm3, %v2126_v38 }
 0xbe3   : > { %3107 = vmatpush3.bf16.msra.mxu1 %v2226_v41  ;;  %3108 = vmatprep.mubr.msk.bf16.mxu1 %vm3856_vm1, %v3855_v14  ;;  %v3342_v41 = vld [vmem:[%s4867_s12] sm:$0xff]  }
 0xbe4   : > { %3115 = vmatmul.mubr.msk.bf16.vlgmr.msra.gmra.mrb[40].mxu0 %vm1271_vm3, %v2129_v40  ;;  %3118 = vmatprep.subr.bf16.mxu1 %v3855_v14 }
 0xbe5   : > { %3130 = vmatprep.mubr.msk.bf16.mxu0 %vm3856_vm1, %v3855_v14  ;;  %3127 = vmatpush3.bf16.msra.mxu0 %v3340_v30 }
 0xbe6   : > { %2115 = vadd.xlane.f32.xlu0 %v2114_v42  ;;  %3128 = vmatprep.subr.bf16.mxu0 %v3855_v14  ;;  %v3343_v42 = vld [vmem:[%s4867_s12 + $0x8] sm:$0xff]  }
 0xbea   : > { %3109 = vmatmul.mubr.msk.bf16.vlgmr.msra.gmra.mrb[36].mxu1 %vm1271_vm3, %v2128_v43  ;;  %v3344_v43 = vld [vmem:[%s4867_s12 + $0x10] sm:$0xff]  }
 0xbeb   : > { %3122 = vmatprep.mubr.msk.bf16.mxu1 %vm3856_vm1, %v3855_v14  ;;  %3119 = vmatpush3.bf16.msra.mxu1 %v3338_v60 }
 0xbec   : > { %3120 = vmatprep.subr.bf16.mxu1 %v3855_v14 }
 0xbef   : > { %3121 = vmatpush3.bf16.msra.mxu1 %v3339_v3 }
 0xbf0   : > { %3134 = vmatprep.subr.bf16.mxu1 %v3855_v14 }
 0xc67   : > { %v2122_v50 = vpop.xlane.xlu1 %2121 }
 0xc68   : > { %v2119_v44 = vpop.xlane.xlu0 %2118 }
 0xc69   : > { %3376 = vrcp.f32 %v2119_v44  ;;  %v3345_v44 = vld [vmem:[%s4867_s12 + $0x18] sm:$0xff]  }
 0xc6f   : > { %v2125_v45 = vpop.xlane.xlu0 %2124 }
 0xc73   : > { %v2116_v46 = vpop.xlane.xlu0 %2115  ;;  %v3377_v48 = vpop.eup %3376 }
 0xc74   : > { %3378 = vrcp.f32 %v2116_v46 }
 0xc75   : > { %3380 = vrcp.f32 %v2122_v50 }
 0xc76   : > { %3382 = vrcp.f32 %v2125_v45 }
 0xc7e   : > { %v3379_v55 = vpop.eup %3378 }
 0xc7f   : > { %v3381_v5 = vpop.eup %3380 }
 0xc80   : > { %v3383_v10 = vpop.eup %3382 }
 0xcaf   : > { %v2216_v49 = vpop.f32.mrb[36].mxu0 }
 0xcb0   : > { %v2319_v51 = vmul.f32 %v3377_v48, %v2216_v49  ;;  %v3104_v52 = vpop.f32.mrb[37].mxu0 }
 0xcb1   : > { %v2219_v53 = vpop.f32.mrb[38].mxu0 }
 0xcb2   : > { %2324 = vrot.lane.b32.xlu0 %v2319_v51, %s3864_s5  ;;  %v3105_v54 = vpop.f32.mrb[39].mxu0  ;;  %s3866_s5 = smov [#allocation27]  }
 0xcb5   : > { %v2170_v56 = vpop.f32.mrb[32].mxu1 }
 0xcb6   : > { %v2318_v57 = vmul.f32 %v3379_v55, %v2170_v56  ;;  %v3098_v58 = vpop.f32.mrb[33].mxu1 }
 0xcb7   : > { %v2308_v47 = vpop.f32.mrb[40].mxu0  ;;  %v2173_v59 = vpop.f32.mrb[34].mxu1  ;;  %v2915_v58 = vld [vmem:[%s4869_s24] ss:$0 sm:$0xff] }
 0xcb8   : > { %2322 = vst.msk [vmem:[#allocation7] sm:$0xff] %vm1271_vm3, %v2318_v57  ;;  %v3116_v61 = vpop.f32.mrb[41].mxu0  ;;  %v3099_v62 = vpop.f32.mrb[35].mxu1  ;;  %v2321_v11 = vmul.f32 %v3383_v10, %v2308_v47 }
 0xcb9   : > { %v2311_v2 = vpop.f32.mrb[42].mxu0 }
 0xcba   : > { %v3117_v4 = vpop.f32.mrb[43].mxu0 }
 0xcbd   : > { %v2262_v6 = vpop.f32.mrb[36].mxu1 }
 0xcbe   : > { %v2320_v7 = vmul.f32 %v3381_v5, %v2262_v6  ;;  %v3110_v0 = vpop.f32.mrb[37].mxu1 }
 0xcbf   : > { %v2265_v8 = vpop.f32.mrb[38].mxu1 }
 0xcc0   : > { %2329 = vrot.lane.b32.xlu1 %v2320_v7, %s3863_s9  ;;  %v3111_v9 = vpop.f32.mrb[39].mxu1  ;;  %s3728_s9 = scalar_lea.vmem %s4697_s3, 128 }
 0xcc1   : > { %p3729_p5 = scmp.ne.s32.totalorder %s4697_s3, %s3728_s9 }
 0xcc3   : > { %p3730_p9 = pnand %p3729_p5, %p4872_p4 }
 0xcc4   : > { %2334 = vrot.lane.b32.xlu1 %v2321_v11, %s3865_s13  ;;  %s4868_s13 = sld [smem:[#allocation57_spill]] }
 0xcc5   : > { %p3731_p10 = pneg %p3730_p9 }
 0xcca   : > { %v2906_v45 = vld [vmem:[%s4868_s13] ss:$0 sm:$0xff]  ;;  %s3732_s13 = sshll.u32 %s3866_s5, 4  ;;  %s3733_s13 = int_to_ptr.vmem [resolvable:$false] %s3732_s13 }
 0xccb   : > { %s3734_s0 = scalar_lea.vmem %s3733_s13, 256  ;;  %p3735_p12 = scmp.lt.s32.totalorder %s4697_s3, %s3733_s13 }
 0xccc   : > { %p3736_p6 = scmp.lt.s32.totalorder %s3734_s0, %s3728_s9 }
 0xcce   : > { %p3737_p13 = por %p3736_p6, %p3735_p12 }
 0xcd0   : > { %p3738_p0 = pnand %p3737_p13, %p3731_p10 }
 0xd24   : > { %v2325_v12 = vpop.permute.xlu0 %2324 }
 0xd25   : > { %2327 = vst.msk [vmem:[#allocation7] sm:$0xff] %vm1694_vm5, %v2325_v12 }
 0xd32   : > { %v2330_v13 = vpop.permute.xlu1 %2329 }
 0xd33   : > { %2332 = vst.msk [vmem:[#allocation7] sm:$0xff] %vm1700_vm6, %v2330_v13 }
 0xd36   : > { %v2335_v15 = vpop.permute.xlu1 %2334 }
 0xd37   : > { %2337 = vst.msk [vmem:[#allocation7] sm:$0xff] %vm1706_vm7, %v2335_v15 }
 0xd3e   : > { %v2338_v16 = vld [vmem:[#allocation7] sm:$0xff] }
 0xd3f   : > { %v2344_v17 = vpack.c.bf16 %v2338_v16, %v2338_v16 }
 0xd41   : > { %3123 = vmatmul.mubr.msk.bf16.vlgmr.msra.gmra.mrb[40].mxu1 %vm886_vm0, %v2344_v17 }
 0xd42   : > { %3142 = vmatprep.mubr.msk.bf16.mxu1 %vm3856_vm1, %v3855_v14  ;;  %3135 = vmatpush3.bf16.msra.mxu1 %v3342_v41 }
 0xd43   : > { %3136 = vmatprep.subr.bf16.mxu1 %v3855_v14 }
 0xd46   : > { %3137 = vmatpush3.bf16.msra.mxu1 %v3343_v42 }
 0xd47   : > { %3138 = vmatprep.subr.bf16.mxu1 %v3855_v14 }
 0xd4a   : > { %3139 = vmatpush3.bf16.msra.mxu1 %v3344_v43 }
 0xd4b   : > { %3140 = vmatprep.subr.bf16.mxu1 %v3855_v14 }
 0xd4e   : > { %3141 = vmatpush3.bf16.msra.mxu1 %v3345_v44 }
 0xe14   : > { %v2400_v19 = vpop.f32.mrb[40].mxu1 }
 0xe15   : > { %v2401_v20 = vadd.f32 %v2900_v18, %v2400_v19  ;;  %v3124_v21 = vpop.f32.mrb[41].mxu1 }
 0xe16   : > { %v2403_v1 = vpop.f32.mrb[42].mxu1 }
 0xe17   : > { %v2406_v22 = vadd.f32 %v2401_v20, %v4559_v63  ;;  %v3125_v23 = vpop.f32.mrb[43].mxu1  ;;  %v3341_v63 = vld [vmem:[%s4866_s23 + $0x8] sm:$0xff]  }
 0xe18   : > { %3129 = vmatpush3.bf16.msra.mxu0 %v3341_v63 }
 0xe19   : > { %v2409_v24 = vsel %vm886_vm0, %v2406_v22, 0.0 }
 0xe1a   : > { %2410 = vadd.xlane.f32.xlu1 %v2409_v24 }
 0xea7   : > { %v2411_v25 = vpop.xlane.xlu1 %2410 }
 0xea8   : > { %v2412_v26 = vmul.f32 0.03125, %v2411_v25 }
 0xeaa   : > { %v2413_v27 = vsub.f32 %v2406_v22, %v2412_v26 }
 0xeac   : > { %v2414_v28 = vmul.f32 %v2413_v27, %v2413_v27 }
 0xeae   : > { %v2415_v29 = vsel %vm886_vm0, %v2414_v28, 0.0 }
 0xeaf   : > { %2416 = vadd.xlane.f32.xlu0 %v2415_v29 }
 0xf3c   : > { %v2417_v31 = vpop.xlane.xlu0 %2416 }
 0xf3d   : > { %v2418_v32 = vmul.f32 0.03125, %v2417_v31 }
 0xf3f   : > { %v2419_v33 = vadd.f32 1e-05, %v2418_v32 }
 0xf41   : > { %3384 = vrsqrt.f32 %v2419_v33 }
 0xf4b   : > { %v3385_v34 = vpop.eup %3384 }
 0xf4c   : > { %v2421_v36 = vmul.f32 %v3385_v34, %v2413_v27 }
 0xf4e   : > { %v2426_v38 = vmul.f32 %v2904_v35, %v2421_v36 }
 0xf50   : > { %v2431_v39 = vadd.f32 %v2905_v37, %v2426_v38 }
 0xf52   : > { %v2432_v40 = vpack.c.bf16 %v2431_v39, %v2431_v39 }
 0xf54   : > { %3131 = vmatmul.mubr.msk.bf16.vlgmr.msra.gmra.mrb[44].mxu0 %vm886_vm0, %v2432_v40 }
0x1027   : > { %v2493_v46 = vpop.f32.mrb[44].mxu0 }
0x1028   : > { %v2494_v48 = vadd.f32 %v2906_v45, %v2493_v46  ;;  %v3132_v49 = vpop.f32.mrb[45].mxu0 }
0x1029   : > { %v2496_v50 = vpop.f32.mrb[46].mxu0 }
0x102a   : > { %v2500_v51 = vmul.f32 0.70710677, %v2494_v48  ;;  %v3133_v52 = vpop.f32.mrb[47].mxu0  ;;  %v2499_v14 = vmul.f32 0.5, %v2494_v48 }
0x102c   : > { %3386 = verf.f32 %v2500_v51 }
0x1036   : > { %v3387_v53 = vpop.eup %3386 }
0x1037   : > { %v2502_v54 = vadd.f32 1.0, %v3387_v53 }
0x1039   : > { %v2503_v55 = vmul.f32 %v2502_v54, %v2499_v14 }
0x103b   : > { %v2504_v56 = vpack.c.bf16 %v2503_v55, %v2503_v55 }
0x103d   : > { %3143 = vmatmul.mubr.msk.bf16.vlgmr.msra.gmra.mrb[44].mxu1 %vm2537_vm8, %v2504_v56 }
0x1110   : > { %v2575_v57 = vpop.f32.mrb[44].mxu1 }
0x1111   : > { %v2581_v47 = vadd.f32 %v2575_v57, %v2406_v22  ;;  %v3144_v59 = vpop.f32.mrb[45].mxu1 }
0x1112   : > { %v2578_v60 = vpop.f32.mrb[46].mxu1 }
0x1113   : > { %v2589_v61 = vadd.f32 %v2915_v58, %v2581_v47  ;;  %v3145_v62 = vpop.f32.mrb[47].mxu1 }
0x1115   : > { %2590 = vst.msk [vmem:[%s868_s20] sm:$0xff] %vm886_vm0, %v2589_v61 }
0x1116   : > { %3741 = shalt.err (!%p3738_p0)
}
0x1117   : > { %s3742_s1 = scalar_lea.hbm %s4695_s10, 128  ;;  %s3746_s24 = scalar_lea.hbm %s4871_s6, 256 }
0x1118   : > { %p3743_p8 = scmp.ne.s32.totalorder %s4695_s10, %s3742_s1  ;;  %p3747_p1 = scmp.lt.u32.totalorder %s4695_s10, %s4871_s6 }
0x1119   : > { %p3748_p3 = scmp.lt.u32.totalorder %s3746_s24, %s3742_s1  ;;  %p3750_p5 = scmp.lt.u32.totalorder %s3742_s1, %s4695_s10 }
0x111a   : > { %p3744_p11 = pnand %p3743_p8, %p4872_p4 }
0x111b   : > { %p3749_p7 = por %p3748_p3, %p3747_p1 }
0x111c   : > { %p3745_p2 = pneg %p3744_p11 }
0x111d   : > { %p3751_p9 = por %p3750_p5, %p3749_p7 }
0x111f   : > { %p3752_p10 = pnand %p3751_p9, %p3745_p2 }
0x1121   : > { %3755 = shalt.err (!%p3752_p10)
}
0x1122   : > { %3190 = dma.vmem_to_hbm [thread:$0]  (%p4872_p4), %s4697_s3, 128, %s4695_s10, %s2592_s27  }
0x1123 PF: > { %s4873_s4 = sld [smem:[#allocation37_spill]]  ;;  %s4874_s22 = sld [smem:[#allocation42_spill]] }
0x1124   : > { %s4875_s28 = sld [smem:[#allocation39_spill]] }
0x1129   : > { %s2618_s9 = sand.u32 1, %s4873_s4   ;;  %p4876_p12 = scmp.ne.s32.totalorder %s4874_s22, 0 }
0x112a   : > { %p4877_p6 = scmp.ge.s32.totalorder %s4875_s28, 2  ;;  %s2619_s5 = scalar_lea.sflag [#allocation10], %s2618_s9 }
0x112c   : > { %p3231_p13 = pnand %p4877_p6, %p4876_p12 }
0x112e   : > { %3813 = dma.done.wait (!%p3231_p13), %s2619_s5, 128  }
0x112f   : > { %3815 = vsyncadd (!%p3231_p13), %s2619_s5, 4294967168  ;;  %s42_s28 = sadd.s32 1, %s4875_s28   ;;  %s4878_s7 = sld [smem:[#allocation41_spill]] }
0x1130   : > { %p39_p0 = scmp.ge.s32.totalorder %s42_s28, 4   ;;  %s4879_s27 = sld [smem:[#allocation38_spill]] }
0x1131   : > { %s4880_s3 = sld [smem:[#allocation40_spill]]  ;;  %s4881_s2 = smov %s3822_s25 }
0x1132   : > { %s4882_s25 = smov %s3826_s26  ;;  %41 = sbr.rel (!%p39_p0) target bundleno = 30 (0x1e), region = 227 }
0x1135   : > { %s4883_s26 = smov %s4878_s7 }
0x1139   :  { %2624 = vsyncpa [#allocation9], 1 }
0x113a   :  { %2626 = vsyncpa [#allocation9 + $0x1], 1 }
0x113b   :  { %2627 = vsyncpa [#allocation12], 1 }
0x113c   :  { %2628 = vsyncpa [#allocation16], 1 }
0x113d   :  { %2629 = vsyncpa [#allocation19], 1 }
0x113e   :  { %2630 = vsyncpa [#allocation22], 1 }
0x113f   :  { %2631 = vsyncpa [#allocation25], 1 }
0x1140   :  { %2632 = vsyncpa [#allocation10], 1 }
0x1141   :  { %2634 = vsyncpa [#allocation10 + $0x1], 1 }

</bundles_post_ra>
